<compile_context>
chip_gen: v7x
topology: tpu7x:2x2x1
jax: 0.10.0
libtpu: 0.0.40
codegen_flags: <defaults>
</compile_context>

<pallas_src>
import jax
import jax.numpy as jnp
import numpy as np
from jax.experimental import pallas as pl
from jax.experimental.pallas import tpu as pltpu

HID_CH = 16     # hid_channels
KSIZE = 4       # kernel_size
HIDDEN = 64     # hidden_dim
LATENT = 10     # latent_dim
STRIDE = 2
PAD = 1         # ConvTranspose2d padding


def _round_up(x, m):
    return ((x + m - 1) // m) * m


# ----------------------------------------------------------------------------
# Fused decoder kernel (one grid step = BB samples; grid=(B/BB,) "parallel")
# ----------------------------------------------------------------------------
def make_decoder_kernel(stage_hs, bb, l0p):
    """stage_hs: input spatial sizes (H=W) of every convT stage.
    bb: batch block; l0p: padded lane width of the first conv stage's slab."""
    n_stages = len(stage_hs)

    def kernel(z_ref, w1_ref, b1_ref, w2_ref, b2_ref, w3r_ref, b3r_ref, *rest):
        o_ref = rest[-1]
        stage_refs = rest[:-1]              # alternating (wbig, brow) per stage
        cdt = w1_ref.dtype                  # matmul operand dtype (f32 or bf16)

        # ---- MLP: lin1 -> relu -> lin2 -> relu  (M = BB) ----
        a = jnp.dot(z_ref[...].astype(cdt), w1_ref[...],
                    preferred_element_type=jnp.float32) + b1_ref[...]
        a = jnp.maximum(a, 0.0)
        a = jnp.dot(a.astype(cdt), w2_ref[...],
                    preferred_element_type=jnp.float32) + b2_ref[...]
        a = jnp.maximum(a, 0.0)

        # ---- lin3 (fused, one matmul) -> relu.  Output (BB, KSIZE*l0p);
        #      plane i (lanes [i*l0p,(i+1)*l0p)) is row i+1 of the first conv
        #      stage's horizontally padded slab (vreg-aligned lane slices). ----
        t = jnp.dot(a.astype(cdt), w3r_ref[...],
                    preferred_element_type=jnp.float32) + b3r_ref[...]
        t = jnp.maximum(t, 0.0).astype(cdt)
        planes = [t[:, i * l0p:(i + 1) * l0p][None] for i in range(KSIZE)]
        zrow = jnp.zeros((1, bb, l0p), cdt)
        xp = jnp.concatenate([zrow] + planes + [zrow], axis=0)
        # xp: (KSIZE+2, BB, l0p) — rows on the leading axis, samples on sublanes

        # ---- polyphase ConvTranspose2d stages (block-Toeplitz weights) ----
        # For output-row parity ph and vertical tap a:
        #   Y_ph = sum_a  xp[ph+a : ph+a+H] @ wbig[ph, a]        (M = H*BB)
        # wbig folds the horizontal conv, the width interleave and (for
        # non-final stages) the next stage's horizontal zero padding.
        for s in range(n_stages):
            h = stage_hs[s]
            wbig_ref = stage_refs[2 * s]
            brow = stage_refs[2 * s + 1][...]          # (1, Lout) f32
            lin = wbig_ref.shape[2]
            lout = wbig_ref.shape[3]
            last = s == n_stages - 1

            ys = []
            for ph in range(2):
                x_a = xp[ph:ph + h].reshape(h * bb, lin)
                x_b = xp[ph + 1:ph + 1 + h].reshape(h * bb, lin)
                acc = jnp.dot(x_a, wbig_ref[ph, 0],
                              preferred_element_type=jnp.float32)
                acc = acc + jnp.dot(x_b, wbig_ref[ph, 1],
                                    preferred_element_type=jnp.float32)
                ys.append(acc + brow)

            if last:
                # Lane-dense store: [sigmoid(Y_even) | sigmoid(Y_odd)] on lanes
                # (192 / 384 wide); row interleave + NCHW happen in the wrapper.
                y0 = jax.nn.sigmoid(ys[0]).reshape(h, bb, lout)
                y1 = jax.nn.sigmoid(ys[1]).reshape(h, bb, lout)
                o_ref[...] = jnp.concatenate([y0, y1], axis=-1)
            else:
                y0 = jnp.maximum(ys[0], 0.0).astype(cdt).reshape(h, bb, lout)
                y1 = jnp.maximum(ys[1], 0.0).astype(cdt).reshape(h, bb, lout)
                # Interleave parities + add vertical zero pad rows — all on the
                # LEADING axis (no sublane/lane shuffles; sublane dim stays BB).
                inter = jnp.stack([y0, y1], axis=1).reshape(2 * h, bb, lout)
                zr = jnp.zeros((1, bb, lout), cdt)
                xp = jnp.concatenate([zr, inter, zr], axis=0)   # (2H+2, BB, Lout)

    return kernel


def _const_spec(shape):
    n = len(shape)
    return pl.BlockSpec(tuple(shape), lambda i, _n=n: (0,) * _n)


def _estimate_cost(prep, bpad, hh, lfin, inputs):
    flops = 2 * LATENT * 2 * HIDDEN
    flops += 2 * (2 * HIDDEN) * (2 * HIDDEN)
    flops += 2 * (2 * HIDDEN) * int(prep["w3r"].shape[1])
    for (wbig, _), h in zip(prep["stages"], prep["stage_hs"]):
        flops += 2 * 2 * 2 * h * int(wbig.shape[2]) * int(wbig.shape[3])
    flops = int(flops) * int(bpad)
    trans = int(bpad) * hh * lfin                       # final sigmoid
    bytes_acc = int(sum(int(np.prod(x.shape)) * x.dtype.itemsize for x in inputs)
                    + hh * bpad * lfin * 4)
    return pl.CostEstimate(flops=flops, transcendentals=trans,
                           bytes_accessed=bytes_acc)


def decoder_forward(z, prep, img_size, *, block_batch=None, vmem_limit_mb=32):
    n_chan, hf, wf = img_size
    batch = z.shape[0]
    stage_hs = prep["stage_hs"]
    hh = hf // 2
    lfin = 2 * wf * n_chan

    # Batch block: big enough to fill the MXU, small enough for v7x's 64 MiB
    # VMEM (32 MiB scoped).  Raise block_batch on v5e/v6e if desired.
    if block_batch is None:
        block_batch = 64 if max(hf, wf) <= 32 else 32
    bb = _round_up(min(block_batch, _round_up(batch, 8)), 8)
    bpad = _round_up(batch, bb)
    if bpad != batch:
        z = jnp.concatenate(
            [z, jnp.zeros((bpad - batch, z.shape[1]), z.dtype)], axis=0)
    nblk = bpad // bb

    kernel = make_decoder_kernel(stage_hs, bb, prep["l0p"])

    inputs = [z, prep["w1"], prep["b1"], prep["w2"], prep["b2"],
              prep["w3r"], prep["b3r"]]
    in_specs = [pl.BlockSpec((bb, z.shape[1]), lambda i: (i, 0))]
    in_specs += [_const_spec(x.shape) for x in inputs[1:]]
    for wbig, brow in prep["stages"]:
        inputs += [wbig, brow]
        in_specs += [_const_spec(wbig.shape), _const_spec(brow.shape)]

    out = pl.pallas_call(
        kernel,
        grid=(nblk,),
        out_shape=jax.ShapeDtypeStruct((hh, bpad, lfin), jnp.float32),
        in_specs=in_specs,
        out_specs=pl.BlockSpec((hh, bb, lfin), lambda i: (0, i, 0)),
        compiler_params=pltpu.CompilerParams(
            dimension_semantics=("parallel",),
            vmem_limit_bytes=int(vmem_limit_mb) * 1024 * 1024),
        cost_estimate=_estimate_cost(prep, bpad, hh, lfin, inputs),
    )(*inputs)

    # Layout plumbing in XLA: (Hf/2, B, [parity, W, C]) -> NCHW (B, C, Hf, Wf)
    y = out.reshape(hh, bpad, 2, wf, n_chan)
    y = jnp.transpose(y, (1, 4, 0, 2, 3)).reshape(bpad, n_chan, hf, wf)
    return y[:batch]


# ----------------------------------------------------------------------------
# Host-side (one-time) weight preparation
# ----------------------------------------------------------------------------
def _build_stage_weights(wT, bias, h_in, final):
    """Block-Toeplitz polyphase weights for ConvTranspose2d(stride=2,pad=1,k=4).

    Identity (from y[o] = sum_{i,k: o=2i-1+k} x[i] * W[k]):
      y[2m+ph, 2n+pw, co] = sum_{a,b in {0,1}} sum_ci
          xpad[m+ph+a, n+pw+b, ci] * W[ci, co, 3-ph-2a, 3-pw-2b]
    with xpad = x zero-padded by 1 pixel.  The (n, pw, b, ci, co) part is
    flattened into wbig[ph, a] : ((W+2)*Cin, Lout).  Non-final stages emit the
    next stage's horizontally padded slab (Lout=(2W+2)*Cout, zero bias in the
    pad columns so relu keeps them 0); the final stage emits bare rows.
    """
    wT = np.asarray(wT, np.float32)           # (Cin, Cout, 4, 4) torch layout
    bias = np.asarray(bias, np.float32).reshape(-1)
    cin, cout = wT.shape[0], wT.shape[1]
    w_in = h_in
    w_out = 2 * w_in
    lin = (w_in + 2) * cin
    shift = 0 if final else cout
    lout = w_out * cout + 2 * shift
    wbig = np.zeros((2, 2, lin, lout), np.float32)
    for ph in range(2):
        for a in range(2):
            kh = 3 - ph - 2 * a
            for n in range(w_in):
                for pw in range(2):
                    for b in range(2):
                        kw = 3 - pw - 2 * b
                        ic = (n + pw + b) * cin
                        oc = (2 * n + pw) * cout + shift
                        wbig[ph, a, ic:ic + cin, oc:oc + cout] += wT[:, :, kh, kw]
    brow = np.zeros((1, lout), np.float32)
    brow[0, shift:shift + w_out * cout] = np.tile(bias, w_out)
    return wbig, brow


def _build_lin3_weights(w3, b3, l0p):
    """Fuse lin3's K row-emitting matmuls into one (2*HIDDEN, K*l0p) matrix.
    Plane i (lanes [i*l0p,(i+1)*l0p)) is row i+1 of the first conv stage's
    horizontally padded slab: lane (j+1)*HID_CH + c  <-  torch col c*K*K+i*K+j.
    Pad lanes keep zero weight & bias (relu keeps them 0)."""
    w3 = np.asarray(w3, np.float32)           # (2*HIDDEN, HID_CH*K*K)
    b3 = np.asarray(b3, np.float32).reshape(-1)
    w3f = np.zeros((w3.shape[0], KSIZE * l0p), np.float32)
    b3f = np.zeros((1, KSIZE * l0p), np.float32)
    for i in range(KSIZE):
        for j in range(KSIZE):
            for c in range(HID_CH):
                src = c * KSIZE * KSIZE + i * KSIZE + j
                dst = i * l0p + (j + 1) * HID_CH + c
                w3f[:, dst] = w3[:, src]
                b3f[0, dst] = b3[src]
    return w3f, b3f


def prepare_params(params, img_size, compute_dtype=jnp.float32):
    """All weight prep (flip, polyphase split, Toeplitz expansion, bias tiling,
    lin3 fusion/permutation, optional bf16 cast) done once on the host."""
    l0 = (KSIZE + 2) * HID_CH
    l0p = _round_up(l0, 128)                  # vreg-aligned lin3 plane width
    prep = {
        "w1": jnp.asarray(params["w1"], compute_dtype),
        "b1": jnp.asarray(params["b1"], jnp.float32).reshape(1, -1),
        "w2": jnp.asarray(params["w2"], compute_dtype),
        "b2": jnp.asarray(params["b2"], jnp.float32).reshape(1, -1),
    }
    w3f, b3f = _build_lin3_weights(params["w3"], params["b3"], l0p)
    prep["w3r"] = jnp.asarray(w3f, compute_dtype)
    prep["b3r"] = jnp.asarray(b3f, jnp.float32)

    stage_keys = []
    if img_size[1] == img_size[2] == 64:
        stage_keys.append(("wT64", "bT64"))
    stage_keys += [("wT1", "bT1"), ("wT2", "bT2"), ("wT3", "bT3")]
    stages, stage_hs = [], []
    h = KSIZE
    for idx, (wk, bk) in enumerate(stage_keys):
        final = idx == len(stage_keys) - 1
        wbig, brow = _build_stage_weights(params[wk], params[bk], h, final)
        if idx == 0 and wbig.shape[2] < l0p:
            # Zero-pad the contraction dim to the padded lin3 plane width.
            wbig = np.pad(wbig, ((0, 0), (0, 0), (0, l0p - wbig.shape[2]), (0, 0)))
        stages.append((jnp.asarray(wbig, compute_dtype),
                       jnp.asarray(brow, jnp.float32)))
        stage_hs.append(h)
        h *= 2
    prep["stages"] = stages
    prep["stage_hs"] = tuple(stage_hs)
    prep["l0p"] = l0p
    return prep


# ----------------------------------------------------------------------------
# Pure-JAX reference (zero-insertion formulation) for correctness checking
# ----------------------------------------------------------------------------
def upsample_and_pad(x, stride, pad_amt):
    B, H, W, C = x.shape
    up = jnp.zeros((B, (H - 1) * stride + 1, (W - 1) * stride + 1, C), x.dtype)
    up = up.at[:, ::stride, ::stride, :].set(x)
    return jnp.pad(up, ((0, 0), (pad_amt, pad_amt), (pad_amt, pad_amt), (0, 0)))


def conv_transpose_ref(x, wT, b, activation):
    B, H, W, Cin = x.shape
    K = wT.shape[2]
    Cout = wT.shape[1]
    Ho, Wo = H * STRIDE, W * STRIDE
    x_pad = upsample_and_pad(x, STRIDE, K - 1 - PAD)
    w_conv = jnp.transpose(wT[:, :, ::-1, ::-1], (2, 3, 0, 1))
    acc = jnp.zeros((B, Ho, Wo, Cout), jnp.float32)
    for kh in range(K):
        for kw in range(K):
            patch = x_pad[:, kh:kh + Ho, kw:kw + Wo, :]
            acc = acc + jnp.einsum("bhwc,co->bhwo", patch, w_conv[kh, kw])
    return activation(acc + b.reshape(1, 1, 1, Cout))


def decoder_forward_ref(z, params, img_size):
    relu = lambda v: jnp.maximum(v, 0.0)
    h = relu(z @ params["w1"] + params["b1"])
    h = relu(h @ params["w2"] + params["b2"])
    h = relu(h @ params["w3"] + params["b3"])
    x = h.reshape(z.shape[0], HID_CH, KSIZE, KSIZE).transpose(0, 2, 3, 1)
    if img_size[1] == img_size[2] == 64:
        x = conv_transpose_ref(x, params["wT64"], params["bT64"], relu)
    x = conv_transpose_ref(x, params["wT1"], params["bT1"], relu)
    x = conv_transpose_ref(x, params["wT2"], params["bT2"], relu)
    x = conv_transpose_ref(x, params["wT3"], params["bT3"], jax.nn.sigmoid)
    return x.transpose(0, 3, 1, 2)


# ----------------------------------------------------------------------------
# Deterministic parameter init (shapes follow the nn.Module __init__)
# ----------------------------------------------------------------------------
def init_params(key, img_size, latent_dim=LATENT):
    n_chan = img_size[0]
    keys = jax.random.split(key, 16)

    def lin(kw, kb, fan_in, fan_out):
        bound = 1.0 / np.sqrt(fan_in)
        w = jax.random.uniform(kw, (fan_in, fan_out), jnp.float32, -bound, bound)
        b = jax.random.uniform(kb, (1, fan_out), jnp.float32, -bound, bound)
        return w, b

    def convT(kw, kb, cin, cout, k):
        bound = 1.0 / np.sqrt(cin * k * k)
        w = jax.random.uniform(kw, (cin, cout, k, k), jnp.float32, -bound, bound)
        b = jax.random.uniform(kb, (cout,), jnp.float32, -bound, bound)
        return w, b

    p = {}
    p["w1"], p["b1"] = lin(keys[0], keys[1], latent_dim, HIDDEN * 2)
    p["w2"], p["b2"] = lin(keys[2], keys[3], HIDDEN * 2, HIDDEN * 2)
    p["w3"], p["b3"] = lin(keys[4], keys[5], HIDDEN * 2, HID_CH * KSIZE * KSIZE)
    p["wT1"], p["bT1"] = convT(keys[6], keys[7], HID_CH, HID_CH // 2, KSIZE)
    p["wT2"], p["bT2"] = convT(keys[8], keys[9], HID_CH // 2, HID_CH // 2, KSIZE)
    p["wT3"], p["bT3"] = convT(keys[10], keys[11], HID_CH // 2, n_chan, KSIZE)
    if img_size[1] == img_size[2] == 64:
        p["wT64"], p["bT64"] = convT(keys[12], keys[13], HID_CH, HID_CH, KSIZE)
    return p


if __name__ == "__main__":
    img_size = (3, 32, 32)   # small config: the 64x64-only convT_64 branch is skipped
    B = 32                   # batch-blocked with BB=16 -> grid=(2,)
    key = jax.random.PRNGKey(0)
    kz, kp = jax.random.split(key)
    z = jax.random.normal(kz, (B, LATENT), dtype=jnp.float32)
    params = init_params(kp, img_size)
    ref = decoder_forward_ref(z, params, img_size)

    # --- f32 matmul operands: exact match to the reference ---
    prep_f32 = prepare_params(params, img_size, compute_dtype=jnp.float32)
    fwd_f32 = jax.jit(lambda zz: decoder_forward(zz, prep_f32, img_size,
                                                 block_batch=16))
    out_f32 = jax.block_until_ready(fwd_f32(z))
    assert out_f32.shape == (B, img_size[0], img_size[1], img_size[2]), out_f32.shape
    np.testing.assert_allclose(np.asarray(out_f32), np.asarray(ref),
                               atol=1e-4, rtol=1e-4)

    # --- bf16 matmul operands (f32 accumulate): MXU-friendly on v5e/v6e/v7x ---
    prep_bf16 = prepare_params(params, img_size, compute_dtype=jnp.bfloat16)
    fwd_bf16 = jax.jit(lambda zz: decoder_forward(zz, prep_bf16, img_size,
                                                  block_batch=16))
    out_bf16 = jax.block_until_ready(fwd_bf16(z))
    np.testing.assert_allclose(np.asarray(out_bf16), np.asarray(ref),
                               atol=5e-2, rtol=5e-2)

    print("KERNEL_OK")
</pallas_src>

<mosaic_0001>
module attributes {stable_mosaic.version = 11 : i64} {
  func.func @kernel(%arg0: i32, %arg1: memref<16x10xf32, #tpu.memory_space<vmem>>, %arg2: memref<10x128xf32, #tpu.memory_space<vmem>>, %arg3: memref<1x128xf32, #tpu.memory_space<vmem>>, %arg4: memref<128x128xf32, #tpu.memory_space<vmem>>, %arg5: memref<1x128xf32, #tpu.memory_space<vmem>>, %arg6: memref<128x512xf32, #tpu.memory_space<vmem>>, %arg7: memref<1x512xf32, #tpu.memory_space<vmem>>, %arg8: memref<2x2x128x80xf32, #tpu.memory_space<vmem>>, %arg9: memref<1x80xf32, #tpu.memory_space<vmem>>, %arg10: memref<2x2x80x144xf32, #tpu.memory_space<vmem>>, %arg11: memref<1x144xf32, #tpu.memory_space<vmem>>, %arg12: memref<2x2x144x96xf32, #tpu.memory_space<vmem>>, %arg13: memref<1x96xf32, #tpu.memory_space<vmem>>, %arg14: memref<16x16x192xf32, #tpu.memory_space<vmem>>) attributes {dimension_semantics = [#tpu.dimension_semantics<parallel>], iteration_bounds = array<i64: 2>, scalar_prefetch = 0 : i64, scratch_operands = 0 : i64, tpu.core_type = #tpu.core_type<tc>, window_params = [{transform_indices = @transform_0, window_bounds = array<i64: 16, 10>}, {pipeline_mode = #tpu.pipeline_mode<synchronous>, transform_indices = @transform_1, window_bounds = array<i64: 10, 128>}, {pipeline_mode = #tpu.pipeline_mode<synchronous>, transform_indices = @transform_2, window_bounds = array<i64: 1, 128>}, {pipeline_mode = #tpu.pipeline_mode<synchronous>, transform_indices = @transform_3, window_bounds = array<i64: 128, 128>}, {pipeline_mode = #tpu.pipeline_mode<synchronous>, transform_indices = @transform_4, window_bounds = array<i64: 1, 128>}, {pipeline_mode = #tpu.pipeline_mode<synchronous>, transform_indices = @transform_5, window_bounds = array<i64: 128, 512>}, {pipeline_mode = #tpu.pipeline_mode<synchronous>, transform_indices = @transform_6, window_bounds = array<i64: 1, 512>}, {pipeline_mode = #tpu.pipeline_mode<synchronous>, transform_indices = @transform_7, window_bounds = array<i64: 2, 2, 128, 80>}, {pipeline_mode = #tpu.pipeline_mode<synchronous>, transform_indices = @transform_8, window_bounds = array<i64: 1, 80>}, {pipeline_mode = #tpu.pipeline_mode<synchronous>, transform_indices = @transform_9, window_bounds = array<i64: 2, 2, 80, 144>}, {pipeline_mode = #tpu.pipeline_mode<synchronous>, transform_indices = @transform_10, window_bounds = array<i64: 1, 144>}, {pipeline_mode = #tpu.pipeline_mode<synchronous>, transform_indices = @transform_11, window_bounds = array<i64: 2, 2, 144, 96>}, {pipeline_mode = #tpu.pipeline_mode<synchronous>, transform_indices = @transform_12, window_bounds = array<i64: 1, 96>}, {transform_indices = @transform_13, window_bounds = array<i64: 16, 16, 192>}]} {
    %c0 = arith.constant 0 : index
    %c0_0 = arith.constant 0 : index
    %0 = vector.load %arg1[%c0, %c0_0] : memref<16x10xf32, #tpu.memory_space<vmem>>, vector<16x10xf32>
    %c0_1 = arith.constant 0 : index
    %c0_2 = arith.constant 0 : index
    %1 = vector.load %arg2[%c0_1, %c0_2] : memref<10x128xf32, #tpu.memory_space<vmem>>, vector<10x128xf32>
    %cst = arith.constant dense<0.000000e+00> : vector<16x128xf32>
    %2 = tpu.matmul %0, %1, %cst {dimension_numbers = #tpu.dot_dimension_numbers<[1], [0], [0], [1], [0, 0, 1, 1], [], []>} : vector<16x10xf32>, vector<10x128xf32>, vector<16x128xf32> -> vector<16x128xf32>
    %c0_3 = arith.constant 0 : index
    %c0_4 = arith.constant 0 : index
    %3 = vector.load %arg3[%c0_3, %c0_4] : memref<1x128xf32, #tpu.memory_space<vmem>>, vector<1x128xf32>
    %4 = vector.broadcast %3 : vector<1x128xf32> to vector<16x128xf32>
    %5 = arith.addf %2, %4 : vector<16x128xf32>
    %cst_5 = arith.constant 0.000000e+00 : f32
    %6 = vector.broadcast %cst_5 : f32 to vector<16x128xf32>
    %7 = arith.maximumf %5, %6 : vector<16x128xf32>
    %c0_6 = arith.constant 0 : index
    %c0_7 = arith.constant 0 : index
    %8 = vector.load %arg4[%c0_6, %c0_7] : memref<128x128xf32, #tpu.memory_space<vmem>>, vector<128x128xf32>
    %cst_8 = arith.constant dense<0.000000e+00> : vector<16x128xf32>
    %9 = tpu.matmul %7, %8, %cst_8 {dimension_numbers = #tpu.dot_dimension_numbers<[1], [0], [0], [1], [0, 0, 1, 1], [], []>} : vector<16x128xf32>, vector<128x128xf32>, vector<16x128xf32> -> vector<16x128xf32>
    %c0_9 = arith.constant 0 : index
    %c0_10 = arith.constant 0 : index
    %10 = vector.load %arg5[%c0_9, %c0_10] : memref<1x128xf32, #tpu.memory_space<vmem>>, vector<1x128xf32>
    %11 = vector.broadcast %10 : vector<1x128xf32> to vector<16x128xf32>
    %12 = arith.addf %9, %11 : vector<16x128xf32>
    %cst_11 = arith.constant 0.000000e+00 : f32
    %13 = vector.broadcast %cst_11 : f32 to vector<16x128xf32>
    %14 = arith.maximumf %12, %13 : vector<16x128xf32>
    %c0_12 = arith.constant 0 : index
    %c0_13 = arith.constant 0 : index
    %15 = vector.load %arg6[%c0_12, %c0_13] : memref<128x512xf32, #tpu.memory_space<vmem>>, vector<128x512xf32>
    %cst_14 = arith.constant dense<0.000000e+00> : vector<16x512xf32>
    %16 = tpu.matmul %14, %15, %cst_14 {dimension_numbers = #tpu.dot_dimension_numbers<[1], [0], [0], [1], [0, 0, 1, 1], [], []>} : vector<16x128xf32>, vector<128x512xf32>, vector<16x512xf32> -> vector<16x512xf32>
    %c0_15 = arith.constant 0 : index
    %c0_16 = arith.constant 0 : index
    %17 = vector.load %arg7[%c0_15, %c0_16] : memref<1x512xf32, #tpu.memory_space<vmem>>, vector<1x512xf32>
    %18 = vector.broadcast %17 : vector<1x512xf32> to vector<16x512xf32>
    %19 = arith.addf %16, %18 : vector<16x512xf32>
    %cst_17 = arith.constant 0.000000e+00 : f32
    %20 = vector.broadcast %cst_17 : f32 to vector<16x512xf32>
    %21 = arith.maximumf %19, %20 : vector<16x512xf32>
    %22 = vector.extract_strided_slice %21 {offsets = [0, 0], sizes = [16, 128], strides = [1, 1]} : vector<16x512xf32> to vector<16x128xf32>
    %23 = vector.shape_cast %22 : vector<16x128xf32> to vector<1x16x128xf32>
    %24 = vector.extract_strided_slice %21 {offsets = [0, 128], sizes = [16, 128], strides = [1, 1]} : vector<16x512xf32> to vector<16x128xf32>
    %25 = vector.shape_cast %24 : vector<16x128xf32> to vector<1x16x128xf32>
    %26 = vector.extract_strided_slice %21 {offsets = [0, 256], sizes = [16, 128], strides = [1, 1]} : vector<16x512xf32> to vector<16x128xf32>
    %27 = vector.shape_cast %26 : vector<16x128xf32> to vector<1x16x128xf32>
    %28 = vector.extract_strided_slice %21 {offsets = [0, 384], sizes = [16, 128], strides = [1, 1]} : vector<16x512xf32> to vector<16x128xf32>
    %29 = vector.shape_cast %28 : vector<16x128xf32> to vector<1x16x128xf32>
    %cst_18 = arith.constant 0.000000e+00 : f32
    %30 = vector.broadcast %cst_18 : f32 to vector<1x16x128xf32>
    %31 = tpu.concatenate %30, %23, %25, %27, %29, %30 in 0 : vector<1x16x128xf32>, vector<1x16x128xf32>, vector<1x16x128xf32>, vector<1x16x128xf32>, vector<1x16x128xf32>, vector<1x16x128xf32> -> vector<6x16x128xf32>
    %c0_19 = arith.constant 0 : index
    %c0_20 = arith.constant 0 : index
    %32 = vector.load %arg9[%c0_19, %c0_20] : memref<1x80xf32, #tpu.memory_space<vmem>>, vector<1x80xf32>
    %33 = vector.extract_strided_slice %31 {offsets = [0, 0, 0], sizes = [4, 16, 128], strides = [1, 1, 1]} : vector<6x16x128xf32> to vector<4x16x128xf32>
    %34 = vector.shape_cast %33 : vector<4x16x128xf32> to vector<64x128xf32>
    %35 = vector.extract_strided_slice %31 {offsets = [1, 0, 0], sizes = [4, 16, 128], strides = [1, 1, 1]} : vector<6x16x128xf32> to vector<4x16x128xf32>
    %36 = vector.shape_cast %35 : vector<4x16x128xf32> to vector<64x128xf32>
    %c0_21 = arith.constant 0 : index
    %c0_22 = arith.constant 0 : index
    %c0_23 = arith.constant 0 : index
    %c0_24 = arith.constant 0 : index
    %37 = vector.load %arg8[%c0_21, %c0_22, %c0_23, %c0_24] : memref<2x2x128x80xf32, #tpu.memory_space<vmem>>, vector<1x1x128x80xf32>
    %38 = vector.shape_cast %37 : vector<1x1x128x80xf32> to vector<128x80xf32>
    %cst_25 = arith.constant dense<0.000000e+00> : vector<64x80xf32>
    %39 = tpu.matmul %34, %38, %cst_25 {dimension_numbers = #tpu.dot_dimension_numbers<[1], [0], [0], [1], [0, 0, 1, 1], [], []>} : vector<64x128xf32>, vector<128x80xf32>, vector<64x80xf32> -> vector<64x80xf32>
    %c0_26 = arith.constant 0 : index
    %c1 = arith.constant 1 : index
    %c0_27 = arith.constant 0 : index
    %c0_28 = arith.constant 0 : index
    %40 = vector.load %arg8[%c0_26, %c1, %c0_27, %c0_28] : memref<2x2x128x80xf32, #tpu.memory_space<vmem>>, vector<1x1x128x80xf32>
    %41 = vector.shape_cast %40 : vector<1x1x128x80xf32> to vector<128x80xf32>
    %cst_29 = arith.constant dense<0.000000e+00> : vector<64x80xf32>
    %42 = tpu.matmul %36, %41, %cst_29 {dimension_numbers = #tpu.dot_dimension_numbers<[1], [0], [0], [1], [0, 0, 1, 1], [], []>} : vector<64x128xf32>, vector<128x80xf32>, vector<64x80xf32> -> vector<64x80xf32>
    %43 = arith.addf %39, %42 : vector<64x80xf32>
    %44 = vector.broadcast %32 : vector<1x80xf32> to vector<64x80xf32>
    %45 = arith.addf %43, %44 : vector<64x80xf32>
    %46 = vector.extract_strided_slice %31 {offsets = [1, 0, 0], sizes = [4, 16, 128], strides = [1, 1, 1]} : vector<6x16x128xf32> to vector<4x16x128xf32>
    %47 = vector.shape_cast %46 : vector<4x16x128xf32> to vector<64x128xf32>
    %48 = vector.extract_strided_slice %31 {offsets = [2, 0, 0], sizes = [4, 16, 128], strides = [1, 1, 1]} : vector<6x16x128xf32> to vector<4x16x128xf32>
    %49 = vector.shape_cast %48 : vector<4x16x128xf32> to vector<64x128xf32>
    %c1_30 = arith.constant 1 : index
    %c0_31 = arith.constant 0 : index
    %c0_32 = arith.constant 0 : index
    %c0_33 = arith.constant 0 : index
    %50 = vector.load %arg8[%c1_30, %c0_31, %c0_32, %c0_33] : memref<2x2x128x80xf32, #tpu.memory_space<vmem>>, vector<1x1x128x80xf32>
    %51 = vector.shape_cast %50 : vector<1x1x128x80xf32> to vector<128x80xf32>
    %cst_34 = arith.constant dense<0.000000e+00> : vector<64x80xf32>
    %52 = tpu.matmul %47, %51, %cst_34 {dimension_numbers = #tpu.dot_dimension_numbers<[1], [0], [0], [1], [0, 0, 1, 1], [], []>} : vector<64x128xf32>, vector<128x80xf32>, vector<64x80xf32> -> vector<64x80xf32>
    %c1_35 = arith.constant 1 : index
    %c1_36 = arith.constant 1 : index
    %c0_37 = arith.constant 0 : index
    %c0_38 = arith.constant 0 : index
    %53 = vector.load %arg8[%c1_35, %c1_36, %c0_37, %c0_38] : memref<2x2x128x80xf32, #tpu.memory_space<vmem>>, vector<1x1x128x80xf32>
    %54 = vector.shape_cast %53 : vector<1x1x128x80xf32> to vector<128x80xf32>
    %cst_39 = arith.constant dense<0.000000e+00> : vector<64x80xf32>
    %55 = tpu.matmul %49, %54, %cst_39 {dimension_numbers = #tpu.dot_dimension_numbers<[1], [0], [0], [1], [0, 0, 1, 1], [], []>} : vector<64x128xf32>, vector<128x80xf32>, vector<64x80xf32> -> vector<64x80xf32>
    %56 = arith.addf %52, %55 : vector<64x80xf32>
    %57 = vector.broadcast %32 : vector<1x80xf32> to vector<64x80xf32>
    %58 = arith.addf %56, %57 : vector<64x80xf32>
    %cst_40 = arith.constant 0.000000e+00 : f32
    %59 = vector.broadcast %cst_40 : f32 to vector<64x80xf32>
    %60 = arith.maximumf %45, %59 : vector<64x80xf32>
    %61 = vector.shape_cast %60 : vector<64x80xf32> to vector<4x16x80xf32>
    %cst_41 = arith.constant 0.000000e+00 : f32
    %62 = vector.broadcast %cst_41 : f32 to vector<64x80xf32>
    %63 = arith.maximumf %58, %62 : vector<64x80xf32>
    %64 = vector.shape_cast %63 : vector<64x80xf32> to vector<4x16x80xf32>
    %65 = vector.shape_cast %61 : vector<4x16x80xf32> to vector<4x1x16x80xf32>
    %66 = vector.shape_cast %64 : vector<4x16x80xf32> to vector<4x1x16x80xf32>
    %67 = tpu.concatenate %65, %66 in 1 : vector<4x1x16x80xf32>, vector<4x1x16x80xf32> -> vector<4x2x16x80xf32>
    %68 = vector.shape_cast %67 : vector<4x2x16x80xf32> to vector<8x16x80xf32>
    %cst_42 = arith.constant 0.000000e+00 : f32
    %69 = vector.broadcast %cst_42 : f32 to vector<1x16x80xf32>
    %70 = tpu.concatenate %69, %68, %69 in 0 : vector<1x16x80xf32>, vector<8x16x80xf32>, vector<1x16x80xf32> -> vector<10x16x80xf32>
    %c0_43 = arith.constant 0 : index
    %c0_44 = arith.constant 0 : index
    %71 = vector.load %arg11[%c0_43, %c0_44] : memref<1x144xf32, #tpu.memory_space<vmem>>, vector<1x144xf32>
    %72 = vector.extract_strided_slice %70 {offsets = [0, 0, 0], sizes = [8, 16, 80], strides = [1, 1, 1]} : vector<10x16x80xf32> to vector<8x16x80xf32>
    %73 = vector.shape_cast %72 : vector<8x16x80xf32> to vector<128x80xf32>
    %74 = vector.extract_strided_slice %70 {offsets = [1, 0, 0], sizes = [8, 16, 80], strides = [1, 1, 1]} : vector<10x16x80xf32> to vector<8x16x80xf32>
    %75 = vector.shape_cast %74 : vector<8x16x80xf32> to vector<128x80xf32>
    %c0_45 = arith.constant 0 : index
    %c0_46 = arith.constant 0 : index
    %c0_47 = arith.constant 0 : index
    %c0_48 = arith.constant 0 : index
    %76 = vector.load %arg10[%c0_45, %c0_46, %c0_47, %c0_48] : memref<2x2x80x144xf32, #tpu.memory_space<vmem>>, vector<1x1x80x144xf32>
    %77 = vector.shape_cast %76 : vector<1x1x80x144xf32> to vector<80x144xf32>
    %cst_49 = arith.constant dense<0.000000e+00> : vector<128x144xf32>
    %78 = tpu.matmul %73, %77, %cst_49 {dimension_numbers = #tpu.dot_dimension_numbers<[1], [0], [0], [1], [0, 0, 1, 1], [], []>} : vector<128x80xf32>, vector<80x144xf32>, vector<128x144xf32> -> vector<128x144xf32>
    %c0_50 = arith.constant 0 : index
    %c1_51 = arith.constant 1 : index
    %c0_52 = arith.constant 0 : index
    %c0_53 = arith.constant 0 : index
    %79 = vector.load %arg10[%c0_50, %c1_51, %c0_52, %c0_53] : memref<2x2x80x144xf32, #tpu.memory_space<vmem>>, vector<1x1x80x144xf32>
    %80 = vector.shape_cast %79 : vector<1x1x80x144xf32> to vector<80x144xf32>
    %cst_54 = arith.constant dense<0.000000e+00> : vector<128x144xf32>
    %81 = tpu.matmul %75, %80, %cst_54 {dimension_numbers = #tpu.dot_dimension_numbers<[1], [0], [0], [1], [0, 0, 1, 1], [], []>} : vector<128x80xf32>, vector<80x144xf32>, vector<128x144xf32> -> vector<128x144xf32>
    %82 = arith.addf %78, %81 : vector<128x144xf32>
    %83 = vector.broadcast %71 : vector<1x144xf32> to vector<128x144xf32>
    %84 = arith.addf %82, %83 : vector<128x144xf32>
    %85 = vector.extract_strided_slice %70 {offsets = [1, 0, 0], sizes = [8, 16, 80], strides = [1, 1, 1]} : vector<10x16x80xf32> to vector<8x16x80xf32>
    %86 = vector.shape_cast %85 : vector<8x16x80xf32> to vector<128x80xf32>
    %87 = vector.extract_strided_slice %70 {offsets = [2, 0, 0], sizes = [8, 16, 80], strides = [1, 1, 1]} : vector<10x16x80xf32> to vector<8x16x80xf32>
    %88 = vector.shape_cast %87 : vector<8x16x80xf32> to vector<128x80xf32>
    %c1_55 = arith.constant 1 : index
    %c0_56 = arith.constant 0 : index
    %c0_57 = arith.constant 0 : index
    %c0_58 = arith.constant 0 : index
    %89 = vector.load %arg10[%c1_55, %c0_56, %c0_57, %c0_58] : memref<2x2x80x144xf32, #tpu.memory_space<vmem>>, vector<1x1x80x144xf32>
    %90 = vector.shape_cast %89 : vector<1x1x80x144xf32> to vector<80x144xf32>
    %cst_59 = arith.constant dense<0.000000e+00> : vector<128x144xf32>
    %91 = tpu.matmul %86, %90, %cst_59 {dimension_numbers = #tpu.dot_dimension_numbers<[1], [0], [0], [1], [0, 0, 1, 1], [], []>} : vector<128x80xf32>, vector<80x144xf32>, vector<128x144xf32> -> vector<128x144xf32>
    %c1_60 = arith.constant 1 : index
    %c1_61 = arith.constant 1 : index
    %c0_62 = arith.constant 0 : index
    %c0_63 = arith.constant 0 : index
    %92 = vector.load %arg10[%c1_60, %c1_61, %c0_62, %c0_63] : memref<2x2x80x144xf32, #tpu.memory_space<vmem>>, vector<1x1x80x144xf32>
    %93 = vector.shape_cast %92 : vector<1x1x80x144xf32> to vector<80x144xf32>
    %cst_64 = arith.constant dense<0.000000e+00> : vector<128x144xf32>
    %94 = tpu.matmul %88, %93, %cst_64 {dimension_numbers = #tpu.dot_dimension_numbers<[1], [0], [0], [1], [0, 0, 1, 1], [], []>} : vector<128x80xf32>, vector<80x144xf32>, vector<128x144xf32> -> vector<128x144xf32>
    %95 = arith.addf %91, %94 : vector<128x144xf32>
    %96 = vector.broadcast %71 : vector<1x144xf32> to vector<128x144xf32>
    %97 = arith.addf %95, %96 : vector<128x144xf32>
    %cst_65 = arith.constant 0.000000e+00 : f32
    %98 = vector.broadcast %cst_65 : f32 to vector<128x144xf32>
    %99 = arith.maximumf %84, %98 : vector<128x144xf32>
    %100 = vector.shape_cast %99 : vector<128x144xf32> to vector<8x16x144xf32>
    %cst_66 = arith.constant 0.000000e+00 : f32
    %101 = vector.broadcast %cst_66 : f32 to vector<128x144xf32>
    %102 = arith.maximumf %97, %101 : vector<128x144xf32>
    %103 = vector.shape_cast %102 : vector<128x144xf32> to vector<8x16x144xf32>
    %104 = vector.shape_cast %100 : vector<8x16x144xf32> to vector<8x1x16x144xf32>
    %105 = vector.shape_cast %103 : vector<8x16x144xf32> to vector<8x1x16x144xf32>
    %106 = tpu.concatenate %104, %105 in 1 : vector<8x1x16x144xf32>, vector<8x1x16x144xf32> -> vector<8x2x16x144xf32>
    %107 = vector.shape_cast %106 : vector<8x2x16x144xf32> to vector<16x16x144xf32>
    %cst_67 = arith.constant 0.000000e+00 : f32
    %108 = vector.broadcast %cst_67 : f32 to vector<1x16x144xf32>
    %109 = tpu.concatenate %108, %107, %108 in 0 : vector<1x16x144xf32>, vector<16x16x144xf32>, vector<1x16x144xf32> -> vector<18x16x144xf32>
    %c0_68 = arith.constant 0 : index
    %c0_69 = arith.constant 0 : index
    %110 = vector.load %arg13[%c0_68, %c0_69] : memref<1x96xf32, #tpu.memory_space<vmem>>, vector<1x96xf32>
    %111 = vector.extract_strided_slice %109 {offsets = [0, 0, 0], sizes = [16, 16, 144], strides = [1, 1, 1]} : vector<18x16x144xf32> to vector<16x16x144xf32>
    %112 = vector.shape_cast %111 : vector<16x16x144xf32> to vector<256x144xf32>
    %113 = vector.extract_strided_slice %109 {offsets = [1, 0, 0], sizes = [16, 16, 144], strides = [1, 1, 1]} : vector<18x16x144xf32> to vector<16x16x144xf32>
    %114 = vector.shape_cast %113 : vector<16x16x144xf32> to vector<256x144xf32>
    %c0_70 = arith.constant 0 : index
    %c0_71 = arith.constant 0 : index
    %c0_72 = arith.constant 0 : index
    %c0_73 = arith.constant 0 : index
    %115 = vector.load %arg12[%c0_70, %c0_71, %c0_72, %c0_73] : memref<2x2x144x96xf32, #tpu.memory_space<vmem>>, vector<1x1x144x96xf32>
    %116 = vector.shape_cast %115 : vector<1x1x144x96xf32> to vector<144x96xf32>
    %cst_74 = arith.constant dense<0.000000e+00> : vector<256x96xf32>
    %117 = tpu.matmul %112, %116, %cst_74 {dimension_numbers = #tpu.dot_dimension_numbers<[1], [0], [0], [1], [0, 0, 1, 1], [], []>} : vector<256x144xf32>, vector<144x96xf32>, vector<256x96xf32> -> vector<256x96xf32>
    %c0_75 = arith.constant 0 : index
    %c1_76 = arith.constant 1 : index
    %c0_77 = arith.constant 0 : index
    %c0_78 = arith.constant 0 : index
    %118 = vector.load %arg12[%c0_75, %c1_76, %c0_77, %c0_78] : memref<2x2x144x96xf32, #tpu.memory_space<vmem>>, vector<1x1x144x96xf32>
    %119 = vector.shape_cast %118 : vector<1x1x144x96xf32> to vector<144x96xf32>
    %cst_79 = arith.constant dense<0.000000e+00> : vector<256x96xf32>
    %120 = tpu.matmul %114, %119, %cst_79 {dimension_numbers = #tpu.dot_dimension_numbers<[1], [0], [0], [1], [0, 0, 1, 1], [], []>} : vector<256x144xf32>, vector<144x96xf32>, vector<256x96xf32> -> vector<256x96xf32>
    %121 = arith.addf %117, %120 : vector<256x96xf32>
    %122 = vector.broadcast %110 : vector<1x96xf32> to vector<256x96xf32>
    %123 = arith.addf %121, %122 : vector<256x96xf32>
    %124 = vector.extract_strided_slice %109 {offsets = [1, 0, 0], sizes = [16, 16, 144], strides = [1, 1, 1]} : vector<18x16x144xf32> to vector<16x16x144xf32>
    %125 = vector.shape_cast %124 : vector<16x16x144xf32> to vector<256x144xf32>
    %126 = vector.extract_strided_slice %109 {offsets = [2, 0, 0], sizes = [16, 16, 144], strides = [1, 1, 1]} : vector<18x16x144xf32> to vector<16x16x144xf32>
    %127 = vector.shape_cast %126 : vector<16x16x144xf32> to vector<256x144xf32>
    %c1_80 = arith.constant 1 : index
    %c0_81 = arith.constant 0 : index
    %c0_82 = arith.constant 0 : index
    %c0_83 = arith.constant 0 : index
    %128 = vector.load %arg12[%c1_80, %c0_81, %c0_82, %c0_83] : memref<2x2x144x96xf32, #tpu.memory_space<vmem>>, vector<1x1x144x96xf32>
    %129 = vector.shape_cast %128 : vector<1x1x144x96xf32> to vector<144x96xf32>
    %cst_84 = arith.constant dense<0.000000e+00> : vector<256x96xf32>
    %130 = tpu.matmul %125, %129, %cst_84 {dimension_numbers = #tpu.dot_dimension_numbers<[1], [0], [0], [1], [0, 0, 1, 1], [], []>} : vector<256x144xf32>, vector<144x96xf32>, vector<256x96xf32> -> vector<256x96xf32>
    %c1_85 = arith.constant 1 : index
    %c1_86 = arith.constant 1 : index
    %c0_87 = arith.constant 0 : index
    %c0_88 = arith.constant 0 : index
    %131 = vector.load %arg12[%c1_85, %c1_86, %c0_87, %c0_88] : memref<2x2x144x96xf32, #tpu.memory_space<vmem>>, vector<1x1x144x96xf32>
    %132 = vector.shape_cast %131 : vector<1x1x144x96xf32> to vector<144x96xf32>
    %cst_89 = arith.constant dense<0.000000e+00> : vector<256x96xf32>
    %133 = tpu.matmul %127, %132, %cst_89 {dimension_numbers = #tpu.dot_dimension_numbers<[1], [0], [0], [1], [0, 0, 1, 1], [], []>} : vector<256x144xf32>, vector<144x96xf32>, vector<256x96xf32> -> vector<256x96xf32>
    %134 = arith.addf %130, %133 : vector<256x96xf32>
    %135 = vector.broadcast %110 : vector<1x96xf32> to vector<256x96xf32>
    %136 = arith.addf %134, %135 : vector<256x96xf32>
    %137 = arith.negf %123 : vector<256x96xf32>
    %138 = math.exp %137 : vector<256x96xf32>
    %cst_90 = arith.constant 1.000000e+00 : f32
    %139 = vector.broadcast %cst_90 : f32 to vector<256x96xf32>
    %140 = arith.addf %139, %138 : vector<256x96xf32>
    %141 = arith.divf %139, %140 : vector<256x96xf32>
    %142 = vector.shape_cast %141 : vector<256x96xf32> to vector<16x16x96xf32>
    %143 = arith.negf %136 : vector<256x96xf32>
    %144 = math.exp %143 : vector<256x96xf32>
    %cst_91 = arith.constant 1.000000e+00 : f32
    %145 = vector.broadcast %cst_91 : f32 to vector<256x96xf32>
    %146 = arith.addf %145, %144 : vector<256x96xf32>
    %147 = arith.divf %145, %146 : vector<256x96xf32>
    %148 = vector.shape_cast %147 : vector<256x96xf32> to vector<16x16x96xf32>
    %149 = tpu.concatenate %142, %148 in 2 : vector<16x16x96xf32>, vector<16x16x96xf32> -> vector<16x16x192xf32>
    %c0_92 = arith.constant 0 : index
    %c0_93 = arith.constant 0 : index
    %c0_94 = arith.constant 0 : index
    %150 = vector.load %arg14[%c0_92, %c0_93, %c0_94] : memref<16x16x192xf32, #tpu.memory_space<vmem>>, vector<16x16x192xf32>
    tpu.vector_store %arg14[%c0_92, %c0_93, %c0_94], %149 {strides = array<i32>} : memref<16x16x192xf32, #tpu.memory_space<vmem>>, vector<16x16x192xf32>,
    return
  }
  func.func @transform_0(%arg0: i32) -> (i32, i32) {
    %c0_i32 = arith.constant 0 : i32
    %c0_i32_0 = arith.constant 0 : i32
    return %arg0, %c0_i32 : i32, i32
  }
  func.func @transform_1(%arg0: i32) -> (i32, i32) {
    %c0_i32 = arith.constant 0 : i32
    %c0_i32_0 = arith.constant 0 : i32
    %c0_i32_1 = arith.constant 0 : i32
    return %c0_i32, %c0_i32_0 : i32, i32
  }
  func.func @transform_2(%arg0: i32) -> (i32, i32) {
    %c0_i32 = arith.constant 0 : i32
    %c0_i32_0 = arith.constant 0 : i32
    %c0_i32_1 = arith.constant 0 : i32
    return %c0_i32, %c0_i32_0 : i32, i32
  }
  func.func @transform_3(%arg0: i32) -> (i32, i32) {
    %c0_i32 = arith.constant 0 : i32
    %c0_i32_0 = arith.constant 0 : i32
    %c0_i32_1 = arith.constant 0 : i32
    return %c0_i32, %c0_i32_0 : i32, i32
  }
  func.func @transform_4(%arg0: i32) -> (i32, i32) {
    %c0_i32 = arith.constant 0 : i32
    %c0_i32_0 = arith.constant 0 : i32
    %c0_i32_1 = arith.constant 0 : i32
    return %c0_i32, %c0_i32_0 : i32, i32
  }
  func.func @transform_5(%arg0: i32) -> (i32, i32) {
    %c0_i32 = arith.constant 0 : i32
    %c0_i32_0 = arith.constant 0 : i32
    %c0_i32_1 = arith.constant 0 : i32
    return %c0_i32, %c0_i32_0 : i32, i32
  }
  func.func @transform_6(%arg0: i32) -> (i32, i32) {
    %c0_i32 = arith.constant 0 : i32
    %c0_i32_0 = arith.constant 0 : i32
    %c0_i32_1 = arith.constant 0 : i32
    return %c0_i32, %c0_i32_0 : i32, i32
  }
  func.func @transform_7(%arg0: i32) -> (i32, i32, i32, i32) {
    %c0_i32 = arith.constant 0 : i32
    %c0_i32_0 = arith.constant 0 : i32
    %c0_i32_1 = arith.constant 0 : i32
    %c0_i32_2 = arith.constant 0 : i32
    %c0_i32_3 = arith.constant 0 : i32
    return %c0_i32, %c0_i32_0, %c0_i32_1, %c0_i32_2 : i32, i32, i32, i32
  }
  func.func @transform_8(%arg0: i32) -> (i32, i32) {
    %c0_i32 = arith.constant 0 : i32
    %c0_i32_0 = arith.constant 0 : i32
    %c0_i32_1 = arith.constant 0 : i32
    return %c0_i32, %c0_i32_0 : i32, i32
  }
  func.func @transform_9(%arg0: i32) -> (i32, i32, i32, i32) {
    %c0_i32 = arith.constant 0 : i32
    %c0_i32_0 = arith.constant 0 : i32
    %c0_i32_1 = arith.constant 0 : i32
    %c0_i32_2 = arith.constant 0 : i32
    %c0_i32_3 = arith.constant 0 : i32
    return %c0_i32, %c0_i32_0, %c0_i32_1, %c0_i32_2 : i32, i32, i32, i32
  }
  func.func @transform_10(%arg0: i32) -> (i32, i32) {
    %c0_i32 = arith.constant 0 : i32
    %c0_i32_0 = arith.constant 0 : i32
    %c0_i32_1 = arith.constant 0 : i32
    return %c0_i32, %c0_i32_0 : i32, i32
  }
  func.func @transform_11(%arg0: i32) -> (i32, i32, i32, i32) {
    %c0_i32 = arith.constant 0 : i32
    %c0_i32_0 = arith.constant 0 : i32
    %c0_i32_1 = arith.constant 0 : i32
    %c0_i32_2 = arith.constant 0 : i32
    %c0_i32_3 = arith.constant 0 : i32
    return %c0_i32, %c0_i32_0, %c0_i32_1, %c0_i32_2 : i32, i32, i32, i32
  }
  func.func @transform_12(%arg0: i32) -> (i32, i32) {
    %c0_i32 = arith.constant 0 : i32
    %c0_i32_0 = arith.constant 0 : i32
    %c0_i32_1 = arith.constant 0 : i32
    return %c0_i32, %c0_i32_0 : i32, i32
  }
  func.func @transform_13(%arg0: i32) -> (i32, i32, i32) {
    %c0_i32 = arith.constant 0 : i32
    %c0_i32_0 = arith.constant 0 : i32
    %c0_i32_1 = arith.constant 0 : i32
    return %c0_i32, %arg0, %c0_i32_0 : i32, i32, i32
  }
}

</mosaic_0001>

<bundles_post_ra>
// kernel: _lambda_.1
= control target key start
LH: loop header
LB: loop body
LE: loop exit
PB: predicated region body
PF: predicated region fallthrough
CT: control target
= control target key end

     0   :  { %s8654_s0 = inlined_call_operand.vmem [shape: f32[32,10], index: 0, kind: input, shape index: {}]   ;;  %s8655_s1 = inlined_call_operand.hbm [shape: f32[10,128], index: 1, kind: input, shape index: {}]   ;;  %s8656_s2 = inlined_call_operand.hbm [shape: f32[1,128], index: 2, kind: input, shape index: {}]   ;;  %s8657_s3 = inlined_call_operand.hbm [shape: f32[128,128], index: 3, kind: input, shape index: {}]   ;;  %s8658_s4 = inlined_call_operand.hbm [shape: f32[1,128], index: 4, kind: input, shape index: {}]   ;;  %s8659_s5 = inlined_call_operand.hbm [shape: f32[128,512], index: 5, kind: input, shape index: {}]   ;;  %s8660_s6 = inlined_call_operand.hbm [shape: f32[1,512], index: 6, kind: input, shape index: {}]   ;;  %s8661_s7 = inlined_call_operand.hbm [shape: f32[2,2,128,80], index: 7, kind: input, shape index: {}]   ;;  %s8662_s8 = inlined_call_operand.hbm [shape: f32[1,80], index: 8, kind: input, shape index: {}]   ;;  %s8663_s9 = inlined_call_operand.hbm [shape: f32[2,2,80,144], index: 9, kind: input, shape index: {}]   ;;  %s8664_s10 = inlined_call_operand.hbm [shape: f32[1,144], index: 10, kind: input, shape index: {}]   ;;  %s8665_s11 = inlined_call_operand.hbm [shape: f32[2,2,144,96], index: 11, kind: input, shape index: {}]   ;;  %s8666_s12 = inlined_call_operand.hbm [shape: f32[1,96], index: 12, kind: input, shape index: {}]   ;;  %s8667_s13 = inlined_call_operand.vmem [shape: f32[16,32,192], index: 13, kind: output, shape index: {}]  }
   0x1   :  { %8706 = sst [smem:[#allocation49_spill]] %s8655_s1 }
   0x2   :  { %8707 = sst [smem:[#allocation50_spill]] %s8656_s2 }
   0x3   :  { %8708 = sst [smem:[#allocation51_spill]] %s8657_s3 }
   0x4   :  { %8709 = sst [smem:[#allocation52_spill]] %s8658_s4 }
   0x5   :  { %8710 = sst [smem:[#allocation53_spill]] %s8667_s13 }
   0x6   :  { %18 = vsyncpa [#allocation3], 0 }
   0x7   :  { %19 = vsyncpa [#allocation5], 0 }
   0x8   :  { %20 = vsyncpa [#allocation8], 0 }
   0x9   :  { %21 = vsyncpa [#allocation11], 0 }
   0xa   :  { %22 = vsyncpa [#allocation14], 0 }
   0xb   :  { %23 = vsyncpa [#allocation17], 0 }
   0xc   :  { %24 = vsyncpa [#allocation20], 0  ;;  %s6608_s25 = smov 0   ;;  %s6610_s26 = smov 0  }
   0xd   :  { %s6612_s27 = smov 0  }
   0xe LB: > { %8711 = sst [smem:[#allocation29_spill]] %s6510_s26  ;;  %s6621_s28 = sadd.s32 4294967295, %s6514_s27   ;;  %s6514_s27 = sphi %s6612_s27, %s8779_s27   ;;  %s6510_s26 = sphi %s6610_s26, %s8781_s26   ;;  %s6506_s25 = sphi %s6608_s25, %s8780_s25  }
   0xf   : > { %s6623_s29 = sadd.s32 1, %s6514_s27   ;;  %s315_s14 = sadd.s32 1, %s6510_s26 }
  0x10   : > { %8712 = sst [smem:[#allocation30_spill]] %s6623_s29  ;;  %s312_s30 = ssub.s32 %s6514_s27, %s6623_s29 }
  0x11   : > { %p313_p0 = scmp.eq.s32.totalorder %s312_s30, 0  ;;  %p325_p1 = scmp.ne.s32.totalorder %s6510_s26, %s6506_s25 }
  0x12   : > { %p326_p2 = scmp.eq.s32.totalorder %s6621_s28, 1  ;;  %p4571_p3 = scmp.ge.s32.totalorder %s6514_s27, 1 }
  0x13   : > { %s6631_s15 = scalar_select %p313_p0, %s6510_s26, %s315_s14  }
  0x14   : > { %p6633_p4 = por %p326_p2, %p325_p1  ;;  %p339_p5 = scmp.lt.s32.totalorder %s6514_s27, 3 }
  0x15   : > { %8713 = sst [smem:[#allocation31_spill]] %s6631_s15  ;;  %p8669_p6 = scmp.eq.s32.totalorder %s6621_s28, 0 }
  0x16   : > { %s8714_s16 = scalar_select %p6633_p4, 1, 0 }
  0x17   : > { %p6638_p7 = pnand %p4571_p3, %p339_p5  ;;  %s6516_s18 = smov [#allocation4]  }
  0x18   : > { %s365_s19 = sshll.u32 %s6516_s18, 4  ;;  %s6517_s20 = smov [#allocation7]   ;;  %s366_s19 = int_to_ptr.vmem [resolvable:$true] %s365_s19 }
  0x19   : > { %s8715_s17 = scalar_select %p6638_p7, 1, 0 }
  0x1a   : > { %p5764_p8 = pneg %p6638_p7  ;;  %s389_s21 = sshll.u32 %s6517_s20, 4  ;;  %s6650_s21 = int_to_ptr.vmem [resolvable:$true] %s389_s21 }
  0x1b   : > { %s6518_s23 = smov [#allocation10]   ;;  %s8717_s2 = sld [smem:[#allocation50_spill]] }
  0x1c   : > { %p6646_p9 = pnand %p8669_p6, %p5764_p8  ;;  %s413_s24 = sshll.u32 %s6518_s23, 4  ;;  %s6652_s24 = int_to_ptr.vmem [resolvable:$true] %s413_s24 }
  0x1e   : > { %p6662_p11 = pneg %p6646_p9 }
  0x21   : > { %s6128_s14 = scalar_lea.hbm %s8717_s2, 16 }
  0x22   : > { %p6129_p10 = scmp.ne.s32.totalorder %s8717_s2, %s6128_s14  ;;  %p6135_p0 = scmp.lt.u32.totalorder %s6128_s14, %s8717_s2 }
  0x24   : > { %p6131_p12 = pnand %p6662_p11, %p6129_p10 }
  0x26   : > { %p6132_p13 = pneg %p6131_p12 }
  0x28   : > { %p6137_p1 = pnand %p6135_p0, %p6132_p13 }
  0x2a   : > { %6140 = shalt.err (!%p6137_p1)
}
  0x2b   : > { %s6141_s27 = scalar_lea.vmem %s366_s19, 16  ;;  %s6148_s15 = scalar_lea.vmem %s366_s19, 32 }
  0x2c   : > { %p6142_p2 = scmp.ne.s32.totalorder %s366_s19, %s6141_s27  ;;  %p6149_p8 = scmp.lt.s32.totalorder %s366_s19, %s366_s19 }
  0x2d   : > { %p6150_p6 = scmp.lt.s32.totalorder %s6148_s15, %s6141_s27 }
  0x2e   : > { %p6144_p3 = pnand %p6142_p2, %p6662_p11 }
  0x2f   : > { %p6151_p4 = por %p6150_p6, %p6149_p8 }
  0x30   : > { %p6145_p5 = pneg %p6144_p3 }
  0x32   : > { %p6152_p7 = pnand %p6151_p4, %p6145_p5 }
  0x34   : > { %6155 = shalt.err (!%p6152_p7)
}
  0x35   : > { %5770 = dma.hbm_to_vmem [thread:$0]  (!%p6646_p9), %s8717_s2, 16, %s366_s19, [#allocation5]  }
  0x36   : > { %s8719_s4 = sld [smem:[#allocation52_spill]] }
  0x3c   : > { %s6156_s23 = scalar_lea.hbm %s8719_s4, 16 }
  0x3d   : > { %p6157_p10 = scmp.ne.s32.totalorder %s8719_s4, %s6156_s23  ;;  %p6163_p4 = scmp.lt.u32.totalorder %s6156_s23, %s8719_s4 }
  0x3f   : > { %p6159_p12 = pnand %p6157_p10, %p6662_p11 }
  0x41   : > { %p6160_p6 = pneg %p6159_p12 }
  0x43   : > { %p6165_p7 = pnand %p6163_p4, %p6160_p6 }
  0x45   : > { %6168 = shalt.err (!%p6165_p7)
}
  0x46   : > { %s6169_s19 = scalar_lea.vmem %s6650_s21, 16  ;;  %s6176_s13 = scalar_lea.vmem %s6650_s21, 32 }
  0x47   : > { %p6170_p13 = scmp.ne.s32.totalorder %s6650_s21, %s6169_s19  ;;  %p6177_p2 = scmp.lt.s32.totalorder %s6650_s21, %s6650_s21 }
  0x48   : > { %p6178_p3 = scmp.lt.s32.totalorder %s6176_s13, %s6169_s19 }
  0x49   : > { %p6172_p0 = pnand %p6170_p13, %p6662_p11 }
  0x4a   : > { %p6179_p5 = por %p6178_p3, %p6177_p2 }
  0x4b   : > { %p6173_p1 = pneg %p6172_p0 }
  0x4d   : > { %p6180_p8 = pnand %p6179_p5, %p6173_p1 }
  0x4f   : > { %6183 = shalt.err (!%p6180_p8)
}
  0x50   : > { %5776 = dma.hbm_to_vmem [thread:$0]  (!%p6646_p9), %s8719_s4, 16, %s6650_s21, [#allocation8]  }
  0x51   : > { %s6184_s14 = scalar_lea.hbm %s8660_s6, 64 }
  0x52   : > { %p6185_p10 = scmp.ne.s32.totalorder %s8660_s6, %s6184_s14  ;;  %p6191_p4 = scmp.lt.u32.totalorder %s6184_s14, %s8660_s6 }
  0x54   : > { %p6187_p12 = pnand %p6185_p10, %p6662_p11 }
  0x56   : > { %p6188_p6 = pneg %p6187_p12 }
  0x58   : > { %p6193_p7 = pnand %p6191_p4, %p6188_p6 }
  0x5a   : > { %6196 = shalt.err (!%p6193_p7)
}
  0x5b   : > { %s6197_s21 = scalar_lea.vmem %s6652_s24, 64  ;;  %p6205_p2 = scmp.lt.s32.totalorder %s6652_s24, %s6652_s24 }
  0x5c   : > { %p6198_p13 = scmp.ne.s32.totalorder %s6652_s24, %s6197_s21  ;;  %p6206_p3 = scmp.lt.s32.totalorder %s6197_s21, %s6197_s21 }
  0x5e   : > { %p6200_p0 = pnand %p6198_p13, %p6662_p11  ;;  %p6207_p5 = por %p6206_p3, %p6205_p2 }
  0x60   : > { %p6201_p1 = pneg %p6200_p0 }
  0x62   : > { %p6208_p8 = pnand %p6207_p5, %p6201_p1 }
  0x64   : > { %6211 = shalt.err (!%p6208_p8)
}
  0x65   : > { %5782 = dma.hbm_to_vmem [thread:$0]  (!%p6646_p9), %s8660_s6, 64, %s6652_s24, [#allocation11]  }
  0x66   : > { %s6519_s30 = smov [#allocation13]   ;;  %s6520_s26 = smov [#allocation16]  }
  0x67   : > { %s437_s18 = sshll.u32 %s6519_s30, 4  ;;  %s461_s14 = sshll.u32 %s6520_s26, 4  ;;  %s438_s18 = int_to_ptr.vmem [resolvable:$true] %s437_s18  ;;  %s462_s14 = int_to_ptr.vmem [resolvable:$true] %s461_s14 }
  0x68   : > { %s6212_s15 = scalar_lea.hbm %s8662_s8, 16 }
  0x69   : > { %p6213_p10 = scmp.ne.s32.totalorder %s8662_s8, %s6212_s15  ;;  %p6219_p4 = scmp.lt.u32.totalorder %s6212_s15, %s8662_s8 }
  0x6b   : > { %p6215_p12 = pnand %p6213_p10, %p6662_p11 }
  0x6d   : > { %p6216_p6 = pneg %p6215_p12 }
  0x6f   : > { %p6221_p7 = pnand %p6219_p4, %p6216_p6 }
  0x71   : > { %6224 = shalt.err (!%p6221_p7)
}
  0x72   : > { %s6225_s24 = scalar_lea.vmem %s438_s18, 16  ;;  %s6232_s29 = scalar_lea.vmem %s438_s18, 32 }
  0x73   : > { %p6226_p13 = scmp.ne.s32.totalorder %s438_s18, %s6225_s24  ;;  %p6233_p2 = scmp.lt.s32.totalorder %s438_s18, %s438_s18 }
  0x74   : > { %p6234_p3 = scmp.lt.s32.totalorder %s6232_s29, %s6225_s24 }
  0x75   : > { %p6228_p0 = pnand %p6226_p13, %p6662_p11 }
  0x76   : > { %p6235_p5 = por %p6234_p3, %p6233_p2 }
  0x77   : > { %p6229_p1 = pneg %p6228_p0 }
  0x79   : > { %p6236_p8 = pnand %p6235_p5, %p6229_p1 }
  0x7b   : > { %6239 = shalt.err (!%p6236_p8)
}
  0x7c   : > { %5788 = dma.hbm_to_vmem [thread:$0]  (!%p6646_p9), %s8662_s8, 16, %s438_s18, [#allocation14]  }
  0x7d   : > { %s6240_s27 = scalar_lea.hbm %s8664_s10, 32 }
  0x7e   : > { %p6241_p10 = scmp.ne.s32.totalorder %s8664_s10, %s6240_s27  ;;  %p6247_p4 = scmp.lt.u32.totalorder %s6240_s27, %s8664_s10 }
  0x80   : > { %p6243_p12 = pnand %p6241_p10, %p6662_p11 }
  0x82   : > { %p6244_p6 = pneg %p6243_p12 }
  0x84   : > { %p6249_p7 = pnand %p6247_p4, %p6244_p6 }
  0x86   : > { %6252 = shalt.err (!%p6249_p7)
}
  0x87   : > { %s6253_s24 = scalar_lea.vmem %s462_s14, 32  ;;  %p6261_p2 = scmp.lt.s32.totalorder %s462_s14, %s462_s14 }
  0x88   : > { %p6254_p13 = scmp.ne.s32.totalorder %s462_s14, %s6253_s24  ;;  %p6262_p3 = scmp.lt.s32.totalorder %s6253_s24, %s6253_s24 }
  0x8a   : > { %p6256_p0 = pnand %p6254_p13, %p6662_p11  ;;  %p6263_p5 = por %p6262_p3, %p6261_p2 }
  0x8c   : > { %p6257_p1 = pneg %p6256_p0 }
  0x8e   : > { %p6264_p8 = pnand %p6263_p5, %p6257_p1 }
  0x90   : > { %6267 = shalt.err (!%p6264_p8)
}
  0x91   : > { %5794 = dma.hbm_to_vmem [thread:$0]  (!%p6646_p9), %s8664_s10, 32, %s462_s14, [#allocation17]  }
  0x92   : > { %s6521_s30 = smov [#allocation2]   ;;  %s8720_s1 = sld [smem:[#allocation49_spill]] }
  0x93   : > { %s351_s26 = sshll.u32 %s6521_s30, 4  ;;  %s352_s26 = int_to_ptr.vmem [resolvable:$true] %s351_s26 }
  0x98   : > { %s6268_s27 = scalar_lea.hbm %s8720_s1, 256 }
  0x99   : > { %p6269_p10 = scmp.ne.s32.totalorder %s8720_s1, %s6268_s27  ;;  %p6275_p4 = scmp.lt.u32.totalorder %s6268_s27, %s8720_s1 }
  0x9b   : > { %p6271_p12 = pnand %p6269_p10, %p6662_p11 }
  0x9d   : > { %p6272_p6 = pneg %p6271_p12 }
  0x9f   : > { %p6277_p7 = pnand %p6275_p4, %p6272_p6 }
  0xa1   : > { %6280 = shalt.err (!%p6277_p7)
}
  0xa2   : > { %s6281_s14 = scalar_lea.vmem %s352_s26, 256  ;;  %p6289_p2 = scmp.lt.s32.totalorder %s352_s26, %s352_s26 }
  0xa3   : > { %p6282_p13 = scmp.ne.s32.totalorder %s352_s26, %s6281_s14  ;;  %p6290_p3 = scmp.lt.s32.totalorder %s6281_s14, %s6281_s14 }
  0xa5   : > { %p6284_p0 = pnand %p6282_p13, %p6662_p11  ;;  %p6291_p5 = por %p6290_p3, %p6289_p2 }
  0xa7   : > { %p6285_p1 = pneg %p6284_p0 }
  0xa9   : > { %p6292_p8 = pnand %p6291_p5, %p6285_p1 }
  0xab   : > { %6295 = shalt.err (!%p6292_p8)
}
  0xac   : > { %s8673_s24 = smov 128   ;;  %s8675_s18 = smov 8  }
  0xad   : > { %5767 = dma.hbm_to_vmem [thread:$0]  (!%p6646_p9), %s8720_s1, 256, %s352_s26, [#allocation3], %s8673_s24, %s8673_s24, %s8675_s18  }
  0xae   : > { %s6524_s2 = smov [#allocation6]   ;;  %s6525_s27 = smov [#allocation9]  }
  0xaf   : > { %s375_s23 = sshll.u32 %s6524_s2, 4  ;;  %s399_s15 = sshll.u32 %s6525_s27, 4  ;;  %s376_s23 = int_to_ptr.vmem [resolvable:$true] %s375_s23  ;;  %s6782_s15 = int_to_ptr.vmem [resolvable:$true] %s399_s15 }
  0xb0   : > { %s8721_s3 = sld [smem:[#allocation51_spill]] }
  0xb6   : > { %s6296_s13 = scalar_lea.hbm %s8721_s3, 2048 }
  0xb7   : > { %p6297_p10 = scmp.ne.s32.totalorder %s8721_s3, %s6296_s13  ;;  %p6303_p4 = scmp.lt.u32.totalorder %s6296_s13, %s8721_s3 }
  0xb9   : > { %p6299_p12 = pnand %p6297_p10, %p6662_p11 }
  0xbb   : > { %p6300_p6 = pneg %p6299_p12 }
  0xbd   : > { %p6305_p7 = pnand %p6303_p4, %p6300_p6 }
  0xbf   : > { %6308 = shalt.err (!%p6305_p7)
}
  0xc0   : > { %s6309_s30 = scalar_lea.vmem %s376_s23, 2048  ;;  %p6317_p2 = scmp.lt.s32.totalorder %s376_s23, %s376_s23 }
  0xc1   : > { %p6310_p13 = scmp.ne.s32.totalorder %s376_s23, %s6309_s30  ;;  %p6318_p3 = scmp.lt.s32.totalorder %s6309_s30, %s6309_s30 }
  0xc3   : > { %p6312_p0 = pnand %p6310_p13, %p6662_p11  ;;  %p6319_p5 = por %p6318_p3, %p6317_p2 }
  0xc5   : > { %p6313_p1 = pneg %p6312_p0 }
  0xc7   : > { %p6320_p8 = pnand %p6319_p5, %p6313_p1 }
  0xc9   : > { %6323 = shalt.err (!%p6320_p8)
}
  0xca   : > { %5773 = dma.hbm_to_vmem [thread:$0]  (!%p6646_p9), %s8721_s3, 2048, %s376_s23, [#allocation5], %s8673_s24, %s8673_s24, %s8675_s18  }
  0xcb   : > { %s6324_s21 = scalar_lea.hbm %s8659_s5, 8192 }
  0xcc   : > { %p6325_p10 = scmp.ne.s32.totalorder %s8659_s5, %s6324_s21  ;;  %p6331_p4 = scmp.lt.u32.totalorder %s6324_s21, %s8659_s5 }
  0xce   : > { %p6327_p12 = pnand %p6325_p10, %p6662_p11 }
  0xd0   : > { %p6328_p6 = pneg %p6327_p12 }
  0xd2   : > { %p6333_p7 = pnand %p6331_p4, %p6328_p6 }
  0xd4   : > { %6336 = shalt.err (!%p6333_p7)
}
  0xd5   : > { %s6337_s23 = scalar_lea.vmem %s6782_s15, 8192  ;;  %p6345_p2 = scmp.lt.s32.totalorder %s6782_s15, %s6782_s15 }
  0xd6   : > { %p6338_p13 = scmp.ne.s32.totalorder %s6782_s15, %s6337_s23  ;;  %p6346_p3 = scmp.lt.s32.totalorder %s6337_s23, %s6337_s23 }
  0xd8   : > { %p6340_p0 = pnand %p6338_p13, %p6662_p11  ;;  %p6347_p5 = por %p6346_p3, %p6345_p2 }
  0xda   : > { %p6341_p1 = pneg %p6340_p0 }
  0xdc   : > { %p6348_p8 = pnand %p6347_p5, %p6341_p1 }
  0xde   : > { %6351 = shalt.err (!%p6348_p8)
}
  0xdf   : > { %s6526_s30 = smov 512   ;;  %s6527_s4 = smov 32  }
  0xe0   : > { %5779 = dma.hbm_to_vmem [thread:$0]  (!%p6646_p9), %s8659_s5, 8192, %s6782_s15, [#allocation8], %s6526_s30, %s6526_s30, %s6527_s4  }
  0xe1   : > { %s6528_s19 = smov [#allocation12]   ;;  %s6529_s13 = smov [#allocation15]  }
  0xe2   : > { %s423_s21 = sshll.u32 %s6528_s19, 4  ;;  %s447_s14 = sshll.u32 %s6529_s13, 4  ;;  %s424_s21 = int_to_ptr.vmem [resolvable:$true] %s423_s21  ;;  %s6828_s14 = int_to_ptr.vmem [resolvable:$true] %s447_s14 }
  0xe3   : > { %s6352_s23 = scalar_lea.hbm %s8661_s7, 8192 }
  0xe4   : > { %p6353_p10 = scmp.ne.s32.totalorder %s8661_s7, %s6352_s23  ;;  %p6359_p4 = scmp.lt.u32.totalorder %s6352_s23, %s8661_s7 }
  0xe6   : > { %p6355_p12 = pnand %p6353_p10, %p6662_p11 }
  0xe8   : > { %p6356_p6 = pneg %p6355_p12 }
  0xea   : > { %p6361_p7 = pnand %p6359_p4, %p6356_p6 }
  0xec   : > { %6364 = shalt.err (!%p6361_p7)
}
  0xed   : > { %s6365_s30 = scalar_lea.vmem %s424_s21, 8192  ;;  %p6373_p2 = scmp.lt.s32.totalorder %s424_s21, %s424_s21 }
  0xee   : > { %p6366_p13 = scmp.ne.s32.totalorder %s424_s21, %s6365_s30  ;;  %p6374_p3 = scmp.lt.s32.totalorder %s6365_s30, %s6365_s30 }
  0xf0   : > { %p6368_p0 = pnand %p6366_p13, %p6662_p11  ;;  %p6375_p5 = por %p6374_p3, %p6373_p2 }
  0xf2   : > { %p6369_p1 = pneg %p6368_p0 }
  0xf4   : > { %p6376_p8 = pnand %p6375_p5, %p6369_p1 }
  0xf6   : > { %6379 = shalt.err (!%p6376_p8)
}
  0xf7   : > { %s8722_s24 = smov 8   ;;  %s8723_s18 = smov 128  }
  0xf8   : > { %5785 = dma.hbm_to_vmem [thread:$0]  (!%p6646_p9), %s8661_s7, 8192, %s424_s21, [#allocation11], %s8723_s18, %s8723_s18, %s8722_s24  }
  0xf9   : > { %s6380_s29 = scalar_lea.hbm %s8663_s9, 10240 }
  0xfa   : > { %p6381_p10 = scmp.ne.s32.totalorder %s8663_s9, %s6380_s29  ;;  %p6387_p4 = scmp.lt.u32.totalorder %s6380_s29, %s8663_s9 }
  0xfc   : > { %p6383_p12 = pnand %p6381_p10, %p6662_p11 }
  0xfe   : > { %p6384_p6 = pneg %p6383_p12 }
 0x100   : > { %p6389_p7 = pnand %p6387_p4, %p6384_p6 }
 0x102   : > { %6392 = shalt.err (!%p6389_p7)
}
 0x103   : > { %s6393_s21 = scalar_lea.vmem %s6828_s14, 10240  ;;  %p6401_p2 = scmp.lt.s32.totalorder %s6828_s14, %s6828_s14 }
 0x104   : > { %p6394_p13 = scmp.ne.s32.totalorder %s6828_s14, %s6393_s21  ;;  %p6402_p3 = scmp.lt.s32.totalorder %s6393_s21, %s6393_s21 }
 0x106   : > { %p6396_p0 = pnand %p6394_p13, %p6662_p11  ;;  %p6403_p5 = por %p6402_p3, %p6401_p2 }
 0x108   : > { %p6397_p1 = pneg %p6396_p0 }
 0x10a   : > { %p6404_p8 = pnand %p6403_p5, %p6397_p1 }
 0x10c   : > { %6407 = shalt.err (!%p6404_p8)
}
 0x10d   : > { %s6530_s30 = smov 256   ;;  %s6531_s4 = smov 16  }
 0x10e   : > { %5791 = dma.hbm_to_vmem [thread:$0]  (!%p6646_p9), %s8663_s9, 10240, %s6828_s14, [#allocation14], %s6530_s30, %s6530_s30, %s6531_s4  }
 0x10f   : > { %s6532_s13 = smov [#allocation18]   ;;  %s6533_s26 = smov [#allocation19]  }
 0x110   : > { %s471_s29 = sshll.u32 %s6532_s13, 4  ;;  %s485_s23 = sshll.u32 %s6533_s26, 4  ;;  %s472_s29 = int_to_ptr.vmem [resolvable:$true] %s471_s29  ;;  %s6874_s23 = int_to_ptr.vmem [resolvable:$true] %s485_s23 }
 0x111   : > { %s6408_s21 = scalar_lea.hbm %s8665_s11, 9216 }
 0x112   : > { %p6409_p10 = scmp.ne.s32.totalorder %s8665_s11, %s6408_s21  ;;  %p6415_p4 = scmp.lt.u32.totalorder %s6408_s21, %s8665_s11 }
 0x114   : > { %p6411_p12 = pnand %p6409_p10, %p6662_p11 }
 0x116   : > { %p6412_p6 = pneg %p6411_p12 }
 0x118   : > { %p6417_p7 = pnand %p6415_p4, %p6412_p6 }
 0x11a   : > { %6420 = shalt.err (!%p6417_p7)
}
 0x11b   : > { %s6421_s30 = scalar_lea.vmem %s472_s29, 9216  ;;  %p6429_p2 = scmp.lt.s32.totalorder %s472_s29, %s472_s29 }
 0x11c   : > { %p6422_p13 = scmp.ne.s32.totalorder %s472_s29, %s6421_s30  ;;  %p6430_p3 = scmp.lt.s32.totalorder %s6421_s30, %s6421_s30 }
 0x11e   : > { %p6424_p0 = pnand %p6422_p13, %p6662_p11  ;;  %p6431_p5 = por %p6430_p3, %p6429_p2 }
 0x120   : > { %p6425_p1 = pneg %p6424_p0 }
 0x122   : > { %p6432_p8 = pnand %p6431_p5, %p6425_p1 }
 0x124   : > { %6435 = shalt.err (!%p6432_p8)
}
 0x125   : > { %5797 = dma.hbm_to_vmem [thread:$0]  (!%p6646_p9), %s8665_s11, 9216, %s472_s29, [#allocation17], %s8723_s18, %s8723_s18, %s8722_s24  }
 0x126   : > { %s6436_s13 = scalar_lea.hbm %s8666_s12, 16 }
 0x127   : > { %p6437_p10 = scmp.ne.s32.totalorder %s8666_s12, %s6436_s13  ;;  %p6443_p4 = scmp.lt.u32.totalorder %s6436_s13, %s8666_s12 }
 0x129   : > { %p6439_p12 = pnand %p6437_p10, %p6662_p11 }
 0x12b   : > { %p6440_p6 = pneg %p6439_p12 }
 0x12d   : > { %p6445_p7 = pnand %p6443_p4, %p6440_p6 }
 0x12f   : > { %6448 = shalt.err (!%p6445_p7)
}
 0x130   : > { %s6449_s24 = scalar_lea.vmem %s6874_s23, 16  ;;  %s6456_s18 = scalar_lea.vmem %s6874_s23, 32 }
 0x131   : > { %p6450_p13 = scmp.ne.s32.totalorder %s6874_s23, %s6449_s24  ;;  %p6457_p2 = scmp.lt.s32.totalorder %s6874_s23, %s6874_s23 }
 0x132   : > { %p6458_p3 = scmp.lt.s32.totalorder %s6456_s18, %s6449_s24 }
 0x133   : > { %p6452_p0 = pnand %p6450_p13, %p6662_p11 }
 0x134   : > { %p6459_p5 = por %p6458_p3, %p6457_p2 }
 0x135   : > { %p6453_p1 = pneg %p6452_p0 }
 0x137   : > { %p6460_p8 = pnand %p6459_p5, %p6453_p1 }
 0x139   : > { %6463 = shalt.err (!%p6460_p8)
}
 0x13a   : > { %5800 = dma.hbm_to_vmem [thread:$0]  (!%p6646_p9), %s8666_s12, 16, %s6874_s23, [#allocation20]  }
 0x13b   : > { %p8724_p10 = scmp.ne.s32.totalorder %s8715_s17, 0 }
 0x13d   : > { %507 = sbr.rel (%p8724_p10) target bundleno = 2175 (0x87f), region = 72 }
 0x144   : > { %p8725_p11 = scmp.eq.s32.totalorder %s6621_s28, 0 }
 0x146   : > { %6477 = dma.done.wait (%p8725_p11), [#allocation3], 256   ;;  %p8726_p12 = pmov %p8725_p11 }
 0x147   : > { %p8727_p6 = pmov %p8725_p11 }
 0x148   : > { %6479 = vsyncadd (%p8726_p12), [#allocation3], 4294967040 }
 0x149   : > { %6481 = dma.done.wait (%p8727_p6), [#allocation5], 2064   ;;  %p8728_p4 = pmov %p8727_p6 }
 0x14b   : > { %6483 = vsyncadd (%p8728_p4), [#allocation5], 4294965232  ;;  %p8729_p7 = pmov %p8728_p4 }
 0x14c   : > { %p8730_p9 = pmov %p8728_p4 }
 0x14d   : > { %6485 = dma.done.wait (%p8729_p7), [#allocation8], 8208  }
 0x14e   : > { %6487 = vsyncadd (%p8730_p9), [#allocation8], 4294959088  ;;  %p8731_p13 = pmov %p8728_p4 }
 0x14f   : > { %p8732_p0 = pmov %p8728_p4 }
 0x150   : > { %6489 = dma.done.wait (%p8731_p13), [#allocation11], 8256  }
 0x151   : > { %6491 = vsyncadd (%p8732_p0), [#allocation11], 4294959040  ;;  %p8733_p1 = pmov %p8732_p0 }
 0x152   : > { %p8734_p2 = pmov %p8732_p0 }
 0x153   : > { %6493 = dma.done.wait (%p8733_p1), [#allocation14], 10256  }
 0x154   : > { %6495 = vsyncadd (%p8734_p2), [#allocation14], 4294957040  ;;  %p8735_p3 = pmov %p8732_p0 }
 0x155   : > { %p8736_p5 = pmov %p8732_p0 }
 0x156   : > { %6497 = dma.done.wait (%p8735_p3), [#allocation17], 9248  }
 0x157   : > { %6499 = vsyncadd (%p8736_p5), [#allocation17], 4294958048  ;;  %p8737_p8 = pmov %p8732_p0 }
 0x158   : > { %p8738_p10 = pmov %p8732_p0 }
 0x159   : > { %6501 = dma.done.wait (%p8737_p8), [#allocation20], 16  }
 0x15a   : > { %6503 = vsyncadd (%p8738_p10), [#allocation20], 4294967280  ;;  %s4599_s17 = sshll.u32 %s6621_s28, 1  ;;  %vm619_vm0 = vcmask 1041408   ;;  %vm612_vm1 = vcmask 80896   ;;  %vm6534_vm2 = vmmov 1  }
 0x15b   : > { %p595_p11 = scmp.lt.s32.totalorder %s4599_s17, 3  ;;  %vm6952_vm3 = vmpackc.low %vm619_vm0, %vm6534_vm2  ;;  %v603_v1 = vld [vmem:[#allocation2] sm:$0xff]  ;;  %v604_v2 = vld [vmem:[#allocation2 + $0x8] sm:$0x3]  ;;  %vm1616_vm4 = vcmask 654336   ;;  %vm2531_vm5 = vcmask 130048  }
 0x15c   : > { %v5200_v4 = vpack.c.bf16 %v604_v2, %v603_v1  ;;  %v700_v5 = vld [vmem:[#allocation6] sm:$0xff]  ;;  %v701_v6 = vld [vmem:[#allocation6 + $0x8] sm:$0xff]  ;;  %v702_v8 = vld [vmem:[#allocation6 + $0x10] sm:$0xff]  ;;  %s6537_s30 = smov 96   ;;  %s591_s1 = sand.u32 1, %s6506_s25   ;;  %vm4150_vm6 = vcmask 785408  }
 0x15d   : > { %s8783_s17 = smov (!%p595_p11, %s4599_s17), 3  ;;  %v5206_v7 = vpack.c.bf16 %v701_v6, %v700_v5  ;;  %v703_v9 = vld [vmem:[#allocation6 + $0x18] sm:$0xff]  ;;  %v704_v11 = vld [vmem:[#allocation6 + $0x20] sm:$0xff]  ;;  %v705_v12 = vld [vmem:[#allocation6 + $0x28] sm:$0xff]  ;;  %s4598_s3 = sshll.u32 %s591_s1, 9  ;;  %vm4184_vm7 = vcmask 523264  }
 0x15e   : > { %s4600_s22 = sshll.u32 %s8783_s17, 3  ;;  %5202 = vmatprep.subr.msk.bf16.mxu0 %vm6952_vm3, %v5200_v4  ;;  %v5210_v10 = vpack.c.bf16 %v703_v9, %v702_v8  ;;  %v5214_v14 = vpack.c.bf16 %v705_v12, %v704_v11  ;;  %v706_v15 = vld [vmem:[#allocation6 + $0x30] sm:$0xff]  ;;  %v707_v16 = vld [vmem:[#allocation6 + $0x38] sm:$0xff]  ;;  %v708_v18 = vld [vmem:[#allocation6 + $0x40] sm:$0xff]  ;;  %s8328_s25 = scalar_lea.vmem [#allocation21], %s4598_s3 }
 0x15f   : > { %s598_s14 = scalar_lea.vmem %s8654_s0, %s4600_s22  ;;  %5205 = vmatpush3.bf16.msk.msra.mxu0 %vm6952_vm3, %v5200_v4  ;;  %5207 = vmatprep.subr.bf16.mxu1 %v5206_v7  ;;  %v5218_v17 = vpack.c.bf16 %v707_v16, %v706_v15  ;;  %v709_v19 = vld [vmem:[#allocation6 + $0x48] sm:$0xff]  ;;  %v710_v21 = vld [vmem:[#allocation6 + $0x50] sm:$0xff]  ;;  %v711_v22 = vld [vmem:[#allocation6 + $0x58] sm:$0xff]  ;;  %p8777_p12 = scmp.ne.s32.totalorder %s8714_s16, 0 }
 0x160   : > { %v601_v3 = vld [vmem:[%s598_s14] sm:$0xff]  ;;  %v602_v13 = vld [vmem:[%s598_s14 + $0x8] sm:$0xff]  ;;  %5209 = vmatpush3.bf16.msra.mxu1 %v5206_v7  ;;  %v5222_v20 = vpack.c.bf16 %v709_v19, %v708_v18  ;;  %v5226_v23 = vpack.c.bf16 %v711_v22, %v710_v21  ;;  %v712_v24 = vld [vmem:[#allocation6 + $0x60] sm:$0xff]  ;;  %s4863_s4 = sshll.u32 (%p8777_p12), %s6621_s28, 5  ;;  %s8778_s26 = sld [smem:[#allocation53_spill]] (%p8777_p12) }
 0x161   : > { %4986 = vmatprep.mubr.msk.f32.mxu0 %vm612_vm1, %v601_v3  ;;  %5211 = vmatprep.subr.bf16.mxu1 %v5210_v10  ;;  %v713_v25 = vld [vmem:[#allocation6 + $0x68] sm:$0xff]  ;;  %v714_v27 = vld [vmem:[#allocation6 + $0x70] sm:$0xff]  ;;  %v715_v28 = vld [vmem:[#allocation6 + $0x78] sm:$0xff] }
 0x162   : > { %4987 = vmatmul.mubr.msk.f32.vlgmr.msra.gmra.mrb[0].mxu0 %vm612_vm1, %v602_v13  ;;  %v5230_v26 = vpack.c.bf16 %v713_v25, %v712_v24  ;;  %v5234_v29 = vpack.c.bf16 %v715_v28, %v714_v27  ;;  %v801_v30 = vld [vmem:[#allocation9 + $0x8] sm:$0xff]  ;;  %v803_v32 = vld [vmem:[#allocation9 + $0x18] sm:$0xff]  ;;  %v800_v35 = vld [vmem:[#allocation9] sm:$0xff] }
 0x163   : > { %v805_v31 = vld [vmem:[#allocation9 + $0x28] sm:$0xff]  ;;  %v807_v34 = vld [vmem:[#allocation9 + $0x38] sm:$0xff]  ;;  %v804_v36 = vld [vmem:[#allocation9 + $0x20] sm:$0xff] }
 0x164   : > { %5213 = vmatpush3.bf16.msra.mxu1 %v5210_v10  ;;  %v5238_v33 = vpack.c.bf16 %v805_v31, %v801_v30  ;;  %v5270_v37 = vpack.c.bf16 %v807_v34, %v803_v32  ;;  %v5240_v38 = vpack.c.bf16 %v804_v36, %v800_v35  ;;  %v809_v39 = vld [vmem:[#allocation9 + $0x48] sm:$0xff]  ;;  %v808_v42 = vld [vmem:[#allocation9 + $0x40] sm:$0xff]  ;;  %v4601_v11 = vld [vmem:[#allocation4] ss:$0 sm:$0xff] }
 0x165   : > { %5215 = vmatprep.subr.bf16.mxu1 %v5214_v14  ;;  %v813_v40 = vld [vmem:[#allocation9 + $0x68] sm:$0xff]  ;;  %v812_v43 = vld [vmem:[#allocation9 + $0x60] sm:$0xff]  ;;  %v802_v15 = vld [vmem:[#allocation9 + $0x10] sm:$0xff] }
 0x166   : > { %5239 = vmatprep.subr.bf16.mxu0 %v5238_v33  ;;  %v5242_v41 = vpack.c.bf16 %v813_v40, %v809_v39  ;;  %v5244_v44 = vpack.c.bf16 %v812_v43, %v808_v42  ;;  %v817_v45 = vld [vmem:[#allocation9 + $0x88] sm:$0xff]  ;;  %v816_v48 = vld [vmem:[#allocation9 + $0x80] sm:$0xff]  ;;  %v806_v16 = vld [vmem:[#allocation9 + $0x30] sm:$0xff]  ;;  %s8517_s2 = scalar_lea.vmem (%p8777_p12), %s8778_s26, %s4863_s4 }
 0x167   : > { %5241 = vmatpush1.bf16.msra.mxu0 %v5240_v38  ;;  %v821_v46 = vld [vmem:[#allocation9 + $0xa8] sm:$0xff]  ;;  %v820_v49 = vld [vmem:[#allocation9 + $0xa0] sm:$0xff]  ;;  %v811_v18 = vld [vmem:[#allocation9 + $0x58] sm:$0xff]  ;;  %v5272_v21 = vpack.c.bf16 %v806_v16, %v802_v15 }
 0x168   : > { %5217 = vmatpush3.bf16.msra.mxu1 %v5214_v14  ;;  %5243 = vmatprep.subr.bf16.mxu0 %v5242_v41  ;;  %v5246_v47 = vpack.c.bf16 %v821_v46, %v817_v45  ;;  %v5248_v50 = vpack.c.bf16 %v820_v49, %v816_v48  ;;  %v825_v51 = vld [vmem:[#allocation9 + $0xc8] sm:$0xff]  ;;  %v824_v54 = vld [vmem:[#allocation9 + $0xc0] sm:$0xff]  ;;  %v815_v19 = vld [vmem:[#allocation9 + $0x78] sm:$0xff] }
 0x169   : > { %5219 = vmatprep.subr.bf16.mxu1 %v5218_v17  ;;  %v829_v52 = vld [vmem:[#allocation9 + $0xe8] sm:$0xff]  ;;  %v828_v55 = vld [vmem:[#allocation9 + $0xe0] sm:$0xff]  ;;  %v810_v24 = vld [vmem:[#allocation9 + $0x50] sm:$0xff] }
 0x16a   : > { %v5250_v53 = vpack.c.bf16 %v829_v52, %v825_v51  ;;  %v5252_v56 = vpack.c.bf16 %v828_v55, %v824_v54  ;;  %v833_v57 = vld [vmem:[#allocation9 + $0x108] sm:$0xff]  ;;  %v832_v60 = vld [vmem:[#allocation9 + $0x100] sm:$0xff]  ;;  %v814_v25 = vld [vmem:[#allocation9 + $0x70] sm:$0xff] }
 0x16b   : > { %5245 = vmatpush1.bf16.msra.mxu0 %v5244_v44  ;;  %v837_v58 = vld [vmem:[#allocation9 + $0x128] sm:$0xff]  ;;  %v836_v61 = vld [vmem:[#allocation9 + $0x120] sm:$0xff]  ;;  %v823_v27 = vld [vmem:[#allocation9 + $0xb8] sm:$0xff]  ;;  %v5276_v28 = vpack.c.bf16 %v814_v25, %v810_v24 }
 0x16c   : > { %5221 = vmatpush3.bf16.msra.mxu1 %v5218_v17  ;;  %5247 = vmatprep.subr.bf16.mxu0 %v5246_v47  ;;  %v5254_v59 = vpack.c.bf16 %v837_v58, %v833_v57  ;;  %v5256_v62 = vpack.c.bf16 %v836_v61, %v832_v60  ;;  %v841_v63 = vld [vmem:[#allocation9 + $0x148] sm:$0xff]  ;;  %v840_v2 = vld [vmem:[#allocation9 + $0x140] sm:$0xff]  ;;  %v818_v30 = vld [vmem:[#allocation9 + $0x90] sm:$0xff] }
 0x16d   : > { %5223 = vmatprep.subr.bf16.mxu1 %v5222_v20  ;;  %v845_v0 = vld [vmem:[#allocation9 + $0x168] sm:$0xff]  ;;  %v844_v3 = vld [vmem:[#allocation9 + $0x160] sm:$0xff]  ;;  %v822_v31 = vld [vmem:[#allocation9 + $0xb0] sm:$0xff] }
 0x16e   : > { %v5258_v1 = vpack.c.bf16 %v845_v0, %v841_v63  ;;  %v5260_v4 = vpack.c.bf16 %v844_v3, %v840_v2  ;;  %v849_v5 = vld [vmem:[#allocation9 + $0x188] sm:$0xff]  ;;  %v848_v8 = vld [vmem:[#allocation9 + $0x180] sm:$0xff]  ;;  %v827_v32 = vld [vmem:[#allocation9 + $0xd8] sm:$0xff]  ;;  %v5280_v34 = vpack.c.bf16 %v822_v31, %v818_v30 }
 0x16f   : > { %5249 = vmatpush1.bf16.msra.mxu0 %v5248_v50  ;;  %v853_v6 = vld [vmem:[#allocation9 + $0x1a8] sm:$0xff]  ;;  %v852_v9 = vld [vmem:[#allocation9 + $0x1a0] sm:$0xff]  ;;  %v831_v33 = vld [vmem:[#allocation9 + $0xf8] sm:$0xff] }
 0x170   : > { %5225 = vmatpush3.bf16.msra.mxu1 %v5222_v20  ;;  %5251 = vmatprep.subr.bf16.mxu0 %v5250_v53  ;;  %v5262_v7 = vpack.c.bf16 %v853_v6, %v849_v5  ;;  %v5264_v10 = vpack.c.bf16 %v852_v9, %v848_v8  ;;  %v5282_v35 = vpack.c.bf16 %v831_v33, %v827_v32  ;;  %v826_v36 = vld [vmem:[#allocation9 + $0xd0] sm:$0xff]  ;;  %v835_v38 = vld [vmem:[#allocation9 + $0x118] sm:$0xff]  ;;  %v857_v57 = vld [vmem:[#allocation9 + $0x1c8] sm:$0xff]  ;;  %v8677_v5 = vmov 0.0  }
 0x171   : > { %5227 = vmatprep.subr.bf16.mxu1 %v5226_v23  ;;  %v839_v39 = vld [vmem:[#allocation9 + $0x138] sm:$0xff]  ;;  %v834_v42 = vld [vmem:[#allocation9 + $0x110] sm:$0xff]  ;;  %v861_v58 = vld [vmem:[#allocation9 + $0x1e8] sm:$0xff]  ;;  %950 = vmatprep.mubr.f32.mxu0 %v8677_v5 }
 0x172   : > { %v5286_v41 = vpack.c.bf16 %v839_v39, %v835_v38  ;;  %v838_v43 = vld [vmem:[#allocation9 + $0x130] sm:$0xff]  ;;  %v843_v44 = vld [vmem:[#allocation9 + $0x158] sm:$0xff]  ;;  %v5266_v60 = vpack.c.bf16 %v861_v58, %v857_v57  ;;  %v860_v0 = vld [vmem:[#allocation9 + $0x1e0] sm:$0xff] }
 0x173   : > { %5253 = vmatpush1.bf16.msra.mxu0 %v5252_v56  ;;  %v847_v45 = vld [vmem:[#allocation9 + $0x178] sm:$0xff]  ;;  %v5288_v46 = vpack.c.bf16 %v838_v43, %v834_v42  ;;  %v842_v48 = vld [vmem:[#allocation9 + $0x150] sm:$0xff]  ;;  %v1066_v6 = vld [vmem:[#allocation12 + $0x80] sm:$0xff] }
 0x174   : > { %5229 = vmatpush3.bf16.msra.mxu1 %v5226_v23  ;;  %5255 = vmatprep.subr.bf16.mxu0 %v5254_v59  ;;  %v5274_v23 = vpack.c.bf16 %v815_v19, %v811_v18  ;;  %v5290_v47 = vpack.c.bf16 %v847_v45, %v843_v44  ;;  %v846_v49 = vld [vmem:[#allocation9 + $0x170] sm:$0xff]  ;;  %v851_v50 = vld [vmem:[#allocation9 + $0x198] sm:$0xff]  ;;  %v1324_v8 = vld [vmem:[#allocation12 + $0x180] sm:$0xff] }
 0x175   : > { %5231 = vmatprep.subr.bf16.mxu1 %v5230_v26  ;;  %v855_v51 = vld [vmem:[#allocation9 + $0x1b8] sm:$0xff]  ;;  %v5292_v52 = vpack.c.bf16 %v846_v49, %v842_v48  ;;  %v850_v54 = vld [vmem:[#allocation9 + $0x190] sm:$0xff]  ;;  %v1070_v24 = vld [vmem:[#allocation12 + $0xa0] sm:$0xff] }
 0x176   : > { %v5294_v53 = vpack.c.bf16 %v855_v51, %v851_v50  ;;  %v854_v55 = vld [vmem:[#allocation9 + $0x1b0] sm:$0xff]  ;;  %v859_v59 = vld [vmem:[#allocation9 + $0x1d8] sm:$0xff]  ;;  %v1332_v39 = vld [vmem:[#allocation12 + $0x1c0] sm:$0xff] }
 0x177   : > { %5257 = vmatpush1.bf16.msra.mxu0 %v5256_v62  ;;  %v5296_v56 = vpack.c.bf16 %v854_v55, %v850_v54  ;;  %v863_v61 = vld [vmem:[#allocation9 + $0x1f8] sm:$0xff]  ;;  %v856_v62 = vld [vmem:[#allocation9 + $0x1c0] sm:$0xff]  ;;  %v862_v2 = vld [vmem:[#allocation9 + $0x1f0] sm:$0xff] }
 0x178   : > { %5233 = vmatpush3.bf16.msra.mxu1 %v5230_v26  ;;  %5259 = vmatprep.subr.bf16.mxu0 %v5258_v1  ;;  %v819_v26 = vld [vmem:[#allocation9 + $0x98] sm:$0xff]  ;;  %v5298_v63 = vpack.c.bf16 %v863_v61, %v859_v59  ;;  %v858_v1 = vld [vmem:[#allocation9 + $0x1d0] sm:$0xff]  ;;  %v5268_v3 = vpack.c.bf16 %v860_v0, %v856_v62  ;;  %v1078_v49 = vld [vmem:[#allocation12 + $0xe0] sm:$0xff] }
 0x179   : > { %5235 = vmatprep.subr.bf16.mxu1 %v5234_v29  ;;  %v1068_v15 = vld [vmem:[#allocation12 + $0x90] sm:$0xff]  ;;  %v1327_v19 = vld [vmem:[#allocation12 + $0x198] sm:$0xff]  ;;  %v1071_v25 = vld [vmem:[#allocation12 + $0xa8] sm:$0xff] }
 0x17a   : > { %v1326_v18 = vld [vmem:[#allocation12 + $0x190] sm:$0xff]  ;;  %v1073_v32 = vld [vmem:[#allocation12 + $0xb8] sm:$0xff]  ;;  %v1075_v38 = vld [vmem:[#allocation12 + $0xc8] sm:$0xff] }
 0x17b   : > { %5261 = vmatpush1.bf16.msra.mxu0 %v5260_v4  ;;  %v5300_v4 = vpack.c.bf16 %v862_v2, %v858_v1  ;;  %v1072_v31 = vld [vmem:[#allocation12 + $0xb0] sm:$0xff]  ;;  %v1077_v44 = vld [vmem:[#allocation12 + $0xd8] sm:$0xff]  ;;  %v1079_v50 = vld [vmem:[#allocation12 + $0xe8] sm:$0xff] }
 0x17c   : > { %5237 = vmatpush3.bf16.msra.mxu1 %v5234_v29  ;;  %5263 = vmatprep.subr.bf16.mxu0 %v5262_v7  ;;  %v5278_v29 = vpack.c.bf16 %v823_v27, %v819_v26  ;;  %v1067_v7 = vld [vmem:[#allocation12 + $0x88] sm:$0xff]  ;;  %v1328_v26 = vld [vmem:[#allocation12 + $0x1a0] sm:$0xff]  ;;  %v1330_v33 = vld [vmem:[#allocation12 + $0x1b0] sm:$0xff]  ;;  %v5326_v51 = vpack.c.bf16 %v1079_v50, %v1078_v49 }
 0x17d   : > { %5271 = vmatprep.subr.bf16.mxu1 %v5270_v37  ;;  %v830_v37 = vld [vmem:[#allocation9 + $0xf0] sm:$0xff]  ;;  %v5302_v9 = vpack.c.bf16 %v1067_v7, %v1066_v6  ;;  %v1339_v59 = vld [vmem:[#allocation12 + $0x1f8] sm:$0xff]  ;;  %v1049_v61 = vld [vmem:[#allocation12] sm:$0xff] }
 0x17e   : > { %v5284_v40 = vpack.c.bf16 %v830_v37, %v826_v36  ;;  %v1329_v27 = vld [vmem:[#allocation12 + $0x1a8] sm:$0xff]  ;;  %v1074_v37 = vld [vmem:[#allocation12 + $0xc0] sm:$0xff]  ;;  %v1076_v43 = vld [vmem:[#allocation12 + $0xd0] sm:$0xff] }
 0x17f   : > { %5265 = vmatpush1.bf16.msra.mxu0 %v5264_v10  ;;  %v1325_v10 = vld [vmem:[#allocation12 + $0x188] sm:$0xff]  ;;  %v5374_v30 = vpack.c.bf16 %v1329_v27, %v1328_v26  ;;  %v1334_v45 = vld [vmem:[#allocation12 + $0x1d0] sm:$0xff]  ;;  %v1307_v0 = vld [vmem:[#allocation12 + $0x100] sm:$0xff] }
 0x180   : > { %5267 = vmatprep.subr.bf16.mxu0 %v5266_v60  ;;  %v1080_v55 = vld [vmem:[#allocation12 + $0xf0] sm:$0xff]  ;;  %v1050_v62 = vld [vmem:[#allocation12 + $0x8] sm:$0xff]  ;;  %v864_v7 = vld [vmem:[#allocation10] sm:$0xf] }
 0x181   : > { %v1338_v58 = vld [vmem:[#allocation12 + $0x1f0] sm:$0xff]  ;;  %v1308_v1 = vld [vmem:[#allocation12 + $0x108] sm:$0xff] }
 0x182   : > { %v5394_v60 = vpack.c.bf16 %v1339_v59, %v1338_v58  ;;  %v5398_v2 = vpack.c.bf16 %v1308_v1, %v1307_v0  ;;  %v1315_v59 = vld [vmem:[#allocation12 + $0x140] sm:$0xff]  ;;  %v1317_v1 = vld [vmem:[#allocation12 + $0x150] sm:$0xff] }
 0x183   : > { %5269 = vmatpush1.bf16.msra.mxu0 %v5268_v3  ;;  %v866_v3 = vlaneseq }
 0x184   : > { %5303 = vmatprep.subr.bf16.mxu0 %v5302_v9 }
 0x235   : > { %v4988_v12 = vpop.f32.mrb[0].mxu0 }
 0x236   : > { %v695_v13 = vadd.f32 %v4988_v12, %v4601_v11  ;;  %v689_v14 = vpop.f32.mrb[1].mxu0  ;;  %v4605_v12 = vld [vmem:[#allocation7] ss:$0 sm:$0xff] }
 0x237   : > { %v690_v17 = vadd.f32 %v4601_v11, %v689_v14  ;;  %v5366_v11 = vpack.c.bf16 %v1325_v10, %v1324_v8 }
 0x238   : > { %v699_v22 = vmax.f32 %v695_v13, 0.0 }
 0x239   : > { %v698_v20 = vmax.f32 %v690_v17, 0.0  ;;  %v1069_v17 = vld [vmem:[#allocation12 + $0x98] sm:$0xff] }
 0x23b   : > { %5021 = vmatprep.mubr.f32.mxu1 %v698_v20 }
 0x23c   : > { %5022 = vmatmul.mubr.f32.vlgmr.msra.gmra.mrb[0].mxu1 %v699_v22  ;;  %v5306_v22 = vpack.c.bf16 %v1069_v17, %v1068_v15 }
 0x23d   : > { %5273 = vmatpush1.bf16.msra.mxu1 %v5272_v21  ;;  %1027 = vmatprep.mubr.f32.mxu1 %v8677_v5 }
 0x23e   : > { %5275 = vmatprep.subr.bf16.mxu1 %v5274_v23  ;;  %v5370_v23 = vpack.c.bf16 %v1327_v19, %v1326_v18 }
 0x241   : > { %5277 = vmatpush1.bf16.msra.mxu1 %v5276_v28 }
 0x242   : > { %5279 = vmatprep.subr.bf16.mxu1 %v5278_v29  ;;  %v5310_v29 = vpack.c.bf16 %v1071_v25, %v1070_v24  ;;  %v1051_v24 = vld [vmem:[#allocation12 + $0x10] sm:$0xff]  ;;  %v1052_v25 = vld [vmem:[#allocation12 + $0x18] sm:$0xff] }
 0x245   : > { %5281 = vmatpush1.bf16.msra.mxu1 %v5280_v34  ;;  %v1331_v34 = vld [vmem:[#allocation12 + $0x1b8] sm:$0xff] }
 0x246   : > { %5283 = vmatprep.subr.bf16.mxu1 %v5282_v35  ;;  %v5314_v35 = vpack.c.bf16 %v1073_v32, %v1072_v31  ;;  %v5378_v36 = vpack.c.bf16 %v1331_v34, %v1330_v33  ;;  %v1309_v32 = vld [vmem:[#allocation12 + $0x110] sm:$0xff]  ;;  %v1310_v33 = vld [vmem:[#allocation12 + $0x118] sm:$0xff] }
 0x249   : > { %5285 = vmatpush1.bf16.msra.mxu1 %v5284_v40  ;;  %v1333_v40 = vld [vmem:[#allocation12 + $0x1c8] sm:$0xff] }
 0x24a   : > { %5287 = vmatprep.subr.bf16.mxu1 %v5286_v41  ;;  %v5318_v41 = vpack.c.bf16 %v1075_v38, %v1074_v37  ;;  %v5382_v42 = vpack.c.bf16 %v1333_v40, %v1332_v39  ;;  %v1053_v37 = vld [vmem:[#allocation12 + $0x20] sm:$0xff]  ;;  %v1054_v38 = vld [vmem:[#allocation12 + $0x28] sm:$0xff]  ;;  %v5402_v40 = vpack.c.bf16 %v1310_v33, %v1309_v32 }
 0x24b   : > { %v2055_v33 = vld [vmem:[#allocation15 + $0x1e0] sm:$0xff] }
 0x24d   : > { %5289 = vmatpush1.bf16.msra.mxu1 %v5288_v46  ;;  %v1335_v46 = vld [vmem:[#allocation12 + $0x1d8] sm:$0xff] }
 0x24e   : > { %5291 = vmatprep.subr.bf16.mxu1 %v5290_v47  ;;  %v5322_v47 = vpack.c.bf16 %v1077_v44, %v1076_v43  ;;  %v5386_v48 = vpack.c.bf16 %v1335_v46, %v1334_v45  ;;  %v1311_v43 = vld [vmem:[#allocation12 + $0x120] sm:$0xff]  ;;  %v1312_v44 = vld [vmem:[#allocation12 + $0x128] sm:$0xff]  ;;  %v5342_v45 = vpack.c.bf16 %v1054_v38, %v1053_v37  ;;  %v1055_v46 = vld [vmem:[#allocation12 + $0x30] sm:$0xff] }
 0x24f   : > { %v5406_v50 = vpack.c.bf16 %v1312_v44, %v1311_v43  ;;  %v2060_v38 = vld [vmem:[#allocation15 + $0x208] sm:$0xff]  ;;  %v1602_v43 = vld [vmem:[#allocation15 + $0xd0] sm:$0xff] }
 0x251   : > { %5293 = vmatpush1.bf16.msra.mxu1 %v5292_v52  ;;  %v1336_v52 = vld [vmem:[#allocation12 + $0x1e0] sm:$0xff] }
 0x252   : > { %5295 = vmatprep.subr.bf16.mxu1 %v5294_v53  ;;  %v1337_v53 = vld [vmem:[#allocation12 + $0x1e8] sm:$0xff] }
 0x253   : > { %v5390_v54 = vpack.c.bf16 %v1337_v53, %v1336_v52  ;;  %v1313_v52 = vld [vmem:[#allocation12 + $0x130] sm:$0xff]  ;;  %v1314_v53 = vld [vmem:[#allocation12 + $0x138] sm:$0xff] }
 0x254   : > { %v5410_v58 = vpack.c.bf16 %v1314_v53, %v1313_v52  ;;  %v2064_v53 = vld [vmem:[#allocation15 + $0x228] sm:$0xff] }
 0x255   : > { %5297 = vmatpush1.bf16.msra.mxu1 %v5296_v56  ;;  %v1081_v56 = vld [vmem:[#allocation12 + $0xf8] sm:$0xff] }
 0x256   : > { %5299 = vmatprep.subr.bf16.mxu1 %v5298_v63  ;;  %v5330_v57 = vpack.c.bf16 %v1081_v56, %v1080_v55  ;;  %v5334_v63 = vpack.c.bf16 %v1050_v62, %v1049_v61  ;;  %v1057_v55 = vld [vmem:[#allocation12 + $0x40] sm:$0xff]  ;;  %v1058_v56 = vld [vmem:[#allocation12 + $0x48] sm:$0xff]  ;;  %v1059_v62 = vld [vmem:[#allocation12 + $0x50] sm:$0xff] }
 0x257   : > { %v5350_v61 = vpack.c.bf16 %v1058_v56, %v1057_v55  ;;  %v1604_v56 = vld [vmem:[#allocation15 + $0xe0] sm:$0xff] }
 0x259   : > { %5301 = vmatpush1.bf16.msra.mxu1 %v5300_v4  ;;  %v6969_v4 = vshrl.u32 %v866_v3, 7 }
 0x25a   : > { %5367 = vmatprep.subr.bf16.mxu1 %v5366_v11 }
 0x25b   : > { %v868_v6 = vsub.s32 0, %v6969_v4  ;;  %v872_v8 = vsub.s32 1, %v6969_v4  ;;  %v876_v10 = vsub.s32 2, %v6969_v4  ;;  %v880_v19 = vsub.s32 3, %v6969_v4 }
 0x25d   : > { %v877_v17 = vrot.slane %v864_v7, %v876_v10 }
 0x30f   : > { %v5023_v13 = vpop.f32.mrb[0].mxu1 }
 0x310   : > { %v789_v14 = vpop.f32.mrb[1].mxu1  ;;  %v795_v20 = vadd.f32 %v5023_v13, %v4605_v12 }
 0x311   : > { %v790_v16 = vadd.f32 %v4605_v12, %v789_v14 }
 0x312   : > { %v799_v28 = vmax.f32 %v795_v20, 0.0 }
 0x313   : > { %v798_v21 = vmax.f32 %v790_v16, 0.0 }
 0x315   : > { %951 = vmatmul.mubr.f32.vlgmr.msra.gmra.mrb[2].mxu0 %v798_v21  ;;  %1028 = vmatmul.mubr.f32.vlgmr.msra.gmra.mrb[2].mxu1 %v798_v21 }
 0x316   : > { %956 = vmatprep.mubr.f32.mxu0 %v8677_v5  ;;  %1033 = vmatprep.mubr.f32.mxu1 %v8677_v5 }
 0x317   : > { %5305 = vmatpush3.bf16.msra.mxu0 %v5302_v9  ;;  %5369 = vmatpush3.bf16.msra.mxu1 %v5366_v11  ;;  %v869_v9 = vrot.slane %v864_v7, %v868_v6  ;;  %v873_v11 = vrot.slane %v864_v7, %v872_v8 }
 0x318   : > { %5307 = vmatprep.subr.bf16.mxu0 %v5306_v22  ;;  %5371 = vmatprep.subr.bf16.mxu1 %v5370_v23 }
 0x319   : > { %957 = vmatmul.mubr.f32.gmra.mrb[4].mxu0 %v799_v28  ;;  %1034 = vmatmul.mubr.f32.gmra.mrb[4].mxu1 %v799_v28 }
 0x31b   : > { %5309 = vmatpush3.bf16.msra.mxu0 %v5306_v22  ;;  %5373 = vmatpush3.bf16.msra.mxu1 %v5370_v23 }
 0x31c   : > { %5311 = vmatprep.subr.bf16.mxu0 %v5310_v29  ;;  %5375 = vmatprep.subr.bf16.mxu1 %v5374_v30 }
 0x31f   : > { %5313 = vmatpush3.bf16.msra.mxu0 %v5310_v29  ;;  %5377 = vmatpush3.bf16.msra.mxu1 %v5374_v30  ;;  %v881_v30 = vrot.slane %v864_v7, %v880_v19  ;;  %v1061_v7 = vld [vmem:[#allocation12 + $0x60] sm:$0xff] }
 0x320   : > { %5315 = vmatprep.subr.bf16.mxu0 %v5314_v35  ;;  %5379 = vmatprep.subr.bf16.mxu1 %v5378_v36 }
 0x323   : > { %5317 = vmatpush3.bf16.msra.mxu0 %v5314_v35  ;;  %5381 = vmatpush3.bf16.msra.mxu1 %v5378_v36  ;;  %v5338_v35 = vpack.c.bf16 %v1052_v25, %v1051_v24  ;;  %v2056_v25 = vld [vmem:[#allocation15 + $0x1e8] sm:$0xff] }
 0x324   : > { %5319 = vmatprep.subr.bf16.mxu0 %v5318_v41  ;;  %5383 = vmatprep.subr.bf16.mxu1 %v5382_v42 }
 0x327   : > { %5321 = vmatpush3.bf16.msra.mxu0 %v5318_v41  ;;  %5385 = vmatpush3.bf16.msra.mxu1 %v5382_v42 }
 0x328   : > { %5323 = vmatprep.subr.bf16.mxu0 %v5322_v47  ;;  %5387 = vmatprep.subr.bf16.mxu1 %v5386_v48 }
 0x32b   : > { %5325 = vmatpush3.bf16.msra.mxu0 %v5322_v47  ;;  %5389 = vmatpush3.bf16.msra.mxu1 %v5386_v48  ;;  %v1056_v47 = vld [vmem:[#allocation12 + $0x38] sm:$0xff] }
 0x32c   : > { %5327 = vmatprep.subr.bf16.mxu0 %v5326_v51  ;;  %5391 = vmatprep.subr.bf16.mxu1 %v5390_v54 }
 0x32f   : > { %5329 = vmatpush3.bf16.msra.mxu0 %v5326_v51  ;;  %5393 = vmatpush3.bf16.msra.mxu1 %v5390_v54  ;;  %v5346_v54 = vpack.c.bf16 %v1056_v47, %v1055_v46  ;;  %v1607_v46 = vld [vmem:[#allocation15 + $0xf8] sm:$0xff] }
 0x330   : > { %5331 = vmatprep.subr.bf16.mxu0 %v5330_v57  ;;  %5395 = vmatprep.subr.bf16.mxu1 %v5394_v60 }
 0x333   : > { %5333 = vmatpush3.bf16.msra.mxu0 %v5330_v57  ;;  %5397 = vmatpush3.bf16.msra.mxu1 %v5394_v60  ;;  %v1316_v60 = vld [vmem:[#allocation12 + $0x148] sm:$0xff] }
 0x334   : > { %5335 = vmatprep.subr.bf16.mxu0 %v5334_v63  ;;  %5399 = vmatprep.subr.bf16.mxu1 %v5398_v2  ;;  %v5414_v0 = vpack.c.bf16 %v1316_v60, %v1315_v59  ;;  %v1609_v60 = vld [vmem:[#allocation15 + $0x108] sm:$0xff] }
 0x3e8   : > { %v952_v12 = vpop.f32.mrb[2].mxu0  ;;  %v1029_v13 = vpop.f32.mrb[2].mxu1 }
 0x3e9   : > { %v953_v14 = vadd.f32 %v952_v12, %v869_v9  ;;  %v954_v15 = vpop.f32.mrb[3].mxu0  ;;  %v1031_v16 = vpop.f32.mrb[3].mxu1  ;;  %v1030_v29 = vadd.f32 %v1029_v13, %v877_v17  ;;  %v1320_v12 = vld [vmem:[#allocation12 + $0x168] sm:$0xff] }
 0x3ea   : > { %v955_v18 = vadd.f32 %v954_v15, %v873_v11  ;;  %v1032_v42 = vadd.f32 %v1031_v16, %v881_v30  ;;  %v1064_v15 = vld [vmem:[#allocation12 + $0x78] sm:$0xff] }
 0x3eb   : > { %v6979_v20 = vmax.f32 %v953_v14, 0.0  ;;  %v6990_v41 = vmax.f32 %v1030_v29, 0.0  ;;  %v1063_v14 = vld [vmem:[#allocation12 + $0x70] sm:$0xff] }
 0x3ec   : > { %v6981_v21 = vmax.f32 %v955_v18, 0.0  ;;  %v958_v22 = vpop.f32.mrb[4].mxu0  ;;  %v1035_v23 = vpop.f32.mrb[4].mxu1  ;;  %v6998_v51 = vmax.f32 %v1032_v42, 0.0  ;;  %v1322_v18 = vld [vmem:[#allocation12 + $0x178] sm:$0xff]  ;;  %v5362_v19 = vpack.c.bf16 %v1064_v15, %v1063_v14  ;;  %v1600_v42 = vld [vmem:[#allocation15 + $0xc0] sm:$0xff] }
 0x3ed   : > { %v959_v26 = vadd.f32 %v958_v22, %v869_v9  ;;  %v960_v27 = vpop.f32.mrb[5].mxu0  ;;  %v1037_v28 = vpop.f32.mrb[5].mxu1  ;;  %5056 = vmatprep.mubr.f32.mxu0 %v6979_v20  ;;  %v1036_v39 = vadd.f32 %v1035_v23, %v877_v17  ;;  %v1062_v9 = vld [vmem:[#allocation12 + $0x68] sm:$0xff]  ;;  %v1321_v17 = vld [vmem:[#allocation12 + $0x170] sm:$0xff]  ;;  %v1599_v23 = vld [vmem:[#allocation15 + $0xb8] sm:$0xff]  ;;  %v5436_v52 = vpack.c.bf16 %v1602_v43, %v1600_v42 }
 0x3ee   : > { %v961_v31 = vadd.f32 %v960_v27, %v873_v11  ;;  %5144 = vmatprep.mubr.f32.mxu1 %v6981_v21  ;;  %v1038_v49 = vadd.f32 %v1037_v28, %v881_v30  ;;  %v1319_v11 = vld [vmem:[#allocation12 + $0x160] sm:$0xff]  ;;  %v5358_v13 = vpack.c.bf16 %v1062_v9, %v1061_v7  ;;  %v1597_v22 = vld [vmem:[#allocation15 + $0xa8] sm:$0xff]  ;;  %v5426_v24 = vpack.c.bf16 %v1322_v18, %v1321_v17  ;;  %v1598_v29 = vld [vmem:[#allocation15 + $0xb0] sm:$0xff] }
 0x3ef   : > { %v6985_v34 = vmax.f32 %v959_v26, 0.0  ;;  %v6995_v48 = vmax.f32 %v1036_v39, 0.0  ;;  %v5422_v16 = vpack.c.bf16 %v1320_v12, %v1319_v11  ;;  %v2058_v26 = vld [vmem:[#allocation15 + $0x1f8] sm:$0xff]  ;;  %v5430_v27 = vpack.c.bf16 %v1599_v23, %v1597_v22  ;;  %v1596_v28 = vld [vmem:[#allocation15 + $0xa0] sm:$0xff]  ;;  %v1601_v30 = vld [vmem:[#allocation15 + $0xc8] sm:$0xff] }
 0x3f0   : > { %v6987_v36 = vmax.f32 %v961_v31, 0.0  ;;  %v7003_v57 = vmax.f32 %v1038_v49, 0.0  ;;  %v1603_v31 = vld [vmem:[#allocation15 + $0xd8] sm:$0xff]  ;;  %v5470_v32 = vpack.c.bf16 %v2058_v26, %v2056_v25  ;;  %v5432_v37 = vpack.c.bf16 %v1598_v29, %v1596_v28  ;;  %v2059_v49 = vld [vmem:[#allocation15 + $0x200] sm:$0xff]  ;;  %v1610_v9 = vld [vmem:[#allocation15 + $0x110] sm:$0xff] }
 0x3f1   : > { %5057 = vmatmul.mubr.f32.vlgmr.msra.gmra.mrb[6].mxu0 %v6985_v34  ;;  %v2062_v39 = vld [vmem:[#allocation15 + $0x218] sm:$0xff]  ;;  %v1608_v7 = vld [vmem:[#allocation15 + $0x100] sm:$0xff]  ;;  %v1613_v12 = vld [vmem:[#allocation15 + $0x128] sm:$0xff] }
 0x3f2   : > { %5337 = vmatpush3.bf16.msra.mxu0 %v5334_v63  ;;  %5059 = vmatprep.mubr.f32.mxu0 %v6981_v21  ;;  %v1060_v63 = vld [vmem:[#allocation12 + $0x58] sm:$0xff]  ;;  %v5474_v47 = vpack.c.bf16 %v2062_v39, %v2060_v38  ;;  %v1612_v15 = vld [vmem:[#allocation15 + $0x120] sm:$0xff]  ;;  %v2035_v26 = vld [vmem:[#allocation15 + $0x148] sm:$0xff] }
 0x3f3   : > { %5145 = vmatmul.mubr.f32.vlgmr.msra.gmra.mrb[6].mxu1 %v6987_v36  ;;  %5339 = vmatprep.subr.bf16.mxu0 %v5338_v35  ;;  %v5354_v3 = vpack.c.bf16 %v1060_v63, %v1059_v62  ;;  %v2063_v62 = vld [vmem:[#allocation15 + $0x220] sm:$0xff]  ;;  %v2065_v63 = vld [vmem:[#allocation15 + $0x230] sm:$0xff]  ;;  %v7029_v29 = vld [vmem:[#allocation13] ss:$0 sm:$0xff] }
 0x3f4   : > { %5401 = vmatpush3.bf16.msra.mxu1 %v5398_v2  ;;  %5147 = vmatprep.mubr.f32.mxu1 %v6990_v41  ;;  %v1318_v2 = vld [vmem:[#allocation12 + $0x158] sm:$0xff]  ;;  %v2071_v18 = vld [vmem:[#allocation15 + $0x260] sm:$0xff] }
 0x3f5   : > { %5060 = vmatmul.mubr.f32.gmra.mrb[8].mxu0 %v6987_v36  ;;  %5403 = vmatprep.subr.bf16.mxu1 %v5402_v40  ;;  %v5418_v10 = vpack.c.bf16 %v1318_v2, %v1317_v1  ;;  %v2068_v1 = vld [vmem:[#allocation15 + $0x248] sm:$0xff]  ;;  %v2070_v2 = vld [vmem:[#allocation15 + $0x258] sm:$0xff]  ;;  %v2036_v42 = vld [vmem:[#allocation15 + $0x150] sm:$0xff] }
 0x3f6   : > { %5341 = vmatpush3.bf16.msra.mxu0 %v5338_v35  ;;  %5062 = vmatprep.mubr.f32.mxu0 %v6990_v41  ;;  %v2057_v35 = vld [vmem:[#allocation15 + $0x1f0] sm:$0xff] }
 0x3f7   : > { %5148 = vmatmul.mubr.f32.gmra.mrb[8].mxu1 %v6995_v48  ;;  %5343 = vmatprep.subr.bf16.mxu0 %v5342_v45  ;;  %v5472_v44 = vpack.c.bf16 %v2057_v35, %v2055_v33  ;;  %v1580_v35 = vld [vmem:[#allocation15 + $0x28] sm:$0xff] }
 0x3f8   : > { %5405 = vmatpush3.bf16.msra.mxu1 %v5402_v40  ;;  %5150 = vmatprep.mubr.f32.mxu1 %v6998_v51  ;;  %v5434_v40 = vpack.c.bf16 %v1603_v31, %v1601_v30  ;;  %v1575_v31 = vld [vmem:[#allocation15] sm:$0xff] }
 0x3f9   : > { %5063 = vmatmul.mubr.f32.gmra.mrb[10].mxu0 %v6995_v48  ;;  %5407 = vmatprep.subr.bf16.mxu1 %v5406_v50 }
 0x3fa   : > { %5345 = vmatpush3.bf16.msra.mxu0 %v5342_v45  ;;  %5065 = vmatprep.mubr.f32.mxu0 %v6998_v51  ;;  %v1605_v45 = vld [vmem:[#allocation15 + $0xe8] sm:$0xff] }
 0x3fb   : > { %5151 = vmatmul.mubr.f32.gmra.mrb[10].mxu1 %v7003_v57  ;;  %5347 = vmatprep.subr.bf16.mxu0 %v5346_v54  ;;  %v5438_v55 = vpack.c.bf16 %v1607_v46, %v1605_v45  ;;  %v2039_v45 = vld [vmem:[#allocation15 + $0x168] sm:$0xff]  ;;  %v2041_v46 = vld [vmem:[#allocation15 + $0x178] sm:$0xff] }
 0x3fc   : > { %5409 = vmatpush3.bf16.msra.mxu1 %v5406_v50  ;;  %5153 = vmatprep.mubr.f32.mxu1 %v8677_v5  ;;  %v2061_v50 = vld [vmem:[#allocation15 + $0x210] sm:$0xff] }
 0x3fd   : > { %5066 = vmatmul.mubr.f32.gmra.mrb[12].mxu0 %v7003_v57  ;;  %5411 = vmatprep.subr.bf16.mxu1 %v5410_v58  ;;  %v5476_v59 = vpack.c.bf16 %v2061_v50, %v2059_v49 }
 0x3fe   : > { %5349 = vmatpush3.bf16.msra.mxu0 %v5346_v54  ;;  %5100 = vmatprep.mubr.f32.mxu0 %v8677_v5  ;;  %v2066_v54 = vld [vmem:[#allocation15 + $0x238] sm:$0xff] }
 0x3ff   : > { %5154 = vmatmul.mubr.f32.gmra.mrb[12].mxu1 %v8677_v5  ;;  %5351 = vmatprep.subr.bf16.mxu0 %v5350_v61 }
 0x400   : > { %5413 = vmatpush3.bf16.msra.mxu1 %v5410_v58  ;;  %5188 = vmatprep.mubr.f32.mxu1 %v6979_v20  ;;  %v1606_v58 = vld [vmem:[#allocation15 + $0xf0] sm:$0xff] }
 0x401   : > { %5415 = vmatprep.subr.bf16.mxu1 %v5414_v0 }
 0x402   : > { %5353 = vmatpush3.bf16.msra.mxu0 %v5350_v61  ;;  %v1611_v61 = vld [vmem:[#allocation15 + $0x118] sm:$0xff] }
 0x403   : > { %5355 = vmatprep.subr.bf16.mxu0 %v5354_v3 }
 0x404   : > { %5417 = vmatpush3.bf16.msra.mxu1 %v5414_v0  ;;  %v5440_v0 = vpack.c.bf16 %v1606_v58, %v1604_v56 }
 0x405   : > { %5419 = vmatprep.subr.bf16.mxu1 %v5418_v10 }
 0x406   : > { %5357 = vmatpush3.bf16.msra.mxu0 %v5354_v3  ;;  %v5442_v3 = vpack.c.bf16 %v1611_v61, %v1609_v60  ;;  %v1586_v60 = vld [vmem:[#allocation15 + $0x58] sm:$0xff] }
 0x407   : > { %5359 = vmatprep.subr.bf16.mxu0 %v5358_v13 }
 0x408   : > { %5421 = vmatpush3.bf16.msra.mxu1 %v5418_v10  ;;  %v5482_v10 = vpack.c.bf16 %v2070_v2, %v2068_v1  ;;  %v2040_v1 = vld [vmem:[#allocation15 + $0x170] sm:$0xff] }
 0x409   : > { %5423 = vmatprep.subr.bf16.mxu1 %v5422_v16 }
 0x40a   : > { %5361 = vmatpush3.bf16.msra.mxu0 %v5358_v13  ;;  %v1615_v13 = vld [vmem:[#allocation15 + $0x138] sm:$0xff] }
 0x40b   : > { %5363 = vmatprep.subr.bf16.mxu0 %v5362_v19  ;;  %v5446_v14 = vpack.c.bf16 %v1615_v13, %v1613_v12  ;;  %v1588_v13 = vld [vmem:[#allocation15 + $0x68] sm:$0xff] }
 0x40c   : > { %5425 = vmatpush3.bf16.msra.mxu1 %v5422_v16  ;;  %v2072_v16 = vld [vmem:[#allocation15 + $0x268] sm:$0xff] }
 0x40d   : > { %5427 = vmatprep.subr.bf16.mxu1 %v5426_v24 }
 0x40e   : > { %5365 = vmatpush3.bf16.msra.mxu0 %v5362_v19  ;;  %v2073_v19 = vld [vmem:[#allocation15 + $0x270] sm:$0xff] }
 0x40f   : > { %5431 = vmatprep.subr.bf16.mxu0 %v5430_v27  ;;  %v5488_v23 = vpack.c.bf16 %v2073_v19, %v2071_v18  ;;  %v2037_v27 = vld [vmem:[#allocation15 + $0x158] sm:$0xff]  ;;  %v2044_v18 = vld [vmem:[#allocation15 + $0x190] sm:$0xff] }
 0x410   : > { %5429 = vmatpush3.bf16.msra.mxu1 %v5426_v24  ;;  %v1578_v24 = vld [vmem:[#allocation15 + $0x18] sm:$0xff]  ;;  %v5490_v28 = vpack.c.bf16 %v2037_v27, %v2035_v26  ;;  %v1587_v26 = vld [vmem:[#allocation15 + $0x60] sm:$0xff]  ;;  %v1589_v27 = vld [vmem:[#allocation15 + $0x70] sm:$0xff] }
 0x411   : > { %5101 = vmatmul.mubr.f32.vlgmr.msra.gmra.mrb[6].mxu0 %v8677_v5  ;;  %5471 = vmatprep.subr.bf16.mxu1 %v5470_v32  ;;  %v1577_v32 = vld [vmem:[#allocation15 + $0x10] sm:$0xff] }
 0x412   : > { %5103 = vmatprep.mubr.f32.mxu0 %v6979_v20  ;;  %5433 = vmatpush1.bf16.msra.mxu0 %v5432_v37  ;;  %v5478_v20 = vpack.c.bf16 %v2066_v54, %v2064_v53  ;;  %v1582_v37 = vld [vmem:[#allocation15 + $0x38] sm:$0xff]  ;;  %v1579_v54 = vld [vmem:[#allocation15 + $0x20] sm:$0xff] }
 0x413   : > { %5189 = vmatmul.mubr.f32.vlgmr.msra.gmra.mrb[6].mxu1 %v6985_v34  ;;  %5435 = vmatprep.subr.bf16.mxu0 %v5434_v40  ;;  %v2034_v40 = vld [vmem:[#allocation15 + $0x140] sm:$0xff]  ;;  %v5454_v53 = vpack.c.bf16 %v1582_v37, %v1580_v35 }
 0x414   : > { %5191 = vmatprep.mubr.f32.mxu1 %v6981_v21  ;;  %5473 = vmatpush1.bf16.msra.mxu1 %v5472_v44  ;;  %v5452_v44 = vpack.c.bf16 %v1577_v32, %v1575_v31  ;;  %v5492_v58 = vpack.c.bf16 %v2036_v42, %v2034_v40  ;;  %v1592_v31 = vld [vmem:[#allocation15 + $0x88] sm:$0xff]  ;;  %v1594_v32 = vld [vmem:[#allocation15 + $0x98] sm:$0xff]  ;;  %v2048_v40 = vld [vmem:[#allocation15 + $0x1b0] sm:$0xff] }
 0x415   : > { %5104 = vmatmul.mubr.f32.gmra.mrb[8].mxu0 %v6985_v34  ;;  %5475 = vmatprep.subr.bf16.mxu1 %v5474_v47  ;;  %v5480_v34 = vpack.c.bf16 %v2065_v63, %v2063_v62  ;;  %v5494_v63 = vpack.c.bf16 %v2041_v46, %v2039_v45  ;;  %v2053_v45 = vld [vmem:[#allocation15 + $0x1d8] sm:$0xff]  ;;  %v5466_v46 = vpack.c.bf16 %v1594_v32, %v1592_v31  ;;  %v2498_v32 = vld [vmem:[#allocation18 + $0x20] sm:$0xff] }
 0x416   : > { %5106 = vmatprep.mubr.f32.mxu0 %v6981_v21  ;;  %5437 = vmatpush1.bf16.msra.mxu0 %v5436_v52  ;;  %v5444_v21 = vpack.c.bf16 %v1610_v9, %v1608_v7  ;;  %v2043_v7 = vld [vmem:[#allocation15 + $0x188] sm:$0xff]  ;;  %v2045_v9 = vld [vmem:[#allocation15 + $0x198] sm:$0xff] }
 0x417   : > { %5192 = vmatmul.mubr.f32.gmra.mrb[8].mxu1 %v6987_v36  ;;  %5439 = vmatprep.subr.bf16.mxu0 %v5438_v55  ;;  %v1581_v55 = vld [vmem:[#allocation15 + $0x30] sm:$0xff] }
 0x418   : > { %5194 = vmatprep.mubr.f32.mxu1 %v6990_v41  ;;  %5477 = vmatpush1.bf16.msra.mxu1 %v5476_v59  ;;  %v1584_v59 = vld [vmem:[#allocation15 + $0x48] sm:$0xff] }
 0x419   : > { %5107 = vmatmul.mubr.f32.gmra.mrb[10].mxu0 %v6987_v36  ;;  %5479 = vmatprep.subr.bf16.mxu1 %v5478_v20  ;;  %v2067_v36 = vld [vmem:[#allocation15 + $0x240] sm:$0xff] }
 0x41a   : > { %5109 = vmatprep.mubr.f32.mxu0 %v6990_v41  ;;  %5441 = vmatpush1.bf16.msra.mxu0 %v5440_v0  ;;  %v2069_v41 = vld [vmem:[#allocation15 + $0x250] sm:$0xff]  ;;  %v2038_v0 = vld [vmem:[#allocation15 + $0x160] sm:$0xff] }
 0x41b   : > { %5195 = vmatmul.mubr.f32.gmra.mrb[10].mxu1 %v6995_v48  ;;  %5443 = vmatprep.subr.bf16.mxu0 %v5442_v3  ;;  %v5484_v11 = vpack.c.bf16 %v2069_v41, %v2067_v36  ;;  %v5456_v3 = vpack.c.bf16 %v1581_v55, %v1579_v54  ;;  %v1583_v36 = vld [vmem:[#allocation15 + $0x40] sm:$0xff]  ;;  %v1585_v41 = vld [vmem:[#allocation15 + $0x50] sm:$0xff]  ;;  %v5496_v12 = vpack.c.bf16 %v2040_v1, %v2038_v0  ;;  %v8679_v0 = vmov 0.0|0.0  }
 0x41c   : > { %5197 = vmatprep.mubr.f32.mxu1 %v6998_v51  ;;  %5481 = vmatpush1.bf16.msra.mxu1 %v5480_v34  ;;  %v1614_v51 = vld [vmem:[#allocation15 + $0x130] sm:$0xff] }
 0x41d   : > { %5110 = vmatmul.mubr.f32.gmra.mrb[12].mxu0 %v6995_v48  ;;  %5483 = vmatprep.subr.bf16.mxu1 %v5482_v10  ;;  %v5448_v17 = vpack.c.bf16 %v1614_v51, %v1612_v15  ;;  %v2074_v48 = vld [vmem:[#allocation15 + $0x278] sm:$0xff] }
 0x41e   : > { %5445 = vmatpush1.bf16.msra.mxu0 %v5444_v21  ;;  %1729 = vmatprep.mubr.f32.mxu0 %v8677_v5  ;;  %v5486_v22 = vpack.c.bf16 %v2074_v48, %v2072_v16  ;;  %v5458_v21 = vpack.c.bf16 %v1586_v60, %v1584_v59  ;;  %v2042_v48 = vld [vmem:[#allocation15 + $0x180] sm:$0xff] }
 0x41f   : > { %5198 = vmatmul.mubr.f32.gmra.mrb[12].mxu1 %v7003_v57  ;;  %5447 = vmatprep.subr.bf16.mxu0 %v5446_v14  ;;  %v1576_v57 = vld [vmem:[#allocation15 + $0x8] sm:$0xff]  ;;  %v1590_v14 = vld [vmem:[#allocation15 + $0x78] sm:$0xff] }
 0x420   : > { %2139 = vmatprep.mubr.f32.mxu1 %v8677_v5  ;;  %5485 = vmatpush1.bf16.msra.mxu1 %v5484_v11  ;;  %v5450_v25 = vpack.c.bf16 %v1578_v24, %v1576_v57  ;;  %v2049_v57 = vld [vmem:[#allocation15 + $0x1b8] sm:$0xff] }
 0x421   : > { %5487 = vmatprep.subr.bf16.mxu1 %v5486_v22  ;;  %v5460_v22 = vpack.c.bf16 %v1585_v41, %v1583_v36 }
 0x422   : > { %5449 = vmatpush1.bf16.msra.mxu0 %v5448_v17  ;;  %v5498_v17 = vpack.c.bf16 %v2045_v9, %v2043_v7 }
 0x423   : > { %5451 = vmatprep.subr.bf16.mxu0 %v5450_v25  ;;  %v5462_v25 = vpack.c.bf16 %v1590_v14, %v1588_v13 }
 0x424   : > { %5489 = vmatpush1.bf16.msra.mxu1 %v5488_v23  ;;  %v2047_v23 = vld [vmem:[#allocation15 + $0x1a8] sm:$0xff] }
 0x425   : > { %5491 = vmatprep.subr.bf16.mxu1 %v5490_v28 }
 0x4e4   : > { %v5102_v30 = vpop.f32.mrb[6].mxu0 }
 0x4e5   : > { %v1253_v33 = vpop.f32.mrb[7].mxu0  ;;  %v1299_v47 = vadd.f32 %v5102_v30, %v7029_v29  ;;  %v5500_v30 = vpack.c.bf16 %v2044_v18, %v2042_v48  ;;  %v2514_v48 = vld [vmem:[#allocation18 + $0x98] sm:$0xff]  ;;  %v2494_v18 = vld [vmem:[#allocation18] sm:$0xff] }
 0x4e6   : > { %v1298_v38 = vadd.f32 %v7029_v29, %v1253_v33  ;;  %v5190_v39 = vpop.f32.mrb[6].mxu1 }
 0x4e7   : > { %v1511_v43 = vpop.f32.mrb[7].mxu1  ;;  %v1551_v61 = vadd.f32 %v5190_v39, %v7029_v29  ;;  %v7046_v34 = vmax.f32 %v1299_v47, 0.0  ;;  %v2046_v39 = vld [vmem:[#allocation15 + $0x1a0] sm:$0xff] }
 0x4e8   : > { %v7033_v49 = vmax.f32 %v1298_v38, 0.0  ;;  %v1550_v50 = vadd.f32 %v7029_v29, %v1511_v43  ;;  %v5105_v52 = vpop.f32.mrb[8].mxu0  ;;  %v5502_v38 = vpack.c.bf16 %v2049_v57, %v2047_v23  ;;  %v5464_v43 = vpack.c.bf16 %v1589_v27, %v1587_v26  ;;  %v1591_v47 = vld [vmem:[#allocation15 + $0x80] sm:$0xff]  ;;  %v2516_v57 = vld [vmem:[#allocation18 + $0xa8] sm:$0xff] }
 0x4e9   : > { %v1263_v56 = vpop.f32.mrb[9].mxu0  ;;  %v7055_v15 = vmax.f32 %v1551_v61, 0.0  ;;  %v1301_v33 = vadd.f32 %v5105_v52, %v7029_v29  ;;  %v5504_v52 = vpack.c.bf16 %v2048_v40, %v2046_v39  ;;  %v2515_v23 = vld [vmem:[#allocation18 + $0xa0] sm:$0xff]  ;;  %v2497_v26 = vld [vmem:[#allocation18 + $0x18] sm:$0xff]  ;;  %v2520_v39 = vld [vmem:[#allocation18 + $0xc8] sm:$0xff] }
 0x4ea   : > { %v7037_v20 = vmax.f32 %v1550_v50, 0.0  ;;  %v7039_v62 = vpop.f32.mrb[8].mxu1  ;;  %4607 = vmatmul.mubr.msk.f32.vlgmr.msra.gmra.mrb[14].mxu0 %vm1616_vm4, %v7033_v49  ;;  %v1300_v51 = vadd.f32 %v7029_v29, %v1263_v56  ;;  %v1593_v50 = vld [vmem:[#allocation15 + $0x90] sm:$0xff]  ;;  %v2050_v56 = vld [vmem:[#allocation15 + $0x1c0] sm:$0xff]  ;;  %v5514_v27 = vpack.c.bf16 %v2516_v57, %v2515_v23 }
 0x4eb   : > { %v7043_v2 = vpop.f32.mrb[9].mxu1  ;;  %5453 = vmatpush1.bf16.msra.mxu0 %v5452_v44  ;;  %1735 = vmatprep.mubr.f32.mxu0 %v8677_v5  ;;  %v2051_v44 = vld [vmem:[#allocation15 + $0x1c8] sm:$0xff]  ;;  %v5468_v59 = vpack.c.bf16 %v1593_v50, %v1591_v47  ;;  %v1553_v61 = vadd.f32 %v7039_v62, %v7029_v29  ;;  %v3126_v23 = vld [vmem:[#allocation18 + $0x158] sm:$0xff] }
 0x4ec   : > { %4637 = vmatmul.mubr.msk.f32.vlgmr.msra.gmra.mrb[14].mxu1 %vm1616_vm4, %v7037_v20  ;;  %v7050_v10 = vpop.f32.mrb[10].mxu0  ;;  %5455 = vmatprep.subr.bf16.mxu0 %v5454_v53  ;;  %v7073_v35 = vmax.f32 %v1300_v51, 0.0  ;;  %v7085_v53 = vmax.f32 %v1301_v33, 0.0  ;;  %v1552_v54 = vadd.f32 %v7029_v29, %v7043_v2  ;;  %v5506_v55 = vpack.c.bf16 %v2053_v45, %v2051_v44  ;;  %v2499_v33 = vld [vmem:[#allocation18 + $0x28] sm:$0xff]  ;;  %v2521_v45 = vld [vmem:[#allocation18 + $0xd0] sm:$0xff] }
 0x4ed   : > { %v7052_v11 = vpop.f32.mrb[11].mxu0  ;;  %2145 = vmatprep.mubr.f32.mxu1 %v8677_v5  ;;  %5493 = vmatpush1.bf16.msra.mxu1 %v5492_v58  ;;  %v2052_v58 = vld [vmem:[#allocation15 + $0x1d0] sm:$0xff]  ;;  %v7106_v1 = vmax.f32 %v1553_v61, 0.0  ;;  %v1303_v2 = vadd.f32 %v7050_v10, %v7029_v29  ;;  %v5544_v40 = vpack.c.bf16 %v2499_v33, %v2498_v32  ;;  %v2526_v61 = vld [vmem:[#allocation18 + $0xf8] sm:$0xff] }
 0x4ee   : > { %v7058_v16 = vpop.f32.mrb[10].mxu1  ;;  %4608 = vmatmul.mubr.msk.f32.gmra.mrb[16].mxu0 %vm1616_vm4, %v7046_v34  ;;  %5495 = vmatprep.subr.bf16.mxu1 %v5494_v63  ;;  %v5508_v60 = vpack.c.bf16 %v2052_v58, %v2050_v56  ;;  %v7097_v63 = vmax.f32 %v1552_v54, 0.0  ;;  %v1302_v62 = vadd.f32 %v7029_v29, %v7052_v11  ;;  %v2503_v50 = vld [vmem:[#allocation18 + $0x48] sm:$0xff]  ;;  %v2523_v54 = vld [vmem:[#allocation18 + $0xe0] sm:$0xff]  ;;  %v2505_v58 = vld [vmem:[#allocation18 + $0x58] sm:$0xff] }
 0x4ef   : > { %v7062_v19 = vpop.f32.mrb[11].mxu1  ;;  %1741 = vmatprep.mubr.f32.mxu0 %v8677_v5  ;;  %5457 = vmatpush1.bf16.msra.mxu0 %v5456_v3  ;;  %v7127_v7 = vmax.f32 %v1303_v2, 0.0  ;;  %v1555_v10 = vadd.f32 %v7058_v16, %v7029_v29  ;;  %v2507_v2 = vld [vmem:[#allocation18 + $0x68] sm:$0xff] }
 0x4f0   : > { %4638 = vmatmul.mubr.msk.f32.gmra.mrb[16].mxu1 %vm1616_vm4, %v7055_v15  ;;  %v7067_v24 = vpop.f32.mrb[12].mxu0  ;;  %5459 = vmatprep.subr.bf16.mxu0 %v5458_v21  ;;  %v7119_v3 = vmax.f32 %v1302_v62, 0.0  ;;  %v1554_v9 = vadd.f32 %v7029_v29, %v7062_v19  ;;  %v2495_v19 = vld [vmem:[#allocation18 + $0x8] sm:$0xff] }
 0x4f1   : > { %v7069_v28 = vpop.f32.mrb[13].mxu0  ;;  %2151 = vmatprep.mubr.f32.mxu1 %v8677_v5  ;;  %5497 = vmatpush1.bf16.msra.mxu1 %v5496_v12  ;;  %v7147_v36 = vmax.f32 %v1555_v10, 0.0  ;;  %v1305_v11 = vadd.f32 %v7067_v24, %v7029_v29  ;;  %v5538_v24 = vpack.c.bf16 %v2495_v19, %v2494_v18  ;;  %v2527_v10 = vld [vmem:[#allocation18 + $0x100] sm:$0xff]  ;;  %v3132_v32 = vld [vmem:[#allocation18 + $0x188] sm:$0xff] }
 0x4f2   : > { %v7075_v37 = vpop.f32.mrb[12].mxu1  ;;  %4609 = vmatmul.mubr.msk.f32.gmra.mrb[18].mxu0 %vm1616_vm4, %v7037_v20  ;;  %5499 = vmatprep.subr.bf16.mxu1 %v5498_v17  ;;  %v7139_v21 = vmax.f32 %v1554_v9, 0.0  ;;  %v1304_v41 = vadd.f32 %v7029_v29, %v7069_v28  ;;  %v2517_v28 = vld [vmem:[#allocation18 + $0xb0] sm:$0xff] }
 0x4f3   : > { %v7079_v42 = vpop.f32.mrb[13].mxu1  ;;  %1747 = vmatprep.mubr.f32.mxu0 %v8677_v5  ;;  %5461 = vmatpush1.bf16.msra.mxu0 %v5460_v22  ;;  %v7167_v13 = vmax.f32 %v1305_v11, 0.0  ;;  %v1557_v51 = vadd.f32 %v7075_v37, %v7029_v29 }
 0x4f4   : > { %4639 = vmatmul.mubr.msk.f32.gmra.mrb[18].mxu1 %vm1616_vm4, %v7073_v35  ;;  %5463 = vmatprep.subr.bf16.mxu0 %v5462_v25  ;;  %v7159_v12 = vmax.f32 %v1304_v41, 0.0  ;;  %v1556_v14 = vadd.f32 %v7029_v29, %v7079_v42  ;;  %v2513_v29 = vld [vmem:[#allocation18 + $0x90] sm:$0xff]  ;;  %v2528_v41 = vld [vmem:[#allocation18 + $0x108] sm:$0xff] }
 0x4f5   : > { %2157 = vmatprep.mubr.f32.mxu1 %v8677_v5  ;;  %5501 = vmatpush1.bf16.msra.mxu1 %v5500_v30  ;;  %v7187_v17 = vmax.f32 %v1557_v51, 0.0  ;;  %v5511_v22 = vpack.c.bf16 %v2514_v48, %v2513_v29  ;;  %v2496_v25 = vld [vmem:[#allocation18 + $0x10] sm:$0xff]  ;;  %v2518_v30 = vld [vmem:[#allocation18 + $0xb8] sm:$0xff]  ;;  %v5532_v51 = vpack.c.bf16 %v2528_v41, %v2527_v10  ;;  %v2511_v48 = vld [vmem:[#allocation18 + $0x88] sm:$0xff] }
 0x4f6   : > { %4610 = vmatmul.mubr.msk.f32.gmra.mrb[20].mxu0 %vm1616_vm4, %v7055_v15  ;;  %5503 = vmatprep.subr.bf16.mxu1 %v5502_v38  ;;  %v7179_v16 = vmax.f32 %v1556_v14, 0.0  ;;  %v5541_v31 = vpack.c.bf16 %v2497_v26, %v2496_v25  ;;  %v5517_v37 = vpack.c.bf16 %v2518_v30, %v2517_v28  ;;  %v2519_v38 = vld [vmem:[#allocation18 + $0xc0] sm:$0xff]  ;;  %v2500_v42 = vld [vmem:[#allocation18 + $0x30] sm:$0xff]  ;;  %v2509_v14 = vld [vmem:[#allocation18 + $0x78] sm:$0xff] }
 0x4f7   : > { %1753 = vmatprep.mubr.f32.mxu0 %v8677_v5  ;;  %5465 = vmatpush1.bf16.msra.mxu0 %v5464_v43  ;;  %v2501_v43 = vld [vmem:[#allocation18 + $0x38] sm:$0xff]  ;;  %v5520_v44 = vpack.c.bf16 %v2520_v39, %v2519_v38  ;;  %v3128_v25 = vld [vmem:[#allocation18 + $0x168] sm:$0xff] }
 0x4f8   : > { %4640 = vmatmul.mubr.msk.f32.gmra.mrb[20].mxu1 %vm1616_vm4, %v7085_v53  ;;  %5467 = vmatprep.subr.bf16.mxu0 %v5466_v46  ;;  %v2522_v46 = vld [vmem:[#allocation18 + $0xd8] sm:$0xff]  ;;  %v5547_v47 = vpack.c.bf16 %v2501_v43, %v2500_v42  ;;  %v3135_v42 = vld [vmem:[#allocation18 + $0x1a0] sm:$0xff]  ;;  %v3136_v43 = vld [vmem:[#allocation18 + $0x1a8] sm:$0xff] }
 0x4f9   : > { %2163 = vmatprep.mubr.f32.mxu1 %v8677_v5  ;;  %5505 = vmatpush1.bf16.msra.mxu1 %v5504_v52  ;;  %v5523_v52 = vpack.c.bf16 %v2522_v46, %v2521_v45  ;;  %v3130_v28 = vld [vmem:[#allocation18 + $0x178] sm:$0xff] }
 0x4fa   : > { %4611 = vmatmul.mubr.msk.f32.gmra.mrb[22].mxu0 %vm1616_vm4, %v7073_v35  ;;  %5507 = vmatprep.subr.bf16.mxu1 %v5506_v55  ;;  %v2524_v55 = vld [vmem:[#allocation18 + $0xe8] sm:$0xff]  ;;  %v3134_v38 = vld [vmem:[#allocation18 + $0x198] sm:$0xff] }
 0x4fb   : > { %1759 = vmatprep.mubr.f32.mxu0 %v8677_v5  ;;  %5469 = vmatpush1.bf16.msra.mxu0 %v5468_v59  ;;  %v5526_v59 = vpack.c.bf16 %v2524_v55, %v2523_v54  ;;  %v3139_v54 = vld [vmem:[#allocation18 + $0x1b8] sm:$0xff] }
 0x4fc   : > { %4641 = vmatmul.mubr.msk.f32.gmra.mrb[22].mxu1 %vm1616_vm4, %v7097_v63  ;;  %5510 = vmatprep.subr.bf16.mxu0 %v8679_v0 }
 0x4fd   : > { %2169 = vmatprep.mubr.f32.mxu1 %v8677_v5  ;;  %5509 = vmatpush1.bf16.msra.mxu1 %v5508_v60  ;;  %v2525_v60 = vld [vmem:[#allocation18 + $0xf0] sm:$0xff] }
 0x4fe   : > { %4612 = vmatmul.mubr.msk.f32.gmra.mrb[24].mxu0 %vm1616_vm4, %v7085_v53  ;;  %5537 = vmatprep.subr.bf16.mxu1 %v8679_v0  ;;  %v5529_v9 = vpack.c.bf16 %v2526_v61, %v2525_v60 }
 0x4ff   : > { %1765 = vmatprep.mubr.f32.mxu0 %v8677_v5 }
 0x500   : > { %4642 = vmatmul.mubr.msk.f32.gmra.mrb[24].mxu1 %vm1616_vm4, %v7106_v1 }
 0x501   : > { %2175 = vmatprep.mubr.f32.mxu1 %v8677_v5 }
 0x502   : > { %4613 = vmatmul.mubr.msk.f32.gmra.mrb[26].mxu0 %vm1616_vm4, %v7097_v63 }
 0x503   : > { %1771 = vmatprep.mubr.f32.mxu0 %v8677_v5 }
 0x504   : > { %4643 = vmatmul.mubr.msk.f32.gmra.mrb[26].mxu1 %vm1616_vm4, %v7119_v3 }
 0x505   : > { %2181 = vmatprep.mubr.f32.mxu1 %v8677_v5 }
 0x506   : > { %4614 = vmatmul.mubr.msk.f32.gmra.mrb[28].mxu0 %vm1616_vm4, %v7106_v1 }
 0x507   : > { %1777 = vmatprep.mubr.f32.mxu0 %v8677_v5 }
 0x508   : > { %4644 = vmatmul.mubr.msk.f32.gmra.mrb[28].mxu1 %vm1616_vm4, %v7127_v7 }
 0x509   : > { %2187 = vmatprep.mubr.f32.mxu1 %v8677_v5 }
 0x50a   : > { %4615 = vmatmul.mubr.msk.f32.gmra.mrb[30].mxu0 %vm1616_vm4, %v7119_v3 }
 0x50b   : > { %1783 = vmatprep.mubr.f32.mxu0 %v8677_v5 }
 0x50c   : > { %4645 = vmatmul.mubr.msk.f32.gmra.mrb[30].mxu1 %vm1616_vm4, %v7139_v21 }
 0x50d   : > { %2193 = vmatprep.mubr.f32.mxu1 %v8677_v5 }
 0x50e   : > { %4616 = vmatmul.mubr.msk.f32.gmra.mrb[32].mxu0 %vm1616_vm4, %v7127_v7 }
 0x50f   : > { %1789 = vmatprep.mubr.f32.mxu0 %v8677_v5 }
 0x510   : > { %4646 = vmatmul.mubr.msk.f32.gmra.mrb[32].mxu1 %vm1616_vm4, %v7147_v36 }
 0x511   : > { %2199 = vmatprep.mubr.f32.mxu1 %v8677_v5 }
 0x512   : > { %4617 = vmatmul.mubr.msk.f32.gmra.mrb[34].mxu0 %vm1616_vm4, %v7139_v21 }
 0x513   : > { %1795 = vmatprep.mubr.f32.mxu0 %v8677_v5 }
 0x514   : > { %4647 = vmatmul.mubr.msk.f32.gmra.mrb[34].mxu1 %vm1616_vm4, %v7159_v12 }
 0x515   : > { %2205 = vmatprep.mubr.f32.mxu1 %v8677_v5 }
 0x516   : > { %4618 = vmatmul.mubr.msk.f32.gmra.mrb[36].mxu0 %vm1616_vm4, %v7147_v36 }
 0x517   : > { %1801 = vmatprep.mubr.f32.mxu0 %v8677_v5 }
 0x518   : > { %4648 = vmatmul.mubr.msk.f32.gmra.mrb[36].mxu1 %vm1616_vm4, %v7167_v13 }
 0x519   : > { %2211 = vmatprep.mubr.f32.mxu1 %v8677_v5 }
 0x51a   : > { %4619 = vmatmul.mubr.msk.f32.gmra.mrb[38].mxu0 %vm1616_vm4, %v7159_v12 }
 0x51b   : > { %1807 = vmatprep.mubr.f32.mxu0 %v8677_v5 }
 0x51c   : > { %4649 = vmatmul.mubr.msk.f32.gmra.mrb[38].mxu1 %vm1616_vm4, %v7179_v16 }
 0x51d   : > { %2217 = vmatprep.mubr.f32.mxu1 %v8677_v5 }
 0x51e   : > { %4620 = vmatmul.mubr.msk.f32.gmra.mrb[40].mxu0 %vm1616_vm4, %v7167_v13 }
 0x51f   : > { %1813 = vmatprep.mubr.f32.mxu0 %v8677_v5 }
 0x520   : > { %4650 = vmatmul.mubr.msk.f32.gmra.mrb[40].mxu1 %vm1616_vm4, %v7187_v17 }
 0x521   : > { %2223 = vmatprep.mubr.f32.mxu1 %v8677_v5 }
 0x522   : > { %4621 = vmatmul.mubr.msk.f32.gmra.mrb[42].mxu0 %vm1616_vm4, %v7179_v16 }
 0x523   : > { %1819 = vmatprep.mubr.f32.mxu0 %v8677_v5 }
 0x524   : > { %2224 = vmatmul.mubr.f32.gmra.mrb[42].mxu1 %v8677_v5 }
 0x525   : > { %2229 = vmatprep.mubr.f32.mxu1 %v8677_v5 }
 0x526   : > { %4622 = vmatmul.mubr.msk.f32.gmra.mrb[44].mxu0 %vm1616_vm4, %v7187_v17 }
 0x527   : > { %1893 = vmatprep.mubr.f32.mxu0 %v8677_v5 }
 0x528   : > { %2230 = vmatmul.mubr.f32.gmra.mrb[44].mxu1 %v8677_v5 }
 0x529   : > { %2300 = vmatprep.mubr.f32.mxu1 %v8677_v5 }
 0x52a   : > { %1894 = vmatmul.mubr.f32.vlgmr.msra.gmra.mrb[14].mxu0 %v8677_v5 }
 0x52b   : > { %1899 = vmatprep.mubr.f32.mxu0 %v8677_v5  ;;  %5512 = vmatpush1.bf16.msra.mxu0 %v5511_v22  ;;  %v3125_v22 = vld [vmem:[#allocation18 + $0x150] sm:$0xff] }
 0x52c   : > { %4651 = vmatmul.mubr.msk.f32.vlgmr.msra.gmra.mrb[14].mxu1 %vm1616_vm4, %v7033_v49  ;;  %5513 = vmatprep.subr.bf16.mxu0 %v8679_v0  ;;  %v7331_v57 = vpack.c.bf16 %v3126_v23, %v3125_v22 }
 0x52d   : > { %2306 = vmatprep.mubr.f32.mxu1 %v8677_v5  ;;  %5539 = vmatpush1.bf16.msra.mxu1 %v5538_v24  ;;  %v3127_v24 = vld [vmem:[#allocation18 + $0x160] sm:$0xff] }
 0x52e   : > { %1900 = vmatmul.mubr.f32.gmra.mrb[16].mxu0 %v8677_v5  ;;  %5540 = vmatprep.subr.bf16.mxu1 %v8679_v0  ;;  %v7335_v26 = vpack.c.bf16 %v3128_v25, %v3127_v24 }
 0x52f   : > { %1905 = vmatprep.mubr.f32.mxu0 %v8677_v5  ;;  %5515 = vmatpush1.bf16.msra.mxu0 %v5514_v27  ;;  %v3129_v27 = vld [vmem:[#allocation18 + $0x170] sm:$0xff] }
 0x530   : > { %4652 = vmatmul.mubr.msk.f32.gmra.mrb[16].mxu1 %vm1616_vm4, %v7046_v34  ;;  %5516 = vmatprep.subr.bf16.mxu0 %v8679_v0  ;;  %8741 = vst [vmem:[#allocation32_spill] sm:$0xff] %v7335_v26  ;;  %v7339_v30 = vpack.c.bf16 %v3130_v28, %v3129_v27  ;;  %v3144_v27 = vld [vmem:[#allocation18 + $0x1e0] sm:$0xff]  ;;  %v3145_v28 = vld [vmem:[#allocation18 + $0x1e8] sm:$0xff] }
 0x531   : > { %2312 = vmatprep.mubr.f32.mxu1 %v8677_v5  ;;  %5542 = vmatpush1.bf16.msra.mxu1 %v5541_v31  ;;  %v3131_v31 = vld [vmem:[#allocation18 + $0x180] sm:$0xff] }
 0x532   : > { %4623 = vmatmul.mubr.msk.f32.gmra.mrb[18].mxu0 %vm1616_vm4, %v7033_v49  ;;  %5543 = vmatprep.subr.bf16.mxu1 %v8679_v0  ;;  %v2502_v49 = vld [vmem:[#allocation18 + $0x40] sm:$0xff]  ;;  %8742 = vst [vmem:[#allocation33_spill] sm:$0xff] %v7339_v30  ;;  %v7343_v33 = vpack.c.bf16 %v3132_v32, %v3131_v31 }
 0x533   : > { %1911 = vmatprep.mubr.f32.mxu0 %v8677_v5  ;;  %5518 = vmatpush1.bf16.msra.mxu0 %v5517_v37  ;;  %v5550_v56 = vpack.c.bf16 %v2503_v50, %v2502_v49  ;;  %v3133_v37 = vld [vmem:[#allocation18 + $0x190] sm:$0xff] }
 0x534   : > { %4653 = vmatmul.mubr.msk.f32.gmra.mrb[18].mxu1 %vm1616_vm4, %v7037_v20  ;;  %5519 = vmatprep.subr.bf16.mxu0 %v8679_v0  ;;  %8743 = vst [vmem:[#allocation34_spill] sm:$0xff] %v7343_v33  ;;  %v7347_v39 = vpack.c.bf16 %v3134_v38, %v3133_v37 }
 0x535   : > { %2318 = vmatprep.mubr.f32.mxu1 %v8677_v5  ;;  %5545 = vmatpush1.bf16.msra.mxu1 %v5544_v40  ;;  %v1574_v40 = vld [vmem:[#allocation16] sm:$0x3] }
 0x536   : > { %4624 = vmatmul.mubr.msk.f32.gmra.mrb[20].mxu0 %vm1616_vm4, %v7046_v34  ;;  %5546 = vmatprep.subr.bf16.mxu1 %v8679_v0  ;;  %v2504_v34 = vld [vmem:[#allocation18 + $0x50] sm:$0xff]  ;;  %8744 = vst [vmem:[#allocation35_spill] sm:$0xff] %v7347_v39  ;;  %v7355_v45 = vrot.slane %v1574_v40, %v868_v6  ;;  %v7360_v46 = vrot.slane %v1574_v40, %v872_v8 }
 0x537   : > { %1917 = vmatprep.mubr.f32.mxu0 %v8677_v5  ;;  %5521 = vmatpush1.bf16.msra.mxu0 %v5520_v44  ;;  %v5553_v62 = vpack.c.bf16 %v2505_v58, %v2504_v34  ;;  %v7351_v44 = vpack.c.bf16 %v3136_v43, %v3135_v42  ;;  %v5574_v43 = vpack.c.bf16 %v3145_v28, %v3144_v27 }
 0x538   : > { %4654 = vmatmul.mubr.msk.f32.gmra.mrb[20].mxu1 %vm1616_vm4, %v7055_v15  ;;  %5522 = vmatprep.subr.bf16.mxu0 %v8679_v0 }
 0x539   : > { %2324 = vmatprep.mubr.f32.mxu1 %v8677_v5  ;;  %5548 = vmatpush1.bf16.msra.mxu1 %v5547_v47  ;;  %8745 = vst [vmem:[#allocation36_spill] sm:$0xff] %v7351_v44 }
 0x53a   : > { %4625 = vmatmul.mubr.msk.f32.gmra.mrb[22].mxu0 %vm1616_vm4, %v7037_v20  ;;  %5549 = vmatprep.subr.bf16.mxu1 %v8679_v0  ;;  %v2506_v20 = vld [vmem:[#allocation18 + $0x60] sm:$0xff] }
 0x53b   : > { %1923 = vmatprep.mubr.f32.mxu0 %v8677_v5  ;;  %5524 = vmatpush1.bf16.msra.mxu0 %v5523_v52  ;;  %v5556_v11 = vpack.c.bf16 %v2507_v2, %v2506_v20  ;;  %v3138_v52 = vld [vmem:[#allocation18 + $0x1b0] sm:$0xff]  ;;  %v3140_v2 = vld [vmem:[#allocation18 + $0x1c0] sm:$0xff] }
 0x53c   : > { %4655 = vmatmul.mubr.msk.f32.gmra.mrb[22].mxu1 %vm1616_vm4, %v7073_v35  ;;  %5525 = vmatprep.subr.bf16.mxu0 %v8679_v0  ;;  %v5565_v60 = vpack.c.bf16 %v3139_v54, %v3138_v52  ;;  %v3146_v52 = vld [vmem:[#allocation18 + $0x1f0] sm:$0xff]  ;;  %v3147_v54 = vld [vmem:[#allocation18 + $0x1f8] sm:$0xff] }
 0x53d   : > { %2330 = vmatprep.mubr.f32.mxu1 %v8677_v5  ;;  %5551 = vmatpush1.bf16.msra.mxu1 %v5550_v56 }
 0x53e   : > { %4626 = vmatmul.mubr.msk.f32.gmra.mrb[24].mxu0 %vm1616_vm4, %v7055_v15  ;;  %5552 = vmatprep.subr.bf16.mxu1 %v8679_v0  ;;  %v2508_v15 = vld [vmem:[#allocation18 + $0x70] sm:$0xff] }
 0x53f   : > { %1929 = vmatprep.mubr.f32.mxu0 %v8677_v5  ;;  %5527 = vmatpush1.bf16.msra.mxu0 %v5526_v59  ;;  %v5559_v29 = vpack.c.bf16 %v2509_v14, %v2508_v15 }
 0x540   : > { %4656 = vmatmul.mubr.msk.f32.gmra.mrb[24].mxu1 %vm1616_vm4, %v7085_v53  ;;  %5528 = vmatprep.subr.bf16.mxu0 %v8679_v0 }
 0x541   : > { %2336 = vmatprep.mubr.f32.mxu1 %v8677_v5  ;;  %5554 = vmatpush1.bf16.msra.mxu1 %v5553_v62 }
 0x542   : > { %4627 = vmatmul.mubr.msk.f32.gmra.mrb[26].mxu0 %vm1616_vm4, %v7073_v35  ;;  %5555 = vmatprep.subr.bf16.mxu1 %v8679_v0  ;;  %v2510_v35 = vld [vmem:[#allocation18 + $0x80] sm:$0xff] }
 0x543   : > { %1935 = vmatprep.mubr.f32.mxu0 %v8677_v5  ;;  %5530 = vmatpush1.bf16.msra.mxu0 %v5529_v9  ;;  %v5562_v18 = vpack.c.bf16 %v2511_v48, %v2510_v35  ;;  %v3141_v9 = vld [vmem:[#allocation18 + $0x1c8] sm:$0xff] }
 0x544   : > { %4657 = vmatmul.mubr.msk.f32.gmra.mrb[26].mxu1 %vm1616_vm4, %v7097_v63  ;;  %5531 = vmatprep.subr.bf16.mxu0 %v8679_v0  ;;  %v5568_v35 = vpack.c.bf16 %v3141_v9, %v3140_v2  ;;  %v3148_v2 = vld [vmem:[#allocation18 + $0x200] sm:$0xff]  ;;  %v3149_v9 = vld [vmem:[#allocation18 + $0x208] sm:$0xff] }
 0x545   : > { %2342 = vmatprep.mubr.f32.mxu1 %v8677_v5  ;;  %5557 = vmatpush1.bf16.msra.mxu1 %v5556_v11 }
 0x546   : > { %4628 = vmatmul.mubr.msk.f32.gmra.mrb[28].mxu0 %vm1616_vm4, %v7085_v53  ;;  %5558 = vmatprep.subr.bf16.mxu1 %v8679_v0  ;;  %v2529_v53 = vld [vmem:[#allocation18 + $0x110] sm:$0xff] }
 0x547   : > { %1941 = vmatprep.mubr.f32.mxu0 %v8677_v5  ;;  %5533 = vmatpush1.bf16.msra.mxu0 %v5532_v51 }
 0x548   : > { %4658 = vmatmul.mubr.msk.f32.gmra.mrb[28].mxu1 %vm1616_vm4, %v7106_v1  ;;  %5534 = vmatprep.subr.bf16.mxu0 %v8679_v0 }
 0x549   : > { %2348 = vmatprep.mubr.f32.mxu1 %v8677_v5  ;;  %5560 = vmatpush1.bf16.msra.mxu1 %v5559_v29 }
 0x54a   : > { %4629 = vmatmul.mubr.msk.f32.gmra.mrb[30].mxu0 %vm1616_vm4, %v7097_v63  ;;  %5561 = vmatprep.subr.bf16.mxu1 %v8679_v0  ;;  %v2530_v63 = vld [vmem:[#allocation18 + $0x118] sm:$0xff] }
 0x54b   : > { %1947 = vmatprep.mubr.f32.mxu0 %v8677_v5 }
 0x54c   : > { %4659 = vmatmul.mubr.msk.f32.gmra.mrb[30].mxu1 %vm1616_vm4, %v7119_v3 }
 0x54d   : > { %2354 = vmatprep.mubr.f32.mxu1 %v8677_v5  ;;  %5563 = vmatpush1.bf16.msra.mxu1 %v5562_v18 }
 0x54e   : > { %4630 = vmatmul.mubr.msk.f32.gmra.mrb[32].mxu0 %vm1616_vm4, %v7106_v1  ;;  %5618 = vmatprep.subr.bf16.mxu1 %v8679_v0  ;;  %v5535_v1 = vpack.c.bf16 %v2530_v63, %v2529_v53  ;;  %v3142_v63 = vld [vmem:[#allocation18 + $0x1d0] sm:$0xff] }
 0x54f   : > { %1953 = vmatprep.mubr.f32.mxu0 %v8677_v5 }
 0x550   : > { %4660 = vmatmul.mubr.msk.f32.gmra.mrb[32].mxu1 %vm1616_vm4, %v7127_v7  ;;  %5536 = vmatpush1.bf16.msra.mxu0 %v5535_v1  ;;  %v3143_v1 = vld [vmem:[#allocation18 + $0x1d8] sm:$0xff] }
 0x551   : > { %2360 = vmatprep.mubr.f32.mxu1 %v8677_v5  ;;  %5564 = vmatprep.subr.bf16.mxu0 %v8679_v0  ;;  %v5571_v22 = vpack.c.bf16 %v3143_v1, %v3142_v63 }
 0x552   : > { %4631 = vmatmul.mubr.msk.f32.gmra.mrb[34].mxu0 %vm1616_vm4, %v7119_v3  ;;  %v3119_v3 = vld [vmem:[#allocation18 + $0x120] sm:$0xff] }
 0x553   : > { %1959 = vmatprep.mubr.f32.mxu0 %v8677_v5 }
 0x554   : > { %4661 = vmatmul.mubr.msk.f32.gmra.mrb[34].mxu1 %vm1616_vm4, %v7139_v21 }
 0x555   : > { %2366 = vmatprep.mubr.f32.mxu1 %v8677_v5 }
 0x556   : > { %4632 = vmatmul.mubr.msk.f32.gmra.mrb[36].mxu0 %vm1616_vm4, %v7127_v7  ;;  %v3120_v7 = vld [vmem:[#allocation18 + $0x128] sm:$0xff] }
 0x557   : > { %1965 = vmatprep.mubr.f32.mxu0 %v8677_v5 }
 0x558   : > { %4662 = vmatmul.mubr.msk.f32.gmra.mrb[36].mxu1 %vm1616_vm4, %v7147_v36 }
 0x559   : > { %2372 = vmatprep.mubr.f32.mxu1 %v8677_v5 }
 0x55a   : > { %4633 = vmatmul.mubr.msk.f32.gmra.mrb[38].mxu0 %vm1616_vm4, %v7139_v21  ;;  %v7319_v21 = vpack.c.bf16 %v3120_v7, %v3119_v3 }
 0x55b   : > { %1971 = vmatprep.mubr.f32.mxu0 %v8677_v5 }
 0x55c   : > { %4663 = vmatmul.mubr.msk.f32.gmra.mrb[38].mxu1 %vm1616_vm4, %v7159_v12 }
 0x55d   : > { %2378 = vmatprep.mubr.f32.mxu1 %v8677_v5 }
 0x55e   : > { %4634 = vmatmul.mubr.msk.f32.gmra.mrb[40].mxu0 %vm1616_vm4, %v7147_v36  ;;  %v3121_v36 = vld [vmem:[#allocation18 + $0x130] sm:$0xff] }
 0x55f   : > { %1977 = vmatprep.mubr.f32.mxu0 %v8677_v5 }
 0x560   : > { %4664 = vmatmul.mubr.msk.f32.gmra.mrb[40].mxu1 %vm1616_vm4, %v7167_v13 }
 0x561   : > { %2384 = vmatprep.mubr.f32.mxu1 %v8677_v5 }
 0x562   : > { %4635 = vmatmul.mubr.msk.f32.gmra.mrb[42].mxu0 %vm1616_vm4, %v7159_v12  ;;  %v3122_v12 = vld [vmem:[#allocation18 + $0x138] sm:$0xff] }
 0x563   : > { %1983 = vmatprep.mubr.f32.mxu0 %v8677_v5 }
 0x564   : > { %4665 = vmatmul.mubr.msk.f32.gmra.mrb[42].mxu1 %vm1616_vm4, %v7179_v16  ;;  %v3123_v16 = vld [vmem:[#allocation18 + $0x140] sm:$0xff] }
 0x565   : > { %2390 = vmatprep.mubr.f32.mxu1 %v8677_v5 }
 0x566   : > { %4636 = vmatmul.mubr.msk.f32.gmra.mrb[44].mxu0 %vm1616_vm4, %v7167_v13  ;;  %v7323_v13 = vpack.c.bf16 %v3122_v12, %v3121_v36 }
 0x568   : > { %4666 = vmatmul.mubr.msk.f32.gmra.mrb[44].mxu1 %vm1616_vm4, %v7187_v17  ;;  %v3124_v17 = vld [vmem:[#allocation18 + $0x148] sm:$0xff] }
 0x569   : > { %2919 = vmatprep.mubr.f32.mxu1 %v8677_v5  ;;  %v7327_v19 = vpack.c.bf16 %v3124_v17, %v3123_v16 }
 0x56c   : > { %2920 = vmatmul.mubr.f32.vlgmr.msra.gmra.mrb[46].mxu1 %v8677_v5 }
 0x56d   : > { %2924 = vmatprep.mubr.f32.mxu1 %v8677_v5  ;;  %5627 = vmatpush1.bf16.msra.mxu1 %v7319_v21 }
 0x56e   : > { %5619 = vmatprep.subr.bf16.mxu1 %v8679_v0 }
 0x570   : > { %2925 = vmatmul.mubr.f32.gmra.mrb[48].mxu1 %v8677_v5 }
 0x571   : > { %5628 = vmatpush1.bf16.msra.mxu1 %v7323_v13 }
 0x572   : > { %5620 = vmatprep.subr.bf16.mxu1 %v8679_v0 }
 0x575   : > { %5629 = vmatpush1.bf16.msra.mxu1 %v7327_v19 }
 0x576   : > { %5621 = vmatprep.subr.bf16.mxu1 %v8679_v0 }
 0x579   : > { %5630 = vmatpush1.bf16.msra.mxu1 %v7331_v57 }
 0x57a   : > { %5622 = vmatprep.subr.bf16.mxu1 %v8679_v0 }
 0x57d   : > { %5631 = vmatpush1.bf16.msra.mxu1 %v7335_v26 }
 0x57e   : > { %5623 = vmatprep.subr.bf16.mxu1 %v8679_v0 }
 0x581   : > { %5632 = vmatpush1.bf16.msra.mxu1 %v7339_v30 }
 0x582   : > { %5624 = vmatprep.subr.bf16.mxu1 %v8679_v0 }
 0x585   : > { %5633 = vmatpush1.bf16.msra.mxu1 %v7343_v33 }
 0x586   : > { %5625 = vmatprep.subr.bf16.mxu1 %v8679_v0 }
 0x589   : > { %5634 = vmatpush1.bf16.msra.mxu1 %v7347_v39 }
 0x58a   : > { %5626 = vmatprep.subr.bf16.mxu1 %v8679_v0 }
 0x58d   : > { %5635 = vmatpush1.bf16.msra.mxu1 %v7351_v44 }
 0x5fd   : > { %v1895_v47 = vpop.f32.mrb[14].mxu0 }
 0x5fe   : > { %v2001_v49 = vadd.f32 %v7355_v45, %v1895_v47  ;;  %v1897_v50 = vpop.f32.mrb[15].mxu0 }
 0x5ff   : > { %v2002_v55 = vadd.f32 %v7360_v46, %v1897_v50  ;;  %v2302_v56 = vpop.f32.mrb[14].mxu1 }
 0x600   : > { %v2304_v34 = vpop.f32.mrb[15].mxu1  ;;  %v7367_v4 = vmax.f32 %v2001_v49, 0.0  ;;  %v2397_v14 = vadd.f32 %v2302_v56, %v7355_v45 }
 0x601   : > { %v7364_v58 = vmax.f32 %v2002_v55, 0.0  ;;  %v2398_v6 = vadd.f32 %v2304_v34, %v7360_v46  ;;  %v1901_v59 = vpop.f32.mrb[16].mxu0 }
 0x602   : > { %8747 = vst [vmem:[#allocation38_spill] sm:$0xff] %v7367_v4  ;;  %v2003_v8 = vadd.f32 %v7355_v45, %v1901_v59  ;;  %v1903_v61 = vpop.f32.mrb[17].mxu0  ;;  %v7402_v12 = vmax.f32 %v2397_v14, 0.0 }
 0x603   : > { %8746 = vst [vmem:[#allocation37_spill] sm:$0xff] %v7364_v58  ;;  %v2004_v62 = vadd.f32 %v7360_v46, %v1903_v61  ;;  %v2308_v20 = vpop.f32.mrb[16].mxu1  ;;  %4667 = vmatprep.mubr.msk.f32.mxu0 %vm2531_vm5, %v7364_v58  ;;  %4699 = vmatprep.mubr.msk.f32.mxu1 %vm2531_vm5, %v7364_v58  ;;  %v7384_v48 = vmax.f32 %v2398_v6, 0.0 }
 0x604   : > { %v2310_v10 = vpop.f32.mrb[17].mxu1  ;;  %2693 = vmatmul.mubr.f32.vlgmr.msra.gmra.mrb[46].mxu0 %v7367_v4  ;;  %2930 = vmatmul.mubr.f32.gmra.mrb[50].mxu1 %v7367_v4  ;;  %v7381_v51 = vmax.f32 %v2003_v8, 0.0  ;;  %v2399_v16 = vadd.f32 %v2308_v20, %v7355_v45  ;;  %v5577_v8 = vpack.c.bf16 %v3147_v54, %v3146_v52  ;;  %v3153_v52 = vld [vmem:[#allocation18 + $0x228] sm:$0xff] }
 0x605   : > { %v7377_v41 = vmax.f32 %v2004_v62, 0.0  ;;  %v2400_v11 = vadd.f32 %v2310_v10, %v7360_v46  ;;  %5566 = vmatpush1.bf16.msra.mxu0 %v5565_v60  ;;  %v1907_v15 = vpop.f32.mrb[18].mxu0 }
 0x606   : > { %8749 = vst [vmem:[#allocation40_spill] sm:$0xff] %v7381_v51  ;;  %v1909_v29 = vpop.f32.mrb[19].mxu0  ;;  %5567 = vmatprep.subr.bf16.mxu0 %v8679_v0  ;;  %v7422_v38 = vmax.f32 %v2399_v16, 0.0  ;;  %v2005_v40 = vadd.f32 %v7355_v45, %v1907_v15  ;;  %v3151_v16 = vld [vmem:[#allocation18 + $0x218] sm:$0xff] }
 0x607   : > { %8748 = vst [vmem:[#allocation39_spill] sm:$0xff] %v7377_v41  ;;  %v2006_v18 = vadd.f32 %v7360_v46, %v1909_v29  ;;  %v7387_v53 = vpop.f32.mrb[18].mxu1  ;;  %4668 = vmatprep.mubr.msk.f32.mxu0 %vm2531_vm5, %v7377_v41  ;;  %4700 = vmatprep.mubr.msk.f32.mxu1 %vm2531_vm5, %v7377_v41  ;;  %v7405_v23 = vmax.f32 %v2400_v11, 0.0 }
 0x608   : > { %v2316_v3 = vpop.f32.mrb[19].mxu1  ;;  %2698 = vmatmul.mubr.f32.gmra.mrb[48].mxu0 %v7381_v51  ;;  %2935 = vmatmul.mubr.f32.gmra.mrb[52].mxu1 %v7381_v51  ;;  %v7444_v6 = vmax.f32 %v2005_v40, 0.0  ;;  %v2401_v14 = vadd.f32 %v7387_v53, %v7355_v45 }
 0x609   : > { %v7396_v7 = vadd.f32 %v2316_v3, %v7360_v46  ;;  %v1913_v36 = vpop.f32.mrb[20].mxu0  ;;  %4669 = vmatprep.mubr.msk.f32.mxu0 %vm2531_vm5, %v7384_v48  ;;  %4701 = vmatprep.mubr.msk.f32.mxu1 %vm2531_vm5, %v7384_v48  ;;  %v7425_v47 = vmax.f32 %v2006_v18, 0.0  ;;  %v5580_v18 = vpack.c.bf16 %v3149_v9, %v3148_v2 }
 0x60a   : > { %v1915_v17 = vpop.f32.mrb[21].mxu0  ;;  %5569 = vmatpush1.bf16.msra.mxu0 %v5568_v35  ;;  %v2007_v59 = vadd.f32 %v7355_v45, %v1913_v36  ;;  %v3150_v36 = vld [vmem:[#allocation18 + $0x210] sm:$0xff] }
 0x60b   : > { %v2008_v24 = vadd.f32 %v7360_v46, %v1915_v17  ;;  %v7408_v25 = vpop.f32.mrb[20].mxu1  ;;  %5570 = vmatprep.subr.bf16.mxu0 %v8679_v0  ;;  %v7471_v63 = vmax.f32 %v7396_v7, 0.0  ;;  %v7490_v7 = vmax.f32 %v2401_v14, 0.0  ;;  %v5583_v28 = vpack.c.bf16 %v3151_v16, %v3150_v36 }
 0x60c   : > { %v2322_v31 = vpop.f32.mrb[21].mxu1  ;;  %2703 = vmatmul.mubr.f32.gmra.mrb[50].mxu0 %v7402_v12  ;;  %2940 = vmatmul.mubr.f32.gmra.mrb[54].mxu1 %v7402_v12  ;;  %v7468_v29 = vmax.f32 %v2007_v59, 0.0 }
 0x60d   : > { %v7414_v32 = vadd.f32 %v2322_v31, %v7360_v46  ;;  %v7416_v37 = vpop.f32.mrb[22].mxu0  ;;  %4670 = vmatprep.mubr.msk.f32.mxu0 %vm2531_vm5, %v7405_v23  ;;  %4702 = vmatprep.mubr.msk.f32.mxu1 %vm2531_vm5, %v7405_v23  ;;  %v7447_v61 = vmax.f32 %v2008_v24, 0.0  ;;  %v2403_v24 = vadd.f32 %v7408_v25, %v7355_v45 }
 0x60e   : > { %v1921_v42 = vpop.f32.mrb[23].mxu0  ;;  %5572 = vmatpush1.bf16.msra.mxu0 %v5571_v22  ;;  %v2009_v59 = vadd.f32 %v7355_v45, %v7416_v37 }
 0x60f   : > { %v7428_v49 = vadd.f32 %v7360_v46, %v1921_v42  ;;  %v7430_v50 = vpop.f32.mrb[22].mxu1  ;;  %5573 = vmatprep.subr.bf16.mxu0 %v8679_v0  ;;  %v7495_v31 = vmax.f32 %v7414_v32, 0.0  ;;  %v7512_v32 = vmax.f32 %v2403_v24, 0.0 }
 0x610   : > { %v2328_v55 = vpop.f32.mrb[23].mxu1  ;;  %2708 = vmatmul.mubr.f32.gmra.mrb[52].mxu0 %v7422_v38  ;;  %2945 = vmatmul.mubr.f32.gmra.mrb[56].mxu1 %v7422_v38 }
 0x611   : > { %v7436_v56 = vadd.f32 %v2328_v55, %v7360_v46  ;;  %v7438_v34 = vpop.f32.mrb[24].mxu0  ;;  %4671 = vmatprep.mubr.msk.f32.mxu0 %vm2531_vm5, %v7425_v47  ;;  %4703 = vmatprep.mubr.msk.f32.mxu1 %vm2531_vm5, %v7425_v47  ;;  %v7520_v9 = vmax.f32 %v7428_v49, 0.0 }
 0x612   : > { %v1927_v60 = vpop.f32.mrb[25].mxu0  ;;  %5575 = vmatpush1.bf16.msra.mxu0 %v5574_v43  ;;  %v3152_v43 = vld [vmem:[#allocation18 + $0x220] sm:$0xff]  ;;  %v2011_v24 = vadd.f32 %v7355_v45, %v7438_v34 }
 0x613   : > { %v7450_v62 = vadd.f32 %v7360_v46, %v1927_v60  ;;  %v7452_v20 = vpop.f32.mrb[24].mxu1  ;;  %5576 = vmatprep.subr.bf16.mxu0 %v8679_v0  ;;  %v5586_v2 = vpack.c.bf16 %v3153_v52, %v3152_v43 }
 0x614   : > { %v2334_v10 = vpop.f32.mrb[25].mxu1  ;;  %2713 = vmatmul.mubr.f32.gmra.mrb[54].mxu0 %v7444_v6  ;;  %2950 = vmatmul.mubr.f32.gmra.mrb[58].mxu1 %v7444_v6 }
 0x615   : > { %v7458_v11 = vadd.f32 %v2334_v10, %v7360_v46  ;;  %v7460_v15 = vpop.f32.mrb[26].mxu0  ;;  %4672 = vmatprep.mubr.msk.f32.mxu0 %vm2531_vm5, %v7447_v61  ;;  %4704 = vmatprep.mubr.msk.f32.mxu1 %vm2531_vm5, %v7447_v61  ;;  %v7546_v52 = vmax.f32 %v7450_v62, 0.0  ;;  %v2405_v62 = vadd.f32 %v7430_v50, %v7355_v45 }
 0x616   : > { %v1933_v35 = vpop.f32.mrb[27].mxu0  ;;  %5578 = vmatpush1.bf16.msra.mxu0 %v5577_v8 }
 0x617   : > { %v7474_v1 = vadd.f32 %v7360_v46, %v1933_v35  ;;  %v7476_v3 = vpop.f32.mrb[26].mxu1  ;;  %5579 = vmatprep.subr.bf16.mxu0 %v8679_v0  ;;  %v3154_v35 = vld [vmem:[#allocation18 + $0x230] sm:$0xff] }
 0x618   : > { %v2340_v17 = vpop.f32.mrb[27].mxu1  ;;  %2718 = vmatmul.mubr.f32.gmra.mrb[56].mxu0 %v7468_v29  ;;  %2955 = vmatmul.mubr.f32.gmra.mrb[60].mxu1 %v7468_v29 }
 0x619   : > { %v7482_v53 = vadd.f32 %v2340_v17, %v7360_v46  ;;  %v7484_v22 = vpop.f32.mrb[28].mxu0  ;;  %4673 = vmatprep.mubr.msk.f32.mxu0 %vm2531_vm5, %v7471_v63  ;;  %4705 = vmatprep.mubr.msk.f32.mxu1 %vm2531_vm5, %v7471_v63  ;;  %v7538_v17 = vmax.f32 %v2009_v59, 0.0  ;;  %v7623_v41 = vmax.f32 %v7474_v1, 0.0 }
 0x61a   : > { %v1939_v27 = vpop.f32.mrb[29].mxu0  ;;  %5581 = vmatpush1.bf16.msra.mxu0 %v5580_v18  ;;  %v3155_v18 = vld [vmem:[#allocation18 + $0x238] sm:$0xff] }
 0x61b   : > { %v7498_v40 = vadd.f32 %v7360_v46, %v1939_v27  ;;  %v7500_v42 = vpop.f32.mrb[28].mxu1  ;;  %5582 = vmatprep.subr.bf16.mxu0 %v8679_v0  ;;  %v5589_v43 = vpack.c.bf16 %v3155_v18, %v3154_v35  ;;  %8753 = vst [vmem:[#allocation44_spill] sm:$0xff] %v7623_v41 }
 0x61c   : > { %v2346_v54 = vpop.f32.mrb[29].mxu1  ;;  %2723 = vmatmul.mubr.f32.gmra.mrb[58].mxu0 %v7490_v7  ;;  %2960 = vmatmul.mubr.f32.gmra.mrb[62].mxu1 %v7490_v7 }
 0x61d   : > { %v7506_v25 = vadd.f32 %v2346_v54, %v7360_v46  ;;  %v1943_v55 = vpop.f32.mrb[30].mxu0  ;;  %4674 = vmatprep.mubr.msk.f32.mxu0 %vm2531_vm5, %v7495_v31  ;;  %4706 = vmatprep.mubr.msk.f32.mxu1 %vm2531_vm5, %v7495_v31  ;;  %v7648_v39 = vmax.f32 %v7498_v40, 0.0  ;;  %v2409_v40 = vadd.f32 %v7476_v3, %v7355_v45 }
 0x61e   : > { %v7517_v60 = vadd.f32 %v7355_v45, %v1943_v55  ;;  %v1945_v8 = vpop.f32.mrb[31].mxu0  ;;  %5584 = vmatpush1.bf16.msra.mxu0 %v5583_v28 }
 0x61f   : > { %v7523_v10 = vadd.f32 %v7360_v46, %v1945_v8  ;;  %v2350_v14 = vpop.f32.mrb[30].mxu1  ;;  %5585 = vmatprep.subr.bf16.mxu0 %v8679_v0  ;;  %8755 = vst [vmem:[#allocation46_spill] sm:$0xff] %v7648_v39 }
 0x620   : > { %v7527_v36 = vadd.f32 %v2350_v14, %v7355_v45  ;;  %v2352_v37 = vpop.f32.mrb[31].mxu1  ;;  %2728 = vmatmul.mubr.f32.gmra.mrb[60].mxu0 %v7512_v32  ;;  %2965 = vmatmul.mubr.f32.gmra.mrb[64].mxu1 %v7512_v32  ;;  %v7566_v14 = vmax.f32 %v2011_v24, 0.0 }
 0x621   : > { %v7532_v16 = vadd.f32 %v2352_v37, %v7360_v46  ;;  %v1949_v49 = vpop.f32.mrb[32].mxu0  ;;  %4675 = vmatprep.mubr.msk.f32.mxu0 %vm2531_vm5, %v7520_v9  ;;  %4707 = vmatprep.mubr.msk.f32.mxu1 %vm2531_vm5, %v7520_v9  ;;  %v7572_v37 = vmax.f32 %v7436_v56, 0.0  ;;  %v7590_v56 = vmax.f32 %v2405_v62, 0.0 }
 0x622   : > { %v7543_v27 = vadd.f32 %v7355_v45, %v1949_v49  ;;  %v1951_v28 = vpop.f32.mrb[33].mxu0  ;;  %5587 = vmatpush1.bf16.msra.mxu0 %v5586_v2 }
 0x623   : > { %v7549_v54 = vadd.f32 %v7360_v46, %v1951_v28  ;;  %v2356_v55 = vpop.f32.mrb[32].mxu1  ;;  %5588 = vmatprep.subr.bf16.mxu0 %v8679_v0  ;;  %8750 = vst [vmem:[#allocation41_spill] sm:$0xff] %v7590_v56 }
 0x624   : > { %v7553_v59 = vadd.f32 %v2356_v55, %v7355_v45  ;;  %v2358_v8 = vpop.f32.mrb[33].mxu1  ;;  %2733 = vmatmul.mubr.f32.gmra.mrb[62].mxu0 %v7538_v17  ;;  %2970 = vmatmul.mubr.f32.gmra.mrb[66].mxu1 %v7538_v17 }
 0x625   : > { %v7558_v34 = vadd.f32 %v2358_v8, %v7360_v46  ;;  %v1955_v2 = vpop.f32.mrb[34].mxu0  ;;  %4676 = vmatprep.mubr.msk.f32.mxu0 %vm2531_vm5, %v7546_v52  ;;  %4708 = vmatprep.mubr.msk.f32.mxu1 %vm2531_vm5, %v7546_v52  ;;  %v2407_v8 = vadd.f32 %v7452_v20, %v7355_v45 }
 0x626   : > { %v7569_v35 = vadd.f32 %v7355_v45, %v1955_v2  ;;  %v1957_v18 = vpop.f32.mrb[35].mxu0  ;;  %5590 = vmatpush1.bf16.msra.mxu0 %v5589_v43 }
 0x627   : > { %v7575_v49 = vadd.f32 %v7360_v46, %v1957_v18  ;;  %v2362_v28 = vpop.f32.mrb[34].mxu1  ;;  %5591 = vmatprep.subr.bf16.mxu0 %v8679_v0 }
 0x628   : > { %v7579_v55 = vadd.f32 %v2362_v28, %v7355_v45  ;;  %v2364_v50 = vpop.f32.mrb[35].mxu1  ;;  %2738 = vmatmul.mubr.f32.gmra.mrb[64].mxu0 %v7566_v14  ;;  %2975 = vmatmul.mubr.f32.gmra.mrb[68].mxu1 %v7566_v14  ;;  %v7598_v28 = vmax.f32 %v7458_v11, 0.0  ;;  %v7615_v11 = vmax.f32 %v2407_v8, 0.0 }
 0x629   : > { %v7584_v24 = vadd.f32 %v2364_v50, %v7360_v46  ;;  %v1961_v43 = vpop.f32.mrb[36].mxu0  ;;  %4677 = vmatprep.mubr.msk.f32.mxu0 %vm2531_vm5, %v7572_v37  ;;  %4709 = vmatprep.mubr.msk.f32.mxu1 %vm2531_vm5, %v7572_v37 }
 0x62a   : > { %v7595_v2 = vadd.f32 %v7355_v45, %v1961_v43  ;;  %v1963_v18 = vpop.f32.mrb[37].mxu0  ;;  %8751 = vst [vmem:[#allocation42_spill] sm:$0xff] %v7598_v28  ;;  %8752 = vst [vmem:[#allocation43_spill] sm:$0xff] %v7615_v11 }
 0x62b   : > { %v7601_v50 = vadd.f32 %v7360_v46, %v1963_v18  ;;  %v2368_v5 = vpop.f32.mrb[36].mxu1 }
 0x62c   : > { %v7604_v0 = vadd.f32 %v2368_v5, %v7355_v45  ;;  %v2370_v51 = vpop.f32.mrb[37].mxu1  ;;  %2743 = vmatmul.mubr.f32.gmra.mrb[66].mxu0 %v7590_v56  ;;  %2980 = vmatmul.mubr.f32.gmra.mrb[70].mxu1 %v7590_v56  ;;  %v2013_v5 = vadd.f32 %v7355_v45, %v7460_v15 }
 0x62d   : > { %v7609_v20 = vadd.f32 %v2370_v51, %v7360_v46  ;;  %v1967_v62 = vpop.f32.mrb[38].mxu0  ;;  %4678 = vmatprep.mubr.msk.f32.mxu0 %vm2531_vm5, %v7598_v28  ;;  %4710 = vmatprep.mubr.msk.f32.mxu1 %vm2531_vm5, %v7598_v28 }
 0x62e   : > { %v7620_v43 = vadd.f32 %v7355_v45, %v1967_v62  ;;  %v1969_v18 = vpop.f32.mrb[39].mxu0  ;;  %v7640_v1 = vmax.f32 %v2013_v5, 0.0 }
 0x62f   : > { %v7626_v51 = vadd.f32 %v7360_v46, %v1969_v18  ;;  %v2374_v4 = vpop.f32.mrb[38].mxu1 }
 0x630   : > { %v7629_v58 = vadd.f32 %v2374_v4, %v7355_v45  ;;  %v2376_v44 = vpop.f32.mrb[39].mxu1  ;;  %2748 = vmatmul.mubr.f32.gmra.mrb[68].mxu0 %v7615_v11  ;;  %2985 = vmatmul.mubr.f32.gmra.mrb[72].mxu1 %v7615_v11  ;;  %8754 = vst [vmem:[#allocation45_spill] sm:$0xff] %v7640_v1  ;;  %v2015_v4 = vadd.f32 %v7355_v45, %v7484_v22 }
 0x631   : > { %v7634_v15 = vadd.f32 %v2376_v44, %v7360_v46  ;;  %v1973_v8 = vpop.f32.mrb[40].mxu0  ;;  %4679 = vmatprep.mubr.msk.f32.mxu0 %vm2531_vm5, %v7623_v41  ;;  %4711 = vmatprep.mubr.msk.f32.mxu1 %vm2531_vm5, %v7623_v41 }
 0x632   : > { %v7645_v62 = vadd.f32 %v7355_v45, %v1973_v8  ;;  %v1975_v18 = vpop.f32.mrb[41].mxu0 }
 0x633   : > { %v7651_v44 = vadd.f32 %v7360_v46, %v1975_v18  ;;  %v2380_v33 = vpop.f32.mrb[40].mxu1 }
 0x634   : > { %v7654_v11 = vadd.f32 %v2380_v33, %v7355_v45  ;;  %v2382_v41 = vpop.f32.mrb[41].mxu1  ;;  %2753 = vmatmul.mubr.f32.gmra.mrb[70].mxu0 %v7640_v1  ;;  %2990 = vmatmul.mubr.f32.gmra.mrb[74].mxu1 %v7640_v1  ;;  %v7667_v33 = vmax.f32 %v2015_v4, 0.0  ;;  %v7673_v1 = vmax.f32 %v7482_v53, 0.0  ;;  %v7690_v53 = vmax.f32 %v2409_v40, 0.0 }
 0x635   : > { %v7659_v22 = vadd.f32 %v2382_v41, %v7360_v46  ;;  %v1979_v5 = vpop.f32.mrb[42].mxu0  ;;  %4680 = vmatprep.mubr.msk.f32.mxu0 %vm2531_vm5, %v7648_v39  ;;  %4712 = vmatprep.mubr.msk.f32.mxu1 %vm2531_vm5, %v7648_v39  ;;  %v7718_v40 = vmax.f32 %v7523_v10, 0.0  ;;  %v7739_v10 = vmax.f32 %v7543_v27, 0.0  ;;  %v7766_v27 = vmax.f32 %v7575_v49, 0.0 }
 0x636   : > { %8756 = vst [vmem:[#allocation47_spill] sm:$0xff] %v7667_v33  ;;  %v7670_v8 = vadd.f32 %v7355_v45, %v1979_v5  ;;  %v1981_v18 = vpop.f32.mrb[43].mxu0  ;;  %8757 = vst [vmem:[#allocation48_spill] sm:$0xff] %v7673_v1 }
 0x637   : > { %v7676_v41 = vadd.f32 %v7360_v46, %v1981_v18  ;;  %v2386_v30 = vpop.f32.mrb[42].mxu1 }
 0x638   : > { %v7679_v28 = vadd.f32 %v2386_v30, %v7355_v45  ;;  %v2388_v39 = vpop.f32.mrb[43].mxu1  ;;  %2758 = vmatmul.mubr.f32.gmra.mrb[72].mxu0 %v7667_v33  ;;  %2995 = vmatmul.mubr.f32.gmra.mrb[76].mxu1 %v7667_v33  ;;  %v2411_v30 = vadd.f32 %v7500_v42, %v7355_v45  ;;  %v7698_v33 = vmax.f32 %v7506_v25, 0.0 }
 0x639   : > { %v7684_v3 = vadd.f32 %v2388_v39, %v7360_v46  ;;  %v1985_v4 = vpop.f32.mrb[44].mxu0  ;;  %4681 = vmatprep.mubr.msk.f32.mxu0 %vm2531_vm5, %v7673_v1  ;;  %4713 = vmatprep.mubr.msk.f32.mxu1 %vm2531_vm5, %v7673_v1 }
 0x63a   : > { %v7695_v5 = vadd.f32 %v7355_v45, %v1985_v4  ;;  %v1987_v18 = vpop.f32.mrb[45].mxu0  ;;  %v7715_v25 = vmax.f32 %v2411_v30, 0.0  ;;  %v7794_v30 = vmax.f32 %v7584_v24, 0.0  ;;  %v7815_v24 = vmax.f32 %v7604_v0, 0.0 }
 0x63b   : > { %v7701_v39 = vadd.f32 %v7360_v46, %v1987_v18  ;;  %v2392_v56 = vpop.f32.mrb[44].mxu1  ;;  %v7806_v18 = vmax.f32 %v7609_v20, 0.0  ;;  %v7830_v20 = vmax.f32 %v7651_v44, 0.0  ;;  %v7839_v0 = vmax.f32 %v7645_v62, 0.0 }
 0x63c   : > { %v7704_v26 = vadd.f32 %v2392_v56, %v7355_v45  ;;  %v2394_v1 = vpop.f32.mrb[45].mxu1  ;;  %2763 = vmatmul.mubr.f32.gmra.mrb[74].mxu0 %v7690_v53  ;;  %3000 = vmatmul.mubr.f32.gmra.mrb[78].mxu1 %v7690_v53  ;;  %v7727_v45 = vmax.f32 %v7517_v60, 0.0  ;;  %v7742_v56 = vmax.f32 %v7532_v16, 0.0  ;;  %v7751_v60 = vmax.f32 %v7527_v36, 0.0 }
 0x63d   : > { %v7709_v42 = vadd.f32 %v2394_v1, %v7360_v46  ;;  %4682 = vmatprep.mubr.msk.f32.mxu0 %vm2531_vm5, %v7698_v33  ;;  %4714 = vmatprep.mubr.msk.f32.mxu1 %vm2531_vm5, %v7698_v33  ;;  %v7730_v46 = vmax.f32 %v7549_v54, 0.0  ;;  %v7754_v54 = vmax.f32 %v7558_v34, 0.0  ;;  %v7763_v16 = vmax.f32 %v7553_v59, 0.0 }
 0x63e   : > { %v7777_v34 = vmax.f32 %v7569_v35, 0.0  ;;  %v7780_v1 = vmax.f32 %v7601_v50, 0.0  ;;  %v7791_v35 = vmax.f32 %v7595_v2, 0.0  ;;  %v7803_v50 = vmax.f32 %v7579_v55, 0.0 }
 0x63f   : > { %v7774_v36 = vpop.f32.mrb[46].mxu1  ;;  %v7818_v2 = vmax.f32 %v7626_v51, 0.0  ;;  %v7827_v55 = vmax.f32 %v7620_v43, 0.0  ;;  %v7842_v51 = vmax.f32 %v7634_v15, 0.0  ;;  %v7851_v43 = vmax.f32 %v7629_v58, 0.0 }
 0x640   : > { %2768 = vmatmul.mubr.f32.gmra.mrb[76].mxu0 %v7715_v25  ;;  %3005 = vmatmul.mubr.f32.gmra.mrb[80].mxu1 %v7715_v25  ;;  %v2923_v59 = vpop.f32.mrb[47].mxu1  ;;  %v7854_v44 = vmax.f32 %v7659_v22, 0.0  ;;  %v7863_v15 = vmax.f32 %v7654_v11, 0.0  ;;  %v7866_v62 = vmax.f32 %v7676_v41, 0.0  ;;  %v7875_v58 = vmax.f32 %v7670_v8, 0.0 }
 0x641   : > { %4683 = vmatprep.mubr.msk.f32.mxu0 %vm2531_vm5, %v7718_v40  ;;  %4715 = vmatprep.mubr.msk.f32.mxu1 %vm2531_vm5, %v7718_v40  ;;  %v7878_v22 = vmax.f32 %v7701_v39, 0.0  ;;  %v7887_v11 = vmax.f32 %v7695_v5, 0.0  ;;  %v7890_v41 = vmax.f32 %v7684_v3, 0.0  ;;  %v7899_v8 = vmax.f32 %v7679_v28, 0.0 }
 0x642   : > { %v7902_v39 = vmax.f32 %v7709_v42, 0.0  ;;  %v7911_v3 = vmax.f32 %v7704_v26, 0.0  ;;  %v8758_v26 = vmov 0.0|0.0  }
 0x643   : > { %v7784_v49 = vpop.f32.mrb[48].mxu1 }
 0x644   : > { %2773 = vmatmul.mubr.f32.gmra.mrb[78].mxu0 %v7727_v45  ;;  %3010 = vmatmul.mubr.f32.gmra.mrb[82].mxu1 %v7727_v45  ;;  %v2928_v4 = vpop.f32.mrb[49].mxu1 }
 0x645   : > { %4684 = vmatprep.mubr.msk.f32.mxu0 %vm2531_vm5, %v7730_v46  ;;  %4716 = vmatprep.mubr.msk.f32.mxu1 %vm2531_vm5, %v7730_v46 }
 0x648   : > { %2778 = vmatmul.mubr.f32.gmra.mrb[80].mxu0 %v7739_v10  ;;  %3015 = vmatmul.mubr.f32.gmra.mrb[84].mxu1 %v7739_v10 }
 0x649   : > { %4685 = vmatprep.mubr.msk.f32.mxu0 %vm2531_vm5, %v7742_v56  ;;  %4717 = vmatprep.mubr.msk.f32.mxu1 %vm2531_vm5, %v7742_v56 }
 0x64c   : > { %2783 = vmatmul.mubr.f32.gmra.mrb[82].mxu0 %v7751_v60  ;;  %3020 = vmatmul.mubr.f32.gmra.mrb[86].mxu1 %v7751_v60 }
 0x64d   : > { %4686 = vmatprep.mubr.msk.f32.mxu0 %vm2531_vm5, %v7754_v54  ;;  %4718 = vmatprep.mubr.msk.f32.mxu1 %vm2531_vm5, %v7754_v54 }
 0x650   : > { %2788 = vmatmul.mubr.f32.gmra.mrb[84].mxu0 %v7763_v16  ;;  %3025 = vmatmul.mubr.f32.gmra.mrb[88].mxu1 %v7763_v16 }
 0x651   : > { %4687 = vmatprep.mubr.msk.f32.mxu0 %vm2531_vm5, %v7766_v27  ;;  %4719 = vmatprep.mubr.msk.f32.mxu1 %vm2531_vm5, %v7766_v27 }
 0x654   : > { %2793 = vmatmul.mubr.f32.gmra.mrb[86].mxu0 %v7777_v34  ;;  %3030 = vmatmul.mubr.f32.gmra.mrb[90].mxu1 %v7777_v34 }
 0x655   : > { %4688 = vmatprep.mubr.msk.f32.mxu0 %vm2531_vm5, %v7780_v1  ;;  %4720 = vmatprep.mubr.msk.f32.mxu1 %vm2531_vm5, %v7780_v1 }
 0x658   : > { %2798 = vmatmul.mubr.f32.gmra.mrb[88].mxu0 %v7791_v35  ;;  %3035 = vmatmul.mubr.f32.gmra.mrb[92].mxu1 %v7791_v35 }
 0x659   : > { %4689 = vmatprep.mubr.msk.f32.mxu0 %vm2531_vm5, %v7794_v30  ;;  %4721 = vmatprep.mubr.msk.f32.mxu1 %vm2531_vm5, %v7794_v30 }
 0x65c   : > { %2803 = vmatmul.mubr.f32.gmra.mrb[90].mxu0 %v7803_v50  ;;  %3040 = vmatmul.mubr.f32.gmra.mrb[94].mxu1 %v7803_v50 }
 0x65d   : > { %4690 = vmatprep.mubr.msk.f32.mxu0 %vm2531_vm5, %v7806_v18  ;;  %4722 = vmatprep.mubr.msk.f32.mxu1 %vm2531_vm5, %v7806_v18 }
 0x660   : > { %2808 = vmatmul.mubr.f32.gmra.mrb[92].mxu0 %v7815_v24  ;;  %3045 = vmatmul.mubr.f32.gmra.mrb[96].mxu1 %v7815_v24 }
 0x661   : > { %4691 = vmatprep.mubr.msk.f32.mxu0 %vm2531_vm5, %v7818_v2  ;;  %4723 = vmatprep.mubr.msk.f32.mxu1 %vm2531_vm5, %v7818_v2 }
 0x664   : > { %2813 = vmatmul.mubr.f32.gmra.mrb[94].mxu0 %v7827_v55  ;;  %3050 = vmatmul.mubr.f32.gmra.mrb[98].mxu1 %v7827_v55 }
 0x665   : > { %4692 = vmatprep.mubr.msk.f32.mxu0 %vm2531_vm5, %v7830_v20  ;;  %4724 = vmatprep.mubr.msk.f32.mxu1 %vm2531_vm5, %v7830_v20 }
 0x668   : > { %2818 = vmatmul.mubr.f32.gmra.mrb[96].mxu0 %v7839_v0  ;;  %3055 = vmatmul.mubr.f32.gmra.mrb[100].mxu1 %v7839_v0 }
 0x669   : > { %4693 = vmatprep.mubr.msk.f32.mxu0 %vm2531_vm5, %v7842_v51  ;;  %4725 = vmatprep.mubr.msk.f32.mxu1 %vm2531_vm5, %v7842_v51 }
 0x66c   : > { %2823 = vmatmul.mubr.f32.gmra.mrb[98].mxu0 %v7851_v43  ;;  %3060 = vmatmul.mubr.f32.gmra.mrb[102].mxu1 %v7851_v43 }
 0x66d   : > { %4694 = vmatprep.mubr.msk.f32.mxu0 %vm2531_vm5, %v7854_v44  ;;  %4726 = vmatprep.mubr.msk.f32.mxu1 %vm2531_vm5, %v7854_v44 }
 0x670   : > { %2828 = vmatmul.mubr.f32.gmra.mrb[100].mxu0 %v7863_v15  ;;  %3065 = vmatmul.mubr.f32.gmra.mrb[104].mxu1 %v7863_v15 }
 0x671   : > { %4695 = vmatprep.mubr.msk.f32.mxu0 %vm2531_vm5, %v7866_v62  ;;  %4727 = vmatprep.mubr.msk.f32.mxu1 %vm2531_vm5, %v7866_v62 }
 0x674   : > { %2833 = vmatmul.mubr.f32.gmra.mrb[102].mxu0 %v7875_v58  ;;  %3070 = vmatmul.mubr.f32.gmra.mrb[106].mxu1 %v7875_v58 }
 0x675   : > { %4696 = vmatprep.mubr.msk.f32.mxu0 %vm2531_vm5, %v7878_v22  ;;  %4728 = vmatprep.mubr.msk.f32.mxu1 %vm2531_vm5, %v7878_v22 }
 0x678   : > { %2838 = vmatmul.mubr.f32.gmra.mrb[104].mxu0 %v7887_v11  ;;  %3075 = vmatmul.mubr.f32.gmra.mrb[108].mxu1 %v7887_v11 }
 0x679   : > { %4697 = vmatprep.mubr.msk.f32.mxu0 %vm2531_vm5, %v7890_v41  ;;  %4763 = vmatprep.mubr.msk.f32.mxu1 %vm2531_vm5, %v7405_v23 }
 0x67c   : > { %2843 = vmatmul.mubr.f32.gmra.mrb[106].mxu0 %v7899_v8  ;;  %3461 = vmatmul.mubr.f32.vlgmr.msra.gmra.mrb[110].mxu1 %v7422_v38 }
 0x67d   : > { %4698 = vmatprep.mubr.msk.f32.mxu0 %vm2531_vm5, %v7902_v39  ;;  %4764 = vmatprep.mubr.msk.f32.mxu1 %vm2531_vm5, %v7425_v47 }
 0x680   : > { %2848 = vmatmul.mubr.f32.gmra.mrb[108].mxu0 %v7911_v3  ;;  %3466 = vmatmul.mubr.f32.gmra.mrb[112].mxu1 %v7444_v6 }
 0x681   : > { %4730 = vmatprep.mubr.msk.f32.mxu0 %vm2531_vm5, %v7384_v48  ;;  %4765 = vmatprep.mubr.msk.f32.mxu1 %vm2531_vm5, %v7447_v61 }
 0x684   : > { %3221 = vmatmul.mubr.f32.vlgmr.msra.gmra.mrb[110].mxu0 %v7402_v12  ;;  %3471 = vmatmul.mubr.f32.gmra.mrb[114].mxu1 %v7468_v29 }
 0x685   : > { %5593 = vmatpush1.bf16.msra.mxu0 %v7319_v21  ;;  %4731 = vmatprep.mubr.msk.f32.mxu0 %vm2531_vm5, %v7405_v23  ;;  %v8759_v21 = vld [vmem:[#allocation32_spill] sm:$0xff]  ;;  %v8763_v23 = vld [vmem:[#allocation43_spill] sm:$0xff] }
 0x686   : > { %4766 = vmatprep.mubr.msk.f32.mxu1 %vm2531_vm5, %v7471_v63  ;;  %5594 = vmatprep.subr.bf16.mxu0 %v8758_v26 }
 0x688   : > { %3226 = vmatmul.mubr.f32.gmra.mrb[112].mxu0 %v7422_v38  ;;  %3476 = vmatmul.mubr.f32.gmra.mrb[116].mxu1 %v7490_v7  ;;  %v8764_v38 = vld [vmem:[#allocation44_spill] sm:$0xff] }
 0x689   : > { %4732 = vmatprep.mubr.msk.f32.mxu0 %vm2531_vm5, %v7425_v47  ;;  %4767 = vmatprep.mubr.msk.f32.mxu1 %vm2531_vm5, %v7495_v31  ;;  %v8765_v47 = vld [vmem:[#allocation34_spill] sm:$0xff] }
 0x68a   : > { %5596 = vmatpush1.bf16.msra.mxu0 %v7323_v13  ;;  %v8760_v13 = vld [vmem:[#allocation41_spill] sm:$0xff] }
 0x68b   : > { %5597 = vmatprep.subr.bf16.mxu0 %v8758_v26 }
 0x68c   : > { %3231 = vmatmul.mubr.f32.gmra.mrb[114].mxu0 %v7444_v6  ;;  %3481 = vmatmul.mubr.f32.gmra.mrb[118].mxu1 %v7512_v32  ;;  %v8766_v6 = vld [vmem:[#allocation45_spill] sm:$0xff] }
 0x68d   : > { %4733 = vmatprep.mubr.msk.f32.mxu0 %vm2531_vm5, %v7447_v61  ;;  %4768 = vmatprep.mubr.msk.f32.mxu1 %vm2531_vm5, %v7520_v9  ;;  %v8767_v61 = vld [vmem:[#allocation46_spill] sm:$0xff] }
 0x68e   : > { %5599 = vmatpush1.bf16.msra.mxu0 %v7327_v19  ;;  %v8761_v19 = vld [vmem:[#allocation42_spill] sm:$0xff] }
 0x68f   : > { %5600 = vmatprep.subr.bf16.mxu0 %v8758_v26 }
 0x690   : > { %3236 = vmatmul.mubr.f32.gmra.mrb[116].mxu0 %v7468_v29  ;;  %3486 = vmatmul.mubr.f32.gmra.mrb[120].mxu1 %v7538_v17  ;;  %v8768_v29 = vld [vmem:[#allocation35_spill] sm:$0xff] }
 0x691   : > { %4734 = vmatprep.mubr.msk.f32.mxu0 %vm2531_vm5, %v7471_v63  ;;  %4769 = vmatprep.mubr.msk.f32.mxu1 %vm2531_vm5, %v7546_v52  ;;  %v8769_v63 = vld [vmem:[#allocation47_spill] sm:$0xff] }
 0x692   : > { %5602 = vmatpush1.bf16.msra.mxu0 %v7331_v57  ;;  %v8762_v57 = vld [vmem:[#allocation33_spill] sm:$0xff] }
 0x693   : > { %5603 = vmatprep.subr.bf16.mxu0 %v8758_v26 }
 0x694   : > { %3241 = vmatmul.mubr.f32.gmra.mrb[118].mxu0 %v7490_v7  ;;  %3491 = vmatmul.mubr.f32.gmra.mrb[122].mxu1 %v7566_v14  ;;  %v8770_v7 = vld [vmem:[#allocation48_spill] sm:$0xff] }
 0x695   : > { %4735 = vmatprep.mubr.msk.f32.mxu0 %vm2531_vm5, %v7495_v31  ;;  %4770 = vmatprep.mubr.msk.f32.mxu1 %vm2531_vm5, %v7572_v37  ;;  %v8771_v31 = vld [vmem:[#allocation36_spill] sm:$0xff] }
 0x696   : > { %5605 = vmatpush1.bf16.msra.mxu0 %v8759_v21 }
 0x697   : > { %5606 = vmatprep.subr.bf16.mxu0 %v8758_v26 }
 0x698   : > { %3246 = vmatmul.mubr.f32.gmra.mrb[120].mxu0 %v7512_v32  ;;  %3496 = vmatmul.mubr.f32.gmra.mrb[124].mxu1 %v8760_v13 }
 0x699   : > { %4736 = vmatprep.mubr.msk.f32.mxu0 %vm2531_vm5, %v7520_v9  ;;  %4771 = vmatprep.mubr.msk.f32.mxu1 %vm2531_vm5, %v8761_v19 }
 0x69a   : > { %5608 = vmatpush1.bf16.msra.mxu0 %v8762_v57 }
 0x69b   : > { %5609 = vmatprep.subr.bf16.mxu0 %v8758_v26 }
 0x69c   : > { %3251 = vmatmul.mubr.f32.gmra.mrb[122].mxu0 %v7538_v17  ;;  %3501 = vmatmul.mubr.f32.gmra.mrb[126].mxu1 %v8763_v23 }
 0x69d   : > { %4737 = vmatprep.mubr.msk.f32.mxu0 %vm2531_vm5, %v7546_v52  ;;  %4772 = vmatprep.mubr.msk.f32.mxu1 %vm2531_vm5, %v8764_v38 }
 0x69e   : > { %5611 = vmatpush1.bf16.msra.mxu0 %v8765_v47 }
 0x69f   : > { %5612 = vmatprep.subr.bf16.mxu0 %v8758_v26 }
 0x6a0   : > { %3256 = vmatmul.mubr.f32.gmra.mrb[124].mxu0 %v7566_v14  ;;  %3506 = vmatmul.mubr.f32.gmra.mrb[128].mxu1 %v8766_v6 }
 0x6a1   : > { %4738 = vmatprep.mubr.msk.f32.mxu0 %vm2531_vm5, %v7572_v37  ;;  %4773 = vmatprep.mubr.msk.f32.mxu1 %vm2531_vm5, %v8767_v61 }
 0x6a2   : > { %5614 = vmatpush1.bf16.msra.mxu0 %v8768_v29 }
 0x6a3   : > { %5615 = vmatprep.subr.bf16.mxu0 %v8758_v26 }
 0x6a4   : > { %3261 = vmatmul.mubr.f32.gmra.mrb[126].mxu0 %v8760_v13  ;;  %3511 = vmatmul.mubr.f32.gmra.mrb[130].mxu1 %v8769_v63 }
 0x6a5   : > { %4739 = vmatprep.mubr.msk.f32.mxu0 %vm2531_vm5, %v8761_v19  ;;  %4774 = vmatprep.mubr.msk.f32.mxu1 %vm2531_vm5, %v8770_v7 }
 0x6a6   : > { %5617 = vmatpush1.bf16.msra.mxu0 %v8771_v31 }
 0x6a8   : > { %3266 = vmatmul.mubr.f32.gmra.mrb[128].mxu0 %v8763_v23  ;;  %3516 = vmatmul.mubr.f32.gmra.mrb[132].mxu1 %v7690_v53 }
 0x6a9   : > { %4740 = vmatprep.mubr.msk.f32.mxu0 %vm2531_vm5, %v8764_v38  ;;  %4775 = vmatprep.mubr.msk.f32.mxu1 %vm2531_vm5, %v7698_v33 }
 0x6ac   : > { %3271 = vmatmul.mubr.f32.gmra.mrb[130].mxu0 %v8766_v6  ;;  %3521 = vmatmul.mubr.f32.gmra.mrb[134].mxu1 %v7715_v25 }
 0x6ad   : > { %4741 = vmatprep.mubr.msk.f32.mxu0 %vm2531_vm5, %v8767_v61  ;;  %4776 = vmatprep.mubr.msk.f32.mxu1 %vm2531_vm5, %v7718_v40 }
 0x6b0   : > { %3276 = vmatmul.mubr.f32.gmra.mrb[132].mxu0 %v8769_v63  ;;  %3526 = vmatmul.mubr.f32.gmra.mrb[136].mxu1 %v7727_v45 }
 0x6b1   : > { %4742 = vmatprep.mubr.msk.f32.mxu0 %vm2531_vm5, %v8770_v7  ;;  %4777 = vmatprep.mubr.msk.f32.mxu1 %vm2531_vm5, %v7730_v46 }
 0x6b4   : > { %3281 = vmatmul.mubr.f32.gmra.mrb[134].mxu0 %v7690_v53  ;;  %3531 = vmatmul.mubr.f32.gmra.mrb[138].mxu1 %v7739_v10 }
 0x6b5   : > { %4743 = vmatprep.mubr.msk.f32.mxu0 %vm2531_vm5, %v7698_v33  ;;  %4778 = vmatprep.mubr.msk.f32.mxu1 %vm2531_vm5, %v7742_v56 }
 0x6b8   : > { %3286 = vmatmul.mubr.f32.gmra.mrb[136].mxu0 %v7715_v25  ;;  %3536 = vmatmul.mubr.f32.gmra.mrb[140].mxu1 %v7751_v60 }
 0x6b9   : > { %4744 = vmatprep.mubr.msk.f32.mxu0 %vm2531_vm5, %v7718_v40  ;;  %4779 = vmatprep.mubr.msk.f32.mxu1 %vm2531_vm5, %v7754_v54 }
 0x6bc   : > { %3291 = vmatmul.mubr.f32.gmra.mrb[138].mxu0 %v7727_v45  ;;  %3541 = vmatmul.mubr.f32.gmra.mrb[142].mxu1 %v7763_v16 }
 0x6bd   : > { %4745 = vmatprep.mubr.msk.f32.mxu0 %vm2531_vm5, %v7730_v46  ;;  %4780 = vmatprep.mubr.msk.f32.mxu1 %vm2531_vm5, %v7766_v27 }
 0x6c0   : > { %3296 = vmatmul.mubr.f32.gmra.mrb[140].mxu0 %v7739_v10  ;;  %3546 = vmatmul.mubr.f32.gmra.mrb[144].mxu1 %v7777_v34 }
 0x6c1   : > { %4746 = vmatprep.mubr.msk.f32.mxu0 %vm2531_vm5, %v7742_v56  ;;  %4781 = vmatprep.mubr.msk.f32.mxu1 %vm2531_vm5, %v7780_v1 }
 0x6c4   : > { %3301 = vmatmul.mubr.f32.gmra.mrb[142].mxu0 %v7751_v60  ;;  %3551 = vmatmul.mubr.f32.gmra.mrb[146].mxu1 %v7791_v35 }
 0x6c5   : > { %4747 = vmatprep.mubr.msk.f32.mxu0 %vm2531_vm5, %v7754_v54  ;;  %4782 = vmatprep.mubr.msk.f32.mxu1 %vm2531_vm5, %v7794_v30 }
 0x6c8   : > { %3306 = vmatmul.mubr.f32.gmra.mrb[144].mxu0 %v7763_v16  ;;  %3556 = vmatmul.mubr.f32.gmra.mrb[148].mxu1 %v7803_v50 }
 0x6c9   : > { %4748 = vmatprep.mubr.msk.f32.mxu0 %vm2531_vm5, %v7766_v27  ;;  %4783 = vmatprep.mubr.msk.f32.mxu1 %vm2531_vm5, %v7806_v18 }
 0x6cc   : > { %3311 = vmatmul.mubr.f32.gmra.mrb[146].mxu0 %v7777_v34  ;;  %3561 = vmatmul.mubr.f32.gmra.mrb[150].mxu1 %v7815_v24 }
 0x6cd   : > { %4749 = vmatprep.mubr.msk.f32.mxu0 %vm2531_vm5, %v7780_v1  ;;  %4784 = vmatprep.mubr.msk.f32.mxu1 %vm2531_vm5, %v7818_v2 }
 0x6d0   : > { %3316 = vmatmul.mubr.f32.gmra.mrb[148].mxu0 %v7791_v35  ;;  %3566 = vmatmul.mubr.f32.gmra.mrb[152].mxu1 %v7827_v55 }
 0x6d1   : > { %4750 = vmatprep.mubr.msk.f32.mxu0 %vm2531_vm5, %v7794_v30  ;;  %4785 = vmatprep.mubr.msk.f32.mxu1 %vm2531_vm5, %v7830_v20 }
 0x6d4   : > { %3321 = vmatmul.mubr.f32.gmra.mrb[150].mxu0 %v7803_v50  ;;  %3571 = vmatmul.mubr.f32.gmra.mrb[154].mxu1 %v7839_v0 }
 0x6d5   : > { %4751 = vmatprep.mubr.msk.f32.mxu0 %vm2531_vm5, %v7806_v18  ;;  %4786 = vmatprep.mubr.msk.f32.mxu1 %vm2531_vm5, %v7842_v51 }
 0x6d7   : > { %v2694_v32 = vpop.f32.mrb[46].mxu0  ;;  %v2931_v9 = vpop.f32.mrb[50].mxu1 }
 0x6d8   : > { %v8063_v17 = vadd.f32 %v7774_v36, %v2694_v32  ;;  %v2696_v52 = vpop.f32.mrb[47].mxu0  ;;  %v2933_v14 = vpop.f32.mrb[51].mxu1  ;;  %3326 = vmatmul.mubr.f32.gmra.mrb[152].mxu0 %v7815_v24  ;;  %3576 = vmatmul.mubr.f32.gmra.mrb[156].mxu1 %v7851_v43  ;;  %v8774_v32 = vld [vmem:[#allocation38_spill] sm:$0xff] }
 0x6d9   : > { %4752 = vmatprep.mubr.msk.f32.mxu0 %vm2531_vm5, %v7818_v2  ;;  %4787 = vmatprep.mubr.msk.f32.mxu1 %vm2531_vm5, %v7854_v44 }
 0x6db   : > { %v2699_v37 = vpop.f32.mrb[48].mxu0  ;;  %v2936_v28 = vpop.f32.mrb[52].mxu1 }
 0x6dc   : > { %v8072_v33 = vadd.f32 %v7784_v49, %v2699_v37  ;;  %v2701_v53 = vpop.f32.mrb[49].mxu0  ;;  %v2938_v5 = vpop.f32.mrb[53].mxu1  ;;  %3331 = vmatmul.mubr.f32.gmra.mrb[154].mxu0 %v7827_v55  ;;  %3581 = vmatmul.mubr.f32.gmra.mrb[158].mxu1 %v7863_v15 }
 0x6dd   : > { %4753 = vmatprep.mubr.msk.f32.mxu0 %vm2531_vm5, %v7830_v20  ;;  %4788 = vmatprep.mubr.msk.f32.mxu1 %vm2531_vm5, %v7866_v62  ;;  %v8776_v5 = vld [vmem:[#allocation40_spill] sm:$0xff] }
 0x6df   : > { %v2704_v42 = vpop.f32.mrb[50].mxu0  ;;  %v2941_v25 = vpop.f32.mrb[54].mxu1 }
 0x6e0   : > { %v8080_v40 = vadd.f32 %v2931_v9, %v2704_v42  ;;  %v2706_v45 = vpop.f32.mrb[51].mxu0  ;;  %v2943_v46 = vpop.f32.mrb[55].mxu1  ;;  %3336 = vmatmul.mubr.f32.gmra.mrb[156].mxu0 %v7839_v0  ;;  %3586 = vmatmul.mubr.f32.gmra.mrb[160].mxu1 %v7875_v58  ;;  %v8775_v9 = vld [vmem:[#allocation39_spill] sm:$0xff] }
 0x6e1   : > { %4754 = vmatprep.mubr.msk.f32.mxu0 %vm2531_vm5, %v7842_v51  ;;  %4789 = vmatprep.mubr.msk.f32.mxu1 %vm2531_vm5, %v7878_v22 }
 0x6e3   : > { %v2709_v10 = vpop.f32.mrb[52].mxu0  ;;  %v2946_v56 = vpop.f32.mrb[56].mxu1 }
 0x6e4   : > { %v8088_v60 = vadd.f32 %v2936_v28, %v2709_v10  ;;  %v2711_v54 = vpop.f32.mrb[53].mxu0  ;;  %v2948_v16 = vpop.f32.mrb[57].mxu1  ;;  %3341 = vmatmul.mubr.f32.gmra.mrb[158].mxu0 %v7851_v43  ;;  %3591 = vmatmul.mubr.f32.gmra.mrb[162].mxu1 %v7887_v11 }
 0x6e5   : > { %4755 = vmatprep.mubr.msk.f32.mxu0 %vm2531_vm5, %v7854_v44  ;;  %4790 = vmatprep.mubr.msk.f32.mxu1 %vm2531_vm5, %v7890_v41 }
 0x6e7   : > { %v2714_v27 = vpop.f32.mrb[54].mxu0  ;;  %v2951_v36 = vpop.f32.mrb[58].mxu1 }
 0x6e8   : > { %v8096_v34 = vadd.f32 %v2941_v25, %v2714_v27  ;;  %v2716_v59 = vpop.f32.mrb[55].mxu0  ;;  %v2953_v1 = vpop.f32.mrb[59].mxu1  ;;  %3346 = vmatmul.mubr.f32.gmra.mrb[160].mxu0 %v7863_v15  ;;  %3596 = vmatmul.mubr.f32.gmra.mrb[164].mxu1 %v7899_v8 }
 0x6e9   : > { %4756 = vmatprep.mubr.msk.f32.mxu0 %vm2531_vm5, %v7866_v62  ;;  %4791 = vmatprep.mubr.msk.f32.mxu1 %vm2531_vm5, %v7902_v39 }
 0x6eb   : > { %v2719_v49 = vpop.f32.mrb[56].mxu0  ;;  %v2956_v4 = vpop.f32.mrb[60].mxu1 }
 0x6ec   : > { %v8104_v35 = vadd.f32 %v2946_v56, %v2719_v49  ;;  %v2721_v30 = vpop.f32.mrb[57].mxu0  ;;  %v2958_v50 = vpop.f32.mrb[61].mxu1  ;;  %3351 = vmatmul.mubr.f32.gmra.mrb[162].mxu0 %v7875_v58  ;;  %3601 = vmatmul.mubr.f32.gmra.mrb[166].mxu1 %v7911_v3 }
 0x6ed   : > { %4757 = vmatprep.mubr.msk.f32.mxu0 %vm2531_vm5, %v7878_v22 }
 0x6ef   : > { %v2724_v18 = vpop.f32.mrb[58].mxu0  ;;  %v2961_v24 = vpop.f32.mrb[62].mxu1 }
 0x6f0   : > { %v8110_v2 = vadd.f32 %v2951_v36, %v2724_v18  ;;  %v2726_v55 = vpop.f32.mrb[59].mxu0  ;;  %v2963_v20 = vpop.f32.mrb[63].mxu1  ;;  %3356 = vmatmul.mubr.f32.gmra.mrb[164].mxu0 %v7887_v11 }
 0x6f1   : > { %4758 = vmatprep.mubr.msk.f32.mxu0 %vm2531_vm5, %v7890_v41  ;;  %v8772_v41 = vmov 0.0  }
 0x6f3   : > { %v2729_v0 = vpop.f32.mrb[60].mxu0  ;;  %v2966_v51 = vpop.f32.mrb[64].mxu1 }
 0x6f4   : > { %v8115_v43 = vadd.f32 %v2956_v4, %v2729_v0  ;;  %v2731_v44 = vpop.f32.mrb[61].mxu0  ;;  %v2968_v15 = vpop.f32.mrb[65].mxu1  ;;  %3361 = vmatmul.mubr.f32.gmra.mrb[166].mxu0 %v7899_v8 }
 0x6f5   : > { %4759 = vmatprep.mubr.msk.f32.mxu0 %vm2531_vm5, %v7902_v39 }
 0x6f7   : > { %v2734_v62 = vpop.f32.mrb[62].mxu0  ;;  %v2971_v58 = vpop.f32.mrb[66].mxu1 }
 0x6f8   : > { %v8120_v22 = vadd.f32 %v2961_v24, %v2734_v62  ;;  %v2736_v26 = vpop.f32.mrb[63].mxu0  ;;  %v2973_v11 = vpop.f32.mrb[67].mxu1  ;;  %3366 = vmatmul.mubr.f32.gmra.mrb[168].mxu0 %v7911_v3  ;;  %v8773_v3 = vld [vmem:[#allocation37_spill] sm:$0xff] }
 0x6f9   : > { %3370 = vmatprep.mubr.f32.mxu0 %v8772_v41 }
 0x6fb   : > { %v2739_v21 = vpop.f32.mrb[64].mxu0  ;;  %v2976_v13 = vpop.f32.mrb[68].mxu1 }
 0x6fc   : > { %v8124_v19 = vadd.f32 %v2966_v51, %v2739_v21  ;;  %v2741_v57 = vpop.f32.mrb[65].mxu0  ;;  %v2978_v23 = vpop.f32.mrb[69].mxu1  ;;  %3371 = vmatmul.mubr.f32.gmra.mrb[170].mxu0 %v8772_v41 }
 0x6fd   : > { %3375 = vmatprep.mubr.f32.mxu0 %v8772_v41 }
 0x6ff   : > { %v2744_v8 = vpop.f32.mrb[66].mxu0  ;;  %v2981_v39 = vpop.f32.mrb[70].mxu1 }
 0x700   : > { %v8128_v38 = vadd.f32 %v2971_v58, %v2744_v8  ;;  %v2746_v47 = vpop.f32.mrb[67].mxu0  ;;  %v2983_v6 = vpop.f32.mrb[71].mxu1  ;;  %3376 = vmatmul.mubr.f32.gmra.mrb[172].mxu0 %v8772_v41 }
 0x701   : > { %4760 = vmatprep.mubr.msk.f32.mxu0 %vm2531_vm5, %v8773_v3 }
 0x703   : > { %v2749_v61 = vpop.f32.mrb[68].mxu0  ;;  %v2986_v29 = vpop.f32.mrb[72].mxu1 }
 0x704   : > { %v8133_v63 = vadd.f32 %v2976_v13, %v2749_v61  ;;  %v2751_v7 = vpop.f32.mrb[69].mxu0  ;;  %v2988_v31 = vpop.f32.mrb[73].mxu1  ;;  %3446 = vmatmul.mubr.f32.vlgmr.msra.gmra.mrb[174].mxu0 %v8774_v32 }
 0x705   : > { %4761 = vmatprep.mubr.msk.f32.mxu0 %vm2531_vm5, %v8775_v9 }
 0x707   : > { %v2754_v52 = vpop.f32.mrb[70].mxu0  ;;  %v2991_v14 = vpop.f32.mrb[74].mxu1 }
 0x708   : > { %v8138_v37 = vadd.f32 %v2981_v39, %v2754_v52  ;;  %v2756_v28 = vpop.f32.mrb[71].mxu0  ;;  %v2993_v53 = vpop.f32.mrb[75].mxu1  ;;  %3451 = vmatmul.mubr.f32.gmra.mrb[176].mxu0 %v8776_v5 }
 0x709   : > { %4762 = vmatprep.mubr.msk.f32.mxu0 %vm2531_vm5, %v7384_v48 }
 0x70b   : > { %v2759_v42 = vpop.f32.mrb[72].mxu0  ;;  %v2996_v25 = vpop.f32.mrb[76].mxu1 }
 0x70c   : > { %v8143_v45 = vadd.f32 %v2986_v29, %v2759_v42  ;;  %v2761_v46 = vpop.f32.mrb[73].mxu0  ;;  %v2998_v10 = vpop.f32.mrb[77].mxu1  ;;  %3456 = vmatmul.mubr.f32.gmra.mrb[178].mxu0 %v7402_v12 }
 0x70f   : > { %v2764_v56 = vpop.f32.mrb[74].mxu0  ;;  %v3001_v54 = vpop.f32.mrb[78].mxu1 }
 0x710   : > { %v8146_v16 = vadd.f32 %v2991_v14, %v2764_v56  ;;  %v2766_v27 = vpop.f32.mrb[75].mxu0  ;;  %v3003_v36 = vpop.f32.mrb[79].mxu1 }
 0x713   : > { %v2769_v59 = vpop.f32.mrb[76].mxu0  ;;  %v3006_v1 = vpop.f32.mrb[80].mxu1 }
 0x714   : > { %v8148_v49 = vadd.f32 %v2996_v25, %v2769_v59  ;;  %v2771_v4 = vpop.f32.mrb[77].mxu0  ;;  %v3008_v48 = vpop.f32.mrb[81].mxu1 }
 0x717   : > { %v2774_v30 = vpop.f32.mrb[78].mxu0  ;;  %v3011_v50 = vpop.f32.mrb[82].mxu1 }
 0x718   : > { %v8150_v18 = vadd.f32 %v3001_v54, %v2774_v30  ;;  %v2776_v24 = vpop.f32.mrb[79].mxu0  ;;  %v3013_v55 = vpop.f32.mrb[83].mxu1 }
 0x71b   : > { %v2779_v20 = vpop.f32.mrb[80].mxu0  ;;  %v3016_v12 = vpop.f32.mrb[84].mxu1 }
 0x71c   : > { %v8152_v0 = vadd.f32 %v3006_v1, %v2779_v20  ;;  %v2781_v51 = vpop.f32.mrb[81].mxu0  ;;  %v3018_v44 = vpop.f32.mrb[85].mxu1 }
 0x71f   : > { %v2784_v15 = vpop.f32.mrb[82].mxu0  ;;  %v3021_v62 = vpop.f32.mrb[86].mxu1 }
 0x720   : > { %v8154_v58 = vadd.f32 %v3011_v50, %v2784_v15  ;;  %v2786_v26 = vpop.f32.mrb[83].mxu0  ;;  %v3023_v11 = vpop.f32.mrb[87].mxu1 }
 0x723   : > { %v2789_v41 = vpop.f32.mrb[84].mxu0  ;;  %v3026_v21 = vpop.f32.mrb[88].mxu1 }
 0x724   : > { %v8156_v13 = vadd.f32 %v3016_v12, %v2789_v41  ;;  %v2791_v57 = vpop.f32.mrb[85].mxu0  ;;  %v3028_v23 = vpop.f32.mrb[89].mxu1 }
 0x727   : > { %v2794_v8 = vpop.f32.mrb[86].mxu0  ;;  %v3031_v39 = vpop.f32.mrb[90].mxu1 }
 0x728   : > { %v8158_v47 = vadd.f32 %v3021_v62, %v2794_v8  ;;  %v2796_v6 = vpop.f32.mrb[87].mxu0  ;;  %v3033_v3 = vpop.f32.mrb[91].mxu1 }
 0x72b   : > { %v2799_v61 = vpop.f32.mrb[88].mxu0  ;;  %v3036_v29 = vpop.f32.mrb[92].mxu1 }
 0x72c   : > { %v8160_v7 = vadd.f32 %v3026_v21, %v2799_v61  ;;  %v2801_v31 = vpop.f32.mrb[89].mxu0  ;;  %v3038_v32 = vpop.f32.mrb[93].mxu1 }
 0x72f   : > { %v2804_v9 = vpop.f32.mrb[90].mxu0  ;;  %v3041_v52 = vpop.f32.mrb[94].mxu1 }
 0x730   : > { %v8162_v14 = vadd.f32 %v3031_v39, %v2804_v9  ;;  %v2806_v28 = vpop.f32.mrb[91].mxu0  ;;  %v3043_v53 = vpop.f32.mrb[95].mxu1 }
 0x733   : > { %v2809_v5 = vpop.f32.mrb[92].mxu0  ;;  %v3046_v42 = vpop.f32.mrb[96].mxu1 }
 0x734   : > { %v8164_v25 = vadd.f32 %v3036_v29, %v2809_v5  ;;  %v2811_v46 = vpop.f32.mrb[93].mxu0  ;;  %v3048_v10 = vpop.f32.mrb[97].mxu1 }
 0x737   : > { %v2814_v56 = vpop.f32.mrb[94].mxu0  ;;  %v3051_v54 = vpop.f32.mrb[98].mxu1 }
 0x738   : > { %v8166_v27 = vadd.f32 %v3041_v52, %v2814_v56  ;;  %v2816_v36 = vpop.f32.mrb[95].mxu0  ;;  %v3053_v59 = vpop.f32.mrb[99].mxu1 }
 0x73b   : > { %v2819_v1 = vpop.f32.mrb[96].mxu0  ;;  %v3056_v4 = vpop.f32.mrb[100].mxu1 }
 0x73c   : > { %v8168_v48 = vadd.f32 %v3046_v42, %v2819_v1  ;;  %v2821_v30 = vpop.f32.mrb[97].mxu0  ;;  %v3058_v50 = vpop.f32.mrb[101].mxu1 }
 0x73f   : > { %v2824_v24 = vpop.f32.mrb[98].mxu0  ;;  %v3061_v55 = vpop.f32.mrb[102].mxu1 }
 0x740   : > { %v8170_v20 = vadd.f32 %v3051_v54, %v2824_v24  ;;  %v2826_v12 = vpop.f32.mrb[99].mxu0  ;;  %v3063_v51 = vpop.f32.mrb[103].mxu1 }
 0x743   : > { %v2829_v44 = vpop.f32.mrb[100].mxu0  ;;  %v3066_v15 = vpop.f32.mrb[104].mxu1 }
 0x744   : > { %v8172_v62 = vadd.f32 %v3056_v4, %v2829_v44  ;;  %v2831_v26 = vpop.f32.mrb[101].mxu0  ;;  %v3068_v11 = vpop.f32.mrb[105].mxu1 }
 0x747   : > { %v2834_v41 = vpop.f32.mrb[102].mxu0  ;;  %v3071_v21 = vpop.f32.mrb[106].mxu1 }
 0x748   : > { %v8174_v57 = vadd.f32 %v3061_v55, %v2834_v41  ;;  %v2836_v23 = vpop.f32.mrb[103].mxu0  ;;  %v3073_v8 = vpop.f32.mrb[107].mxu1 }
 0x74b   : > { %v2839_v39 = vpop.f32.mrb[104].mxu0  ;;  %v3076_v6 = vpop.f32.mrb[108].mxu1 }
 0x74c   : > { %v8176_v3 = vadd.f32 %v3066_v15, %v2839_v39  ;;  %v2841_v61 = vpop.f32.mrb[105].mxu0  ;;  %v3078_v29 = vpop.f32.mrb[109].mxu1 }
 0x74f   : > { %v2844_v31 = vpop.f32.mrb[106].mxu0  ;;  %v3462_v32 = vpop.f32.mrb[110].mxu1 }
 0x750   : > { %v8178_v9 = vadd.f32 %v3071_v21, %v2844_v31  ;;  %v2846_v52 = vpop.f32.mrb[107].mxu0  ;;  %v3464_v28 = vpop.f32.mrb[111].mxu1  ;;  %v8188_v21 = vld [vmem:[#allocation19] ss:$0 sm:$0xff] }
 0x753   : > { %v2849_v53 = vpop.f32.mrb[108].mxu0  ;;  %v3467_v5 = vpop.f32.mrb[112].mxu1 }
 0x754   : > { %v8180_v42 = vadd.f32 %v3076_v6, %v2849_v53  ;;  %v2851_v46 = vpop.f32.mrb[109].mxu0  ;;  %v3469_v10 = vpop.f32.mrb[113].mxu1 }
 0x757   : > { %v8182_v56 = vpop.f32.mrb[110].mxu0  ;;  %v3472_v54 = vpop.f32.mrb[114].mxu1 }
 0x758   : > { %v3224_v36 = vpop.f32.mrb[111].mxu0  ;;  %v3474_v59 = vpop.f32.mrb[115].mxu1 }
 0x75b   : > { %v8184_v1 = vpop.f32.mrb[112].mxu0  ;;  %v3477_v4 = vpop.f32.mrb[116].mxu1 }
 0x75c   : > { %v3229_v30 = vpop.f32.mrb[113].mxu0  ;;  %v3479_v50 = vpop.f32.mrb[117].mxu1 }
 0x75f   : > { %v8186_v24 = vpop.f32.mrb[114].mxu0  ;;  %v3482_v55 = vpop.f32.mrb[118].mxu1 }
 0x760   : > { %v3234_v12 = vpop.f32.mrb[115].mxu0  ;;  %v3484_v51 = vpop.f32.mrb[119].mxu1 }
 0x763   : > { %v3237_v44 = vpop.f32.mrb[116].mxu0  ;;  %v3487_v15 = vpop.f32.mrb[120].mxu1 }
 0x764   : > { %v3463_v26 = vadd.f32 %v3462_v32, %v3237_v44  ;;  %v3239_v11 = vpop.f32.mrb[117].mxu0  ;;  %v3489_v41 = vpop.f32.mrb[121].mxu1 }
 0x766   : > { %v3609_v23 = vadd.f32 %v8188_v21, %v3463_v26 }
 0x767   : > { %v3242_v8 = vpop.f32.mrb[118].mxu0  ;;  %v3492_v39 = vpop.f32.mrb[122].mxu1 }
 0x768   : > { %v4827_v6 = vmul.f32 -1.442695, %v3609_v23  ;;  %v3468_v61 = vadd.f32 %v3467_v5, %v3242_v8  ;;  %v3244_v29 = vpop.f32.mrb[119].mxu0  ;;  %v3494_v31 = vpop.f32.mrb[123].mxu1 }
 0x76a   : > { %5871 = vpow2.f32 %v4827_v6  ;;  %v3610_v52 = vadd.f32 %v8188_v21, %v3468_v61 }
 0x76b   : > { %v3247_v28 = vpop.f32.mrb[120].mxu0  ;;  %v3497_v53 = vpop.f32.mrb[124].mxu1 }
 0x76c   : > { %v4828_v46 = vmul.f32 -1.442695, %v3610_v52  ;;  %v3473_v10 = vadd.f32 %v3472_v54, %v3247_v28  ;;  %v3249_v32 = vpop.f32.mrb[121].mxu0  ;;  %v3499_v36 = vpop.f32.mrb[125].mxu1 }
 0x76e   : > { %5873 = vpow2.f32 %v4828_v46  ;;  %v3611_v59 = vadd.f32 %v8188_v21, %v3473_v10 }
 0x76f   : > { %v3252_v30 = vpop.f32.mrb[122].mxu0  ;;  %v3502_v50 = vpop.f32.mrb[126].mxu1 }
 0x770   : > { %v4829_v12 = vmul.f32 -1.442695, %v3611_v59  ;;  %v3478_v51 = vadd.f32 %v3477_v4, %v3252_v30  ;;  %v3254_v44 = vpop.f32.mrb[123].mxu0  ;;  %v3504_v5 = vpop.f32.mrb[127].mxu1 }
 0x772   : > { %5875 = vpow2.f32 %v4829_v12  ;;  %v3612_v26 = vadd.f32 %v8188_v21, %v3478_v51 }
 0x773   : > { %v3257_v11 = vpop.f32.mrb[124].mxu0  ;;  %v8194_v41 = vpop.f32.mrb[128].mxu1 }
 0x774   : > { %v5872_v23 = vpop.eup %5871  ;;  %v4830_v8 = vmul.f32 -1.442695, %v3612_v26  ;;  %v3483_v54 = vadd.f32 %v3482_v55, %v3257_v11  ;;  %v3259_v6 = vpop.f32.mrb[125].mxu0 }
 0x775   : > { %v3509_v61 = vpop.f32.mrb[129].mxu1  ;;  %v3929_v29 = vadd.f32 1.0, %v5872_v23 }
 0x776   : > { %5877 = vpow2.f32 %v4830_v8  ;;  %v3613_v31 = vadd.f32 %v8188_v21, %v3483_v54 }
 0x777   : > { %5879 = vrcp.f32 %v3929_v29  ;;  %v3262_v52 = vpop.f32.mrb[126].mxu0  ;;  %v8197_v4 = vpop.f32.mrb[130].mxu1 }
 0x778   : > { %v5874_v28 = vpop.eup %5873  ;;  %v4831_v46 = vmul.f32 -1.442695, %v3613_v31  ;;  %v3488_v10 = vadd.f32 %v3487_v15, %v3262_v52  ;;  %v3264_v32 = vpop.f32.mrb[127].mxu0 }
 0x779   : > { %v3514_v36 = vpop.f32.mrb[131].mxu1  ;;  %v3930_v59 = vadd.f32 1.0, %v5874_v28 }
 0x77a   : > { %5881 = vpow2.f32 %v4831_v46  ;;  %v3614_v30 = vadd.f32 %v8188_v21, %v3488_v10 }
 0x77b   : > { %5883 = vrcp.f32 %v3930_v59  ;;  %v3267_v55 = vpop.f32.mrb[128].mxu0  ;;  %v8200_v12 = vpop.f32.mrb[132].mxu1 }
 0x77c   : > { %v5876_v51 = vpop.eup %5875  ;;  %v4832_v44 = vmul.f32 -1.442695, %v3614_v30  ;;  %v3493_v5 = vadd.f32 %v3492_v39, %v3267_v55  ;;  %v3269_v26 = vpop.f32.mrb[129].mxu0 }
 0x77d   : > { %v3519_v11 = vpop.f32.mrb[133].mxu1  ;;  %v3931_v23 = vadd.f32 1.0, %v5876_v51 }
 0x77e   : > { %5885 = vpow2.f32 %v4832_v44  ;;  %v3615_v8 = vadd.f32 %v8188_v21, %v3493_v5 }
 0x77f   : > { %5887 = vrcp.f32 %v3931_v23  ;;  %v3272_v15 = vpop.f32.mrb[130].mxu0  ;;  %v8203_v54 = vpop.f32.mrb[134].mxu1 }
 0x780   : > { %v5878_v6 = vpop.eup %5877  ;;  %v4833_v61 = vmul.f32 -1.442695, %v3615_v8  ;;  %v3498_v29 = vadd.f32 %v3497_v53, %v3272_v15  ;;  %v3274_v31 = vpop.f32.mrb[131].mxu0 }
 0x781   : > { %v3524_v52 = vpop.f32.mrb[135].mxu1  ;;  %v5880_v28 = vpop.eup %5879  ;;  %v3932_v46 = vadd.f32 1.0, %v5878_v6 }
 0x782   : > { %5889 = vpow2.f32 %v4833_v61  ;;  %v3616_v39 = vadd.f32 %v8188_v21, %v3498_v29  ;;  %4060 = vrot.lane.b32.xlu1 %v5880_v28, %s6537_s30 }
 0x783   : > { %5891 = vrcp.f32 %v3932_v46  ;;  %v3277_v10 = vpop.f32.mrb[132].mxu0  ;;  %v8207_v32 = vpop.f32.mrb[136].mxu1 }
 0x784   : > { %v5882_v36 = vpop.eup %5881  ;;  %v4834_v59 = vmul.f32 -1.442695, %v3616_v39  ;;  %v3503_v30 = vadd.f32 %v3502_v50, %v3277_v10  ;;  %v3279_v55 = vpop.f32.mrb[133].mxu0 }
 0x785   : > { %v3529_v51 = vpop.f32.mrb[137].mxu1  ;;  %v5884_v53 = vpop.eup %5883  ;;  %v3933_v44 = vadd.f32 1.0, %v5882_v36 }
 0x786   : > { %5893 = vpow2.f32 %v4834_v59  ;;  %v3617_v5 = vadd.f32 %v8188_v21, %v3503_v30  ;;  %4062 = vrot.lane.b32.xlu0 %v5884_v53, %s6537_s30 }
 0x787   : > { %5895 = vrcp.f32 %v3933_v44  ;;  %v3282_v26 = vpop.f32.mrb[134].mxu0  ;;  %v8211_v11 = vpop.f32.mrb[138].mxu1 }
 0x788   : > { %v5886_v23 = vpop.eup %5885  ;;  %v4835_v8 = vmul.f32 -1.442695, %v3617_v5  ;;  %v3508_v15 = vadd.f32 %v8194_v41, %v3282_v26  ;;  %v3284_v6 = vpop.f32.mrb[135].mxu0 }
 0x789   : > { %v3534_v61 = vpop.f32.mrb[139].mxu1  ;;  %v5888_v50 = vpop.eup %5887  ;;  %v3934_v29 = vadd.f32 1.0, %v5886_v23 }
 0x78a   : > { %5897 = vpow2.f32 %v4835_v8  ;;  %v3618_v31 = vadd.f32 %v8188_v21, %v3508_v15  ;;  %4064 = vrot.lane.b32.xlu1 %v5888_v50, %s6537_s30 }
 0x78b   : > { %5899 = vrcp.f32 %v3934_v29  ;;  %v3287_v52 = vpop.f32.mrb[136].mxu0  ;;  %v8216_v28 = vpop.f32.mrb[140].mxu1 }
 0x78c   : > { %v5890_v46 = vpop.eup %5889  ;;  %v4836_v39 = vmul.f32 -1.442695, %v3618_v31  ;;  %v3513_v10 = vadd.f32 %v8197_v4, %v3287_v52  ;;  %v3289_v36 = vpop.f32.mrb[137].mxu0 }
 0x78d   : > { %v3539_v59 = vpop.f32.mrb[141].mxu1  ;;  %v5892_v41 = vpop.eup %5891  ;;  %v3935_v30 = vadd.f32 1.0, %v5890_v46 }
 0x78e   : > { %5901 = vpow2.f32 %v4836_v39  ;;  %v3619_v55 = vadd.f32 %v8188_v21, %v3513_v10  ;;  %4066 = vrot.lane.b32.xlu0 %v5892_v41, %s6537_s30 }
 0x78f   : > { %5903 = vrcp.f32 %v3935_v30  ;;  %v3292_v51 = vpop.f32.mrb[138].mxu0  ;;  %v8221_v53 = vpop.f32.mrb[142].mxu1 }
 0x790   : > { %v5894_v44 = vpop.eup %5893  ;;  %v4837_v5 = vmul.f32 -1.442695, %v3619_v55  ;;  %v3518_v26 = vadd.f32 %v8200_v12, %v3292_v51  ;;  %v3294_v23 = vpop.f32.mrb[139].mxu0 }
 0x791   : > { %v3544_v8 = vpop.f32.mrb[143].mxu1  ;;  %v5896_v4 = vpop.eup %5895  ;;  %v3936_v15 = vadd.f32 1.0, %v5894_v44 }
 0x792   : > { %5905 = vpow2.f32 %v4837_v5  ;;  %v3620_v6 = vadd.f32 %v8188_v21, %v3518_v26  ;;  %4068 = vrot.lane.b32.xlu1 %v5896_v4, %s6537_s30 }
 0x793   : > { %5907 = vrcp.f32 %v3936_v15  ;;  %v3297_v61 = vpop.f32.mrb[140].mxu0  ;;  %v8226_v50 = vpop.f32.mrb[144].mxu1 }
 0x794   : > { %v5898_v29 = vpop.eup %5897  ;;  %v4838_v31 = vmul.f32 -1.442695, %v3620_v6  ;;  %v3523_v52 = vadd.f32 %v8203_v54, %v3297_v61  ;;  %v3299_v46 = vpop.f32.mrb[141].mxu0 }
 0x795   : > { %v3549_v39 = vpop.f32.mrb[145].mxu1  ;;  %v5900_v12 = vpop.eup %5899  ;;  %v3937_v10 = vadd.f32 1.0, %v5898_v29 }
 0x796   : > { %5909 = vpow2.f32 %v4838_v31  ;;  %v3621_v36 = vadd.f32 %v8188_v21, %v3523_v52  ;;  %4070 = vrot.lane.b32.xlu0 %v5900_v12, %s6537_s30 }
 0x797   : > { %5911 = vrcp.f32 %v3937_v10  ;;  %v3302_v59 = vpop.f32.mrb[142].mxu0  ;;  %v8231_v41 = vpop.f32.mrb[146].mxu1 }
 0x798   : > { %v5902_v30 = vpop.eup %5901  ;;  %v4839_v55 = vmul.f32 -1.442695, %v3621_v36  ;;  %v3528_v51 = vadd.f32 %v8207_v32, %v3302_v59  ;;  %v3304_v44 = vpop.f32.mrb[143].mxu0 }
 0x799   : > { %v3554_v5 = vpop.f32.mrb[147].mxu1  ;;  %v5904_v54 = vpop.eup %5903  ;;  %v3938_v26 = vadd.f32 1.0, %v5902_v30 }
 0x79a   : > { %5913 = vpow2.f32 %v4839_v55  ;;  %v3622_v23 = vadd.f32 %v8188_v21, %v3528_v51  ;;  %4072 = vrot.lane.b32.xlu1 %v5904_v54, %s6537_s30 }
 0x79b   : > { %5915 = vrcp.f32 %v3938_v26  ;;  %v3307_v8 = vpop.f32.mrb[144].mxu0  ;;  %v8236_v4 = vpop.f32.mrb[148].mxu1 }
 0x79c   : > { %v5906_v15 = vpop.eup %5905  ;;  %v4840_v6 = vmul.f32 -1.442695, %v3622_v23  ;;  %v3533_v61 = vadd.f32 %v8211_v11, %v3307_v8  ;;  %v3309_v29 = vpop.f32.mrb[145].mxu0 }
 0x79d   : > { %v3559_v31 = vpop.f32.mrb[149].mxu1  ;;  %v5908_v32 = vpop.eup %5907  ;;  %v3939_v52 = vadd.f32 1.0, %v5906_v15 }
 0x79e   : > { %5917 = vpow2.f32 %v4840_v6  ;;  %v3623_v46 = vadd.f32 %v8188_v21, %v3533_v61  ;;  %4074 = vrot.lane.b32.xlu0 %v5908_v32, %s6537_s30 }
 0x79f   : > { %5919 = vrcp.f32 %v3939_v52  ;;  %v3312_v39 = vpop.f32.mrb[146].mxu0  ;;  %v8241_v12 = vpop.f32.mrb[150].mxu1 }
 0x7a0   : > { %v5910_v10 = vpop.eup %5909  ;;  %v4841_v36 = vmul.f32 -1.442695, %v3623_v46  ;;  %v3538_v59 = vadd.f32 %v8216_v28, %v3312_v39  ;;  %v3314_v30 = vpop.f32.mrb[147].mxu0 }
 0x7a1   : > { %v3564_v55 = vpop.f32.mrb[151].mxu1  ;;  %v5912_v11 = vpop.eup %5911  ;;  %v3940_v51 = vadd.f32 1.0, %v5910_v10 }
 0x7a2   : > { %5921 = vpow2.f32 %v4841_v36  ;;  %v3624_v44 = vadd.f32 %v8188_v21, %v3538_v59  ;;  %4076 = vrot.lane.b32.xlu1 %v5912_v11, %s6537_s30 }
 0x7a3   : > { %5923 = vrcp.f32 %v3940_v51  ;;  %v3317_v5 = vpop.f32.mrb[148].mxu0  ;;  %v8246_v54 = vpop.f32.mrb[152].mxu1 }
 0x7a4   : > { %v5914_v26 = vpop.eup %5913  ;;  %v4842_v23 = vmul.f32 -1.442695, %v3624_v44  ;;  %v3543_v8 = vadd.f32 %v8221_v53, %v3317_v5  ;;  %v3319_v15 = vpop.f32.mrb[149].mxu0 }
 0x7a5   : > { %v3569_v6 = vpop.f32.mrb[153].mxu1  ;;  %v5916_v28 = vpop.eup %5915  ;;  %v3941_v61 = vadd.f32 1.0, %v5914_v26 }
 0x7a6   : > { %5925 = vpow2.f32 %v4842_v23  ;;  %v3625_v29 = vadd.f32 %v8188_v21, %v3543_v8  ;;  %4078 = vrot.lane.b32.xlu0 %v5916_v28, %s6537_s30 }
 0x7a7   : > { %5927 = vrcp.f32 %v3941_v61  ;;  %v3322_v31 = vpop.f32.mrb[150].mxu0  ;;  %v8251_v32 = vpop.f32.mrb[154].mxu1 }
 0x7a8   : > { %v5918_v52 = vpop.eup %5917  ;;  %v4843_v46 = vmul.f32 -1.442695, %v3625_v29  ;;  %v3548_v39 = vadd.f32 %v8226_v50, %v3322_v31  ;;  %v3324_v10 = vpop.f32.mrb[151].mxu0 }
 0x7a9   : > { %v3574_v36 = vpop.f32.mrb[155].mxu1  ;;  %v5920_v53 = vpop.eup %5919  ;;  %v3942_v59 = vadd.f32 1.0, %v5918_v52 }
 0x7aa   : > { %5929 = vpow2.f32 %v4843_v46  ;;  %v3626_v30 = vadd.f32 %v8188_v21, %v3548_v39  ;;  %4080 = vrot.lane.b32.xlu1 %v5920_v53, %s6537_s30 }
 0x7ab   : > { %5931 = vrcp.f32 %v3942_v59  ;;  %v3327_v55 = vpop.f32.mrb[152].mxu0  ;;  %v8256_v11 = vpop.f32.mrb[156].mxu1 }
 0x7ac   : > { %v5922_v51 = vpop.eup %5921  ;;  %v4844_v44 = vmul.f32 -1.442695, %v3626_v30  ;;  %v3553_v5 = vadd.f32 %v8231_v41, %v3327_v55  ;;  %v3329_v26 = vpop.f32.mrb[153].mxu0 }
 0x7ad   : > { %v3579_v23 = vpop.f32.mrb[157].mxu1  ;;  %v5924_v50 = vpop.eup %5923  ;;  %v3943_v8 = vadd.f32 1.0, %v5922_v51 }
 0x7ae   : > { %5933 = vpow2.f32 %v4844_v44  ;;  %v3627_v15 = vadd.f32 %v8188_v21, %v3553_v5  ;;  %4082 = vrot.lane.b32.xlu0 %v5924_v50, %s6537_s30 }
 0x7af   : > { %5935 = vrcp.f32 %v3943_v8  ;;  %v3332_v6 = vpop.f32.mrb[154].mxu0  ;;  %v8261_v28 = vpop.f32.mrb[158].mxu1 }
 0x7b0   : > { %v5926_v61 = vpop.eup %5925  ;;  %v4845_v29 = vmul.f32 -1.442695, %v3627_v15  ;;  %v3558_v31 = vadd.f32 %v8236_v4, %v3332_v6  ;;  %v3334_v52 = vpop.f32.mrb[155].mxu0 }
 0x7b1   : > { %v3584_v46 = vpop.f32.mrb[159].mxu1  ;;  %v5928_v41 = vpop.eup %5927  ;;  %v3944_v39 = vadd.f32 1.0, %v5926_v61 }
 0x7b2   : > { %5937 = vpow2.f32 %v4845_v29  ;;  %v3628_v10 = vadd.f32 %v8188_v21, %v3558_v31  ;;  %4084 = vrot.lane.b32.xlu1 %v5928_v41, %s6537_s30 }
 0x7b3   : > { %5939 = vrcp.f32 %v3944_v39  ;;  %v3337_v36 = vpop.f32.mrb[156].mxu0  ;;  %v8266_v53 = vpop.f32.mrb[160].mxu1 }
 0x7b4   : > { %v5930_v59 = vpop.eup %5929  ;;  %v4846_v30 = vmul.f32 -1.442695, %v3628_v10  ;;  %v3563_v55 = vadd.f32 %v8241_v12, %v3337_v36  ;;  %v3339_v51 = vpop.f32.mrb[157].mxu0 }
 0x7b5   : > { %v3589_v44 = vpop.f32.mrb[161].mxu1  ;;  %v5932_v4 = vpop.eup %5931  ;;  %v3945_v5 = vadd.f32 1.0, %v5930_v59 }
 0x7b6   : > { %5941 = vpow2.f32 %v4846_v30  ;;  %v3629_v26 = vadd.f32 %v8188_v21, %v3563_v55  ;;  %4086 = vrot.lane.b32.xlu0 %v5932_v4, %s6537_s30 }
 0x7b7   : > { %5943 = vrcp.f32 %v3945_v5  ;;  %v3342_v23 = vpop.f32.mrb[158].mxu0  ;;  %v8271_v50 = vpop.f32.mrb[162].mxu1 }
 0x7b8   : > { %v5934_v8 = vpop.eup %5933  ;;  %v4847_v15 = vmul.f32 -1.442695, %v3629_v26  ;;  %v3568_v6 = vadd.f32 %v8246_v54, %v3342_v23  ;;  %v3344_v61 = vpop.f32.mrb[159].mxu0 }
 0x7b9   : > { %v3594_v29 = vpop.f32.mrb[163].mxu1  ;;  %v5936_v12 = vpop.eup %5935  ;;  %v3946_v31 = vadd.f32 1.0, %v5934_v8 }
 0x7ba   : > { %5945 = vpow2.f32 %v4847_v15  ;;  %v3630_v52 = vadd.f32 %v8188_v21, %v3568_v6  ;;  %4088 = vrot.lane.b32.xlu1 %v5936_v12, %s6537_s30 }
 0x7bb   : > { %5947 = vrcp.f32 %v3946_v31  ;;  %v3347_v46 = vpop.f32.mrb[160].mxu0  ;;  %v3597_v41 = vpop.f32.mrb[164].mxu1 }
 0x7bc   : > { %v5938_v39 = vpop.eup %5937  ;;  %v4848_v10 = vmul.f32 -1.442695, %v3630_v52  ;;  %v3573_v36 = vadd.f32 %v8251_v32, %v3347_v46  ;;  %v3349_v59 = vpop.f32.mrb[161].mxu0 }
 0x7bd   : > { %v3599_v30 = vpop.f32.mrb[165].mxu1  ;;  %v5940_v55 = vpop.eup %5939  ;;  %v3947_v54 = vadd.f32 1.0, %v5938_v39 }
 0x7be   : > { %5949 = vpow2.f32 %v4848_v10  ;;  %v3631_v51 = vadd.f32 %v8188_v21, %v3573_v36  ;;  %4090 = vrot.lane.b32.xlu0 %v5940_v55, %s6537_s30 }
 0x7bf   : > { %5951 = vrcp.f32 %v3947_v54  ;;  %v3352_v44 = vpop.f32.mrb[162].mxu0  ;;  %v3602_v4 = vpop.f32.mrb[166].mxu1 }
 0x7c0   : > { %v5942_v5 = vpop.eup %5941  ;;  %v4849_v26 = vmul.f32 -1.442695, %v3631_v51  ;;  %v3578_v23 = vadd.f32 %v8256_v11, %v3352_v44  ;;  %v3354_v8 = vpop.f32.mrb[163].mxu0 }
 0x7c1   : > { %v3604_v15 = vpop.f32.mrb[167].mxu1  ;;  %v5944_v6 = vpop.eup %5943  ;;  %v3948_v32 = vadd.f32 1.0, %v5942_v5 }
 0x7c2   : > { %5953 = vpow2.f32 %v4849_v26  ;;  %v3632_v61 = vadd.f32 %v8188_v21, %v3578_v23  ;;  %4092 = vrot.lane.b32.xlu1 %v5944_v6, %s6537_s30 }
 0x7c3   : > { %5955 = vrcp.f32 %v3948_v32  ;;  %v3357_v29 = vpop.f32.mrb[164].mxu0 }
 0x7c4   : > { %v5946_v12 = vpop.eup %5945  ;;  %v4850_v31 = vmul.f32 -1.442695, %v3632_v61  ;;  %v3583_v52 = vadd.f32 %v8261_v28, %v3357_v29  ;;  %v3359_v46 = vpop.f32.mrb[165].mxu0 }
 0x7c5   : > { %v5948_v39 = vpop.eup %5947  ;;  %v3949_v10 = vadd.f32 1.0, %v5946_v12 }
 0x7c6   : > { %5957 = vpow2.f32 %v4850_v31  ;;  %v3633_v11 = vadd.f32 %v8188_v21, %v3583_v52  ;;  %4094 = vrot.lane.b32.xlu0 %v5948_v39, %s6537_s30  ;;  %v3089_v39 = vadd.f32 %v8188_v21, %v8088_v60 }
 0x7c7   : > { %5959 = vrcp.f32 %v3949_v10  ;;  %v3362_v36 = vpop.f32.mrb[166].mxu0 }
 0x7c8   : > { %v5950_v59 = vpop.eup %5949  ;;  %v4851_v30 = vmul.f32 -1.442695, %v3633_v11  ;;  %v3588_v55 = vadd.f32 %v8266_v53, %v3362_v36  ;;  %v3364_v54 = vpop.f32.mrb[167].mxu0  ;;  %v3090_v36 = vadd.f32 %v8188_v21, %v8096_v34 }
 0x7c9   : > { %v5952_v51 = vpop.eup %5951  ;;  %v3950_v44 = vadd.f32 1.0, %v5950_v59  ;;  %v4795_v54 = vmul.f32 -1.442695, %v3089_v39 }
 0x7ca   : > { %5961 = vpow2.f32 %v4851_v30  ;;  %v3634_v28 = vadd.f32 %v8188_v21, %v3588_v55  ;;  %4096 = vrot.lane.b32.xlu1 %v5952_v51, %s6537_s30 }
 0x7cb   : > { %5963 = vrcp.f32 %v3950_v44  ;;  %v3367_v5 = vpop.f32.mrb[168].mxu0 }
 0x7cc   : > { %v5954_v26 = vpop.eup %5953  ;;  %v4852_v23 = vmul.f32 -1.442695, %v3634_v28  ;;  %v3593_v8 = vadd.f32 %v8271_v50, %v3367_v5  ;;  %v3369_v15 = vpop.f32.mrb[169].mxu0  ;;  %v4796_v28 = vmul.f32 -1.442695, %v3090_v36  ;;  %v3093_v36 = vadd.f32 %v8188_v21, %v8115_v43 }
 0x7cd   : > { %v5956_v6 = vpop.eup %5955  ;;  %v3951_v32 = vadd.f32 1.0, %v5954_v26 }
 0x7ce   : > { %5965 = vpow2.f32 %v4852_v23  ;;  %v3635_v53 = vadd.f32 %v8188_v21, %v3593_v8  ;;  %4098 = vrot.lane.b32.xlu0 %v5956_v6, %s6537_s30 }
 0x7cf   : > { %5967 = vrcp.f32 %v3951_v32  ;;  %v3372_v61 = vpop.f32.mrb[170].mxu0  ;;  %v3092_v32 = vadd.f32 %v8188_v21, %v8110_v2 }
 0x7d0   : > { %v5958_v29 = vpop.eup %5957  ;;  %v4853_v12 = vmul.f32 -1.442695, %v3635_v53  ;;  %v3598_v31 = vadd.f32 %v3597_v41, %v3372_v61  ;;  %v3374_v52 = vpop.f32.mrb[171].mxu0  ;;  %v3091_v41 = vadd.f32 %v8188_v21, %v8104_v35 }
 0x7d1   : > { %v5960_v46 = vpop.eup %5959  ;;  %v3952_v10 = vadd.f32 1.0, %v5958_v29 }
 0x7d2   : > { %5969 = vpow2.f32 %v4853_v12  ;;  %4100 = vrot.lane.b32.xlu1 %v5960_v46, %s6537_s30  ;;  %v4797_v34 = vmul.f32 -1.442695, %v3091_v41  ;;  %v3636_v8 = vadd.f32 %v8188_v21, %v3598_v31 }
 0x7d3   : > { %5971 = vrcp.f32 %v3952_v10  ;;  %v3377_v50 = vpop.f32.mrb[172].mxu0  ;;  %v4798_v10 = vmul.f32 -1.442695, %v3092_v32 }
 0x7d4   : > { %v5962_v11 = vpop.eup %5961  ;;  %v3603_v59 = vadd.f32 %v3602_v4, %v3377_v50  ;;  %v3379_v30 = vpop.f32.mrb[173].mxu0  ;;  %v4854_v52 = vmul.f32 -1.442695, %v3636_v8 }
 0x7d5   : > { %v5964_v55 = vpop.eup %5963  ;;  %v3953_v51 = vadd.f32 1.0, %v5962_v11 }
 0x7d6   : > { %4102 = vrot.lane.b32.xlu0 %v5964_v55, %s6537_s30  ;;  %v3637_v31 = vadd.f32 %v8188_v21, %v3603_v59 }
 0x7d7   : > { %5973 = vrcp.f32 %v3953_v51  ;;  %v3447_v60 = vpop.f32.mrb[174].mxu0  ;;  %v4799_v51 = vmul.f32 -1.442695, %v3093_v36 }
 0x7d8   : > { %v5966_v44 = vpop.eup %5965  ;;  %v3448_v5 = vadd.f32 %v3447_v60, %v8182_v56  ;;  %v3449_v26 = vpop.f32.mrb[175].mxu0  ;;  %5975 = vpow2.f32 %v4795_v54  ;;  %v4855_v30 = vmul.f32 -1.442695, %v3637_v31 }
 0x7d9   : > { %v5968_v23 = vpop.eup %5967  ;;  %v3954_v4 = vadd.f32 1.0, %v5966_v44 }
 0x7da   : > { %v3606_v15 = vadd.f32 %v8188_v21, %v3448_v5  ;;  %4104 = vrot.lane.b32.xlu1 %v5968_v23, %s6537_s30  ;;  %v3095_v23 = vadd.f32 %v8188_v21, %v8124_v19 }
 0x7db   : > { %5977 = vrcp.f32 %v3954_v4  ;;  %v3452_v35 = vpop.f32.mrb[176].mxu0 }
 0x7dc   : > { %v5970_v6 = vpop.eup %5969  ;;  %5979 = vpow2.f32 %v4796_v28  ;;  %v4824_v53 = vmul.f32 -1.442695, %v3606_v15  ;;  %v3453_v56 = vadd.f32 %v3452_v35, %v8184_v1  ;;  %v3454_v61 = vpop.f32.mrb[177].mxu0  ;;  %v4801_v35 = vmul.f32 -1.442695, %v3095_v23 }
 0x7dd   : > { %v5972_v29 = vpop.eup %5971  ;;  %5981 = vpow2.f32 %v4797_v34  ;;  %v3955_v12 = vadd.f32 1.0, %v5970_v6  ;;  %v3096_v6 = vadd.f32 %v8188_v21, %v8128_v38 }
 0x7de   : > { %5983 = vpow2.f32 %v4824_v53  ;;  %v3607_v46 = vadd.f32 %v8188_v21, %v3453_v56  ;;  %4106 = vrot.lane.b32.xlu0 %v5972_v29, %s6537_s30 }
 0x7df   : > { %5985 = vrcp.f32 %v3955_v12  ;;  %v3457_v39 = vpop.f32.mrb[178].mxu0  ;;  %v4802_v29 = vmul.f32 -1.442695, %v3096_v6  ;;  %v3097_v12 = vadd.f32 %v8188_v21, %v8133_v63 }
 0x7e0   : > { %v4825_v50 = vmul.f32 -1.442695, %v3607_v46  ;;  %v3458_v2 = vadd.f32 %v3457_v39, %v8186_v24  ;;  %v3459_v11 = vpop.f32.mrb[179].mxu0  ;;  %5987 = vpow2.f32 %v4854_v52  ;;  %v3094_v24 = vadd.f32 %v8188_v21, %v8120_v22 }
 0x7e1   : > { %v5974_v1 = vpop.eup %5973  ;;  %v3098_v11 = vadd.f32 %v8188_v21, %v8138_v37 }
 0x7e2   : > { %5989 = vpow2.f32 %v4825_v50  ;;  %v3608_v59 = vadd.f32 %v8188_v21, %v3458_v2  ;;  %4108 = vrot.lane.b32.xlu1 %v5974_v1, %s6537_s30  ;;  %v5976_v55 = vpop.eup %5975  ;;  %v4800_v26 = vmul.f32 -1.442695, %v3094_v24  ;;  %v4803_v2 = vmul.f32 -1.442695, %v3097_v12 }
 0x7e3   : > { %5991 = vpow2.f32 %v4798_v10  ;;  %v3737_v44 = vadd.f32 1.0, %v5976_v55  ;;  %v4804_v55 = vmul.f32 -1.442695, %v3098_v11 }
 0x7e4   : > { %v4826_v54 = vmul.f32 -1.442695, %v3608_v59  ;;  %5993 = vpow2.f32 %v4855_v30 }
 0x7e5   : > { %v5978_v41 = vpop.eup %5977 }
 0x7e6   : > { %v5980_v60 = vpop.eup %5979  ;;  %5995 = vpow2.f32 %v4826_v54  ;;  %4110 = vrot.lane.b32.xlu0 %v5978_v41, %s6537_s30  ;;  %v3099_v54 = vadd.f32 %v8188_v21, %v8143_v45  ;;  %v3100_v45 = vadd.f32 %v8188_v21, %v8146_v16 }
 0x7e7   : > { %v5982_v43 = vpop.eup %5981  ;;  %5997 = vpow2.f32 %v4799_v51  ;;  %v3738_v4 = vadd.f32 1.0, %v5980_v60 }
 0x7e8   : > { %v5984_v28 = vpop.eup %5983  ;;  %5999 = vrcp.f32 %v3737_v44  ;;  %v3739_v15 = vadd.f32 1.0, %v5982_v43  ;;  %v4806_v16 = vmul.f32 -1.442695, %v3100_v45 }
 0x7e9   : > { %v5986_v5 = vpop.eup %5985  ;;  %v3926_v34 = vadd.f32 1.0, %v5984_v28 }
 0x7ea   : > { %4112 = vrot.lane.b32.xlu1 %v5986_v5, %s6537_s30  ;;  %v5988_v22 = vpop.eup %5987  ;;  %v4805_v5 = vmul.f32 -1.442695, %v3099_v54 }
 0x7eb   : > { %6001 = vrcp.f32 %v3926_v34  ;;  %v3956_v56 = vadd.f32 1.0, %v5988_v22 }
 0x7ec   : > { %v5990_v8 = vpop.eup %5989  ;;  %6003 = vpow2.f32 %v4800_v26 }
 0x7ed   : > { %v3927_v32 = vadd.f32 1.0, %v5990_v8  ;;  %v5992_v53 = vpop.eup %5991  ;;  %6005 = vrcp.f32 %v3738_v4 }
 0x7ee   : > { %v5994_v19 = vpop.eup %5993  ;;  %v3740_v31 = vadd.f32 1.0, %v5992_v53 }
 0x7ef   : > { %6007 = vrcp.f32 %v3927_v32  ;;  %v3957_v46 = vadd.f32 1.0, %v5994_v19 }
 0x7f0   : > { %v5996_v61 = vpop.eup %5995  ;;  %6009 = vrcp.f32 %v3739_v15  ;;  %v3101_v15 = vadd.f32 %v8188_v21, %v8148_v49 }
 0x7f1   : > { %6011 = vpow2.f32 %v4801_v35  ;;  %v3928_v52 = vadd.f32 1.0, %v5996_v61  ;;  %v5998_v38 = vpop.eup %5997  ;;  %v3102_v61 = vadd.f32 %v8188_v21, %v8150_v18 }
 0x7f2   : > { %6013 = vrcp.f32 %v3956_v56  ;;  %v6000_v39 = vpop.eup %5999  ;;  %v3741_v63 = vadd.f32 1.0, %v5998_v38  ;;  %v4807_v19 = vmul.f32 -1.442695, %v3101_v15 }
 0x7f3   : > { %6015 = vrcp.f32 %v3928_v52  ;;  %v4808_v38 = vmul.f32 -1.442695, %v3102_v61 }
 0x7f4   : > { %v4061_v10 = vpop.permute.xlu1 %4060  ;;  %6017 = vpow2.f32 %v4802_v29 }
 0x7f5   : > { %v6002_v50 = vpop.eup %6001  ;;  %v4154_v1 = vsel %vm4150_vm6, %v6000_v39, %v4061_v10  ;;  %4191 = vst.msk [vmem:[%s8328_s25 + $0x38] sm:$0xff] %vm4184_vm7, %v4061_v10  ;;  %6019 = vrcp.f32 %v3740_v31 }
 0x7f6   : > { %4190 = vst [vmem:[%s8328_s25 + $0x30] sm:$0xff] %v4154_v1  ;;  %4054 = vrot.lane.b32.xlu0 %v6002_v50, %s6537_s30  ;;  %v6004_v36 = vpop.eup %6003  ;;  %6021 = vrcp.f32 %v3957_v46  ;;  %v3103_v46 = vadd.f32 %v8188_v21, %v8152_v0  ;;  %v3104_v1 = vadd.f32 %v8188_v21, %v8154_v58 }
 0x7f7   : > { %v6006_v30 = vpop.eup %6005  ;;  %6023 = vpow2.f32 %v4803_v2  ;;  %v3742_v24 = vadd.f32 1.0, %v6004_v36 }
 0x7f8   : > { %v4063_v59 = vpop.permute.xlu0 %4062  ;;  %6025 = vrcp.f32 %v3741_v63  ;;  %v4809_v11 = vmul.f32 -1.442695, %v3103_v46 }
 0x7f9   : > { %v6008_v37 = vpop.eup %6007  ;;  %v4155_v41 = vsel %vm4150_vm6, %v6006_v30, %v4063_v59  ;;  %4193 = vst.msk [vmem:[%s8328_s25 + $0x48] sm:$0xff] %vm4184_vm7, %v4063_v59  ;;  %6027 = vpow2.f32 %v4804_v55  ;;  %v8374_v55 = vld [vmem:[#allocation19] ss:$0 sm:$0xff] }
 0x7fa   : > { %v6010_v51 = vpop.eup %6009  ;;  %4192 = vst [vmem:[%s8328_s25 + $0x40] sm:$0xff] %v4155_v41  ;;  %4056 = vrot.lane.b32.xlu0 %v6008_v37, %s6537_s30  ;;  %6029 = vrcp.f32 %v3742_v24  ;;  %v4810_v37 = vmul.f32 -1.442695, %v3104_v1  ;;  %v3105_v54 = vadd.f32 %v8374_v55, %v8156_v13  ;;  %v3108_v15 = vadd.f32 %v8374_v55, %v8162_v14 }
 0x7fb   : > { %v6012_v60 = vpop.eup %6011  ;;  %6031 = vpow2.f32 %v4805_v5 }
 0x7fc   : > { %v6014_v44 = vpop.eup %6013  ;;  %v4065_v43 = vpop.permute.xlu1 %4064  ;;  %v3743_v23 = vadd.f32 1.0, %v6012_v60  ;;  %v4811_v60 = vmul.f32 -1.442695, %v3105_v54 }
 0x7fd   : > { %v6016_v28 = vpop.eup %6015  ;;  %v4156_v26 = vsel %vm4150_vm6, %v6010_v51, %v4065_v43  ;;  %4195 = vst.msk [vmem:[%s8328_s25 + $0x58] sm:$0xff] %vm4184_vm7, %v4065_v43 }
 0x7fe   : > { %4194 = vst [vmem:[%s8328_s25 + $0x50] sm:$0xff] %v4156_v26  ;;  %4058 = vrot.lane.b32.xlu1 %v6016_v28, %s6537_s30  ;;  %4114 = vrot.lane.b32.xlu0 %v6014_v44, %s6537_s30  ;;  %v6018_v34 = vpop.eup %6017  ;;  %6033 = vrcp.f32 %v3743_v23  ;;  %v3106_v44 = vadd.f32 %v8374_v55, %v8158_v47  ;;  %v3107_v23 = vadd.f32 %v8374_v55, %v8160_v7 }
 0x7ff   : > { %v6020_v4 = vpop.eup %6019  ;;  %v3744_v6 = vadd.f32 1.0, %v6018_v34  ;;  %6035 = vpow2.f32 %v4806_v16 }
 0x800   : > { %v4067_v22 = vpop.permute.xlu0 %4066  ;;  %v6022_v8 = vpop.eup %6021  ;;  %v4812_v26 = vmul.f32 -1.442695, %v3106_v44  ;;  %v4813_v16 = vmul.f32 -1.442695, %v3107_v23  ;;  %v3115_v23 = vadd.f32 %v8374_v55, %v8176_v3 }
 0x801   : > { %v4157_v35 = vsel %vm4150_vm6, %v6020_v4, %v4067_v22  ;;  %4197 = vst.msk [vmem:[%s8328_s25 + $0x68] sm:$0xff] %vm4184_vm7, %v4067_v22  ;;  %v6024_v32 = vpop.eup %6023  ;;  %6037 = vrcp.f32 %v3744_v6 }
 0x802   : > { %4196 = vst [vmem:[%s8328_s25 + $0x60] sm:$0xff] %v4157_v35  ;;  %4116 = vrot.lane.b32.xlu1 %v6022_v8, %s6537_s30  ;;  %v6026_v53 = vpop.eup %6025  ;;  %v3745_v29 = vadd.f32 1.0, %v6024_v32  ;;  %6039 = vpow2.f32 %v4807_v19  ;;  %v3109_v19 = vadd.f32 %v8374_v55, %v8164_v25 }
 0x803   : > { %v6028_v12 = vpop.eup %6027 }
 0x804   : > { %v4069_v56 = vpop.permute.xlu1 %4068  ;;  %v6030_v52 = vpop.eup %6029  ;;  %6041 = vrcp.f32 %v3745_v29  ;;  %v3746_v39 = vadd.f32 1.0, %v6028_v12 }
 0x805   : > { %v4158_v49 = vsel %vm4150_vm6, %v6026_v53, %v4069_v56  ;;  %4199 = vst.msk [vmem:[%s8328_s25 + $0x78] sm:$0xff] %vm4184_vm7, %v4069_v56  ;;  %v6032_v10 = vpop.eup %6031  ;;  %6043 = vpow2.f32 %v4808_v38  ;;  %v4814_v56 = vmul.f32 -1.442695, %v3108_v15 }
 0x806   : > { %4198 = vst [vmem:[%s8328_s25 + $0x70] sm:$0xff] %v4158_v49  ;;  %6045 = vrcp.f32 %v3746_v39  ;;  %v3747_v0 = vadd.f32 1.0, %v6032_v10 }
 0x807   : > { %6047 = vpow2.f32 %v4809_v11 }
 0x808   : > { %v4071_v31 = vpop.permute.xlu0 %4070  ;;  %v6034_v50 = vpop.eup %6033  ;;  %6049 = vrcp.f32 %v3747_v0 }
 0x809   : > { %v4159_v18 = vsel %vm4150_vm6, %v6030_v52, %v4071_v31  ;;  %4201 = vst.msk [vmem:[%s8328_s25 + $0x88] sm:$0xff] %vm4184_vm7, %v4071_v31  ;;  %v6036_v36 = vpop.eup %6035  ;;  %6051 = vpow2.f32 %v4810_v37  ;;  %v4815_v52 = vmul.f32 -1.442695, %v3109_v19  ;;  %v3110_v31 = vadd.f32 %v8374_v55, %v8166_v27 }
 0x80a   : > { %4200 = vst [vmem:[%s8328_s25 + $0x80] sm:$0xff] %v4159_v18  ;;  %v3748_v21 = vadd.f32 1.0, %v6036_v36  ;;  %v3112_v36 = vadd.f32 %v8374_v55, %v8170_v20 }
 0x80b   : > { %v6038_v30 = vpop.eup %6037  ;;  %v4816_v10 = vmul.f32 -1.442695, %v3110_v31 }
 0x80c   : > { %v4073_v2 = vpop.permute.xlu1 %4072  ;;  %v6040_v41 = vpop.eup %6039  ;;  %6053 = vrcp.f32 %v3748_v21  ;;  %v3113_v21 = vadd.f32 %v8374_v55, %v8172_v62 }
 0x80d   : > { %v4160_v63 = vsel %vm4150_vm6, %v6034_v50, %v4073_v2  ;;  %4203 = vst.msk [vmem:[%s8328_s25 + $0x98] sm:$0xff] %vm4184_vm7, %v4073_v2  ;;  %v3749_v43 = vadd.f32 1.0, %v6040_v41  ;;  %6055 = vpow2.f32 %v4811_v60  ;;  %v3111_v50 = vadd.f32 %v8374_v55, %v8168_v48 }
 0x80e   : > { %4202 = vst [vmem:[%s8328_s25 + $0x90] sm:$0xff] %v4160_v63  ;;  %v6042_v51 = vpop.eup %6041  ;;  %v4819_v44 = vmul.f32 -1.442695, %v3113_v21 }
 0x80f   : > { %v6044_v28 = vpop.eup %6043  ;;  %6057 = vrcp.f32 %v3749_v43  ;;  %v4817_v0 = vmul.f32 -1.442695, %v3111_v50 }
 0x810   : > { %v4075_v59 = vpop.permute.xlu0 %4074  ;;  %v6046_v5 = vpop.eup %6045  ;;  %v3750_v34 = vadd.f32 1.0, %v6044_v28  ;;  %6059 = vpow2.f32 %v4812_v26 }
 0x811   : > { %v4161_v58 = vsel %vm4150_vm6, %v6038_v30, %v4075_v59  ;;  %4205 = vst.msk [vmem:[%s8328_s25 + $0xa8] sm:$0xff] %vm4184_vm7, %v4075_v59  ;;  %v6048_v4 = vpop.eup %6047 }
 0x812   : > { %4204 = vst [vmem:[%s8328_s25 + $0xa0] sm:$0xff] %v4161_v58  ;;  %v6050_v22 = vpop.eup %6049  ;;  %6061 = vrcp.f32 %v3750_v34  ;;  %v3751_v35 = vadd.f32 1.0, %v6048_v4  ;;  %v4818_v58 = vmul.f32 -1.442695, %v3112_v36 }
 0x813   : > { %v6052_v6 = vpop.eup %6051  ;;  %6063 = vpow2.f32 %v4813_v16 }
 0x814   : > { %v4077_v24 = vpop.permute.xlu1 %4076  ;;  %6065 = vrcp.f32 %v3751_v35  ;;  %v3752_v61 = vadd.f32 1.0, %v6052_v6 }
 0x815   : > { %v4162_v13 = vsel %vm4150_vm6, %v6042_v51, %v4077_v24  ;;  %4207 = vst.msk [vmem:[%s8328_s25 + $0xb8] sm:$0xff] %vm4184_vm7, %v4077_v24  ;;  %6067 = vpow2.f32 %v4814_v56 }
 0x816   : > { %4206 = vst [vmem:[%s8328_s25 + $0xb0] sm:$0xff] %v4162_v13  ;;  %v6054_v32 = vpop.eup %6053  ;;  %6069 = vrcp.f32 %v3752_v61  ;;  %v3114_v13 = vadd.f32 %v8374_v55, %v8174_v57 }
 0x817   : > { %v6056_v49 = vpop.eup %6055  ;;  %6071 = vpow2.f32 %v4815_v52 }
 0x818   : > { %v4079_v45 = vpop.permute.xlu0 %4078  ;;  %v3753_v38 = vadd.f32 1.0, %v6056_v49  ;;  %v4820_v26 = vmul.f32 -1.442695, %v3114_v13 }
 0x819   : > { %v4163_v47 = vsel %vm4150_vm6, %v6046_v5, %v4079_v45  ;;  %4209 = vst.msk [vmem:[%s8328_s25 + $0xc8] sm:$0xff] %vm4184_vm7, %v4079_v45  ;;  %v6058_v29 = vpop.eup %6057 }
 0x81a   : > { %4208 = vst [vmem:[%s8328_s25 + $0xc0] sm:$0xff] %v4163_v47  ;;  %v6060_v46 = vpop.eup %6059  ;;  %6073 = vrcp.f32 %v3753_v38 }
 0x81b   : > { %v3754_v2 = vadd.f32 1.0, %v6060_v46  ;;  %6075 = vpow2.f32 %v4816_v10 }
 0x81c   : > { %v4081_v8 = vpop.permute.xlu1 %4080  ;;  %v6062_v18 = vpop.eup %6061 }
 0x81d   : > { %v4164_v7 = vsel %vm4150_vm6, %v6050_v22, %v4081_v8  ;;  %4211 = vst.msk [vmem:[%s8328_s25 + $0xd8] sm:$0xff] %vm4184_vm7, %v4081_v8  ;;  %v6064_v11 = vpop.eup %6063  ;;  %6077 = vrcp.f32 %v3754_v2  ;;  %v4821_v8 = vmul.f32 -1.442695, %v3115_v23 }
 0x81e   : > { %4210 = vst [vmem:[%s8328_s25 + $0xd0] sm:$0xff] %v4164_v7  ;;  %v6066_v1 = vpop.eup %6065  ;;  %v3755_v30 = vadd.f32 1.0, %v6064_v11  ;;  %6079 = vpow2.f32 %v4817_v0  ;;  %v3117_v0 = vadd.f32 %v8374_v55, %v8180_v42 }
 0x81f   : > { %v6068_v59 = vpop.eup %6067 }
 0x820   : > { %v4083_v53 = vpop.permute.xlu0 %4082  ;;  %v6070_v37 = vpop.eup %6069  ;;  %6081 = vrcp.f32 %v3755_v30  ;;  %v3756_v41 = vadd.f32 1.0, %v6068_v59  ;;  %v4823_v30 = vmul.f32 -1.442695, %v3117_v0 }
 0x821   : > { %v4165_v14 = vsel %vm4150_vm6, %v6054_v32, %v4083_v53  ;;  %4213 = vst.msk [vmem:[%s8328_s25 + $0xe8] sm:$0xff] %vm4184_vm7, %v4083_v53  ;;  %v6072_v51 = vpop.eup %6071  ;;  %6083 = vpow2.f32 %v4818_v58 }
 0x822   : > { %4212 = vst [vmem:[%s8328_s25 + $0xe0] sm:$0xff] %v4165_v14  ;;  %6085 = vrcp.f32 %v3756_v41  ;;  %v3757_v43 = vadd.f32 1.0, %v6072_v51  ;;  %v3086_v14 = vadd.f32 %v8374_v55, %v8063_v17 }
 0x823   : > { %6087 = vpow2.f32 %v4819_v44 }
 0x824   : > { %v4085_v12 = vpop.permute.xlu1 %4084  ;;  %v6074_v24 = vpop.eup %6073  ;;  %6089 = vrcp.f32 %v3757_v43  ;;  %v4792_v31 = vmul.f32 -1.442695, %v3086_v14  ;;  %v4325_v0 = vld [vmem:[%s8328_s25 + $0xd8] sm:$0xff] (%p8777_p12) }
 0x825   : > { %v4166_v25 = vsel %vm4150_vm6, %v6058_v29, %v4085_v12  ;;  %4215 = vst.msk [vmem:[%s8328_s25 + $0xf8] sm:$0xff] %vm4184_vm7, %v4085_v12  ;;  %v6076_v28 = vpop.eup %6075  ;;  %6091 = vpow2.f32 %v4820_v26  ;;  %4326 = vst [vmem:[%s8517_s2 + $0x198] sm:$0xff] (%p8777_p12), %v4325_v0 }
 0x826   : > { %4214 = vst [vmem:[%s8328_s25 + $0xf0] sm:$0xff] %v4166_v25  ;;  %v3758_v47 = vadd.f32 1.0, %v6076_v28  ;;  %v3087_v25 = vadd.f32 %v8374_v55, %v8072_v33  ;;  %v3116_v33 = vadd.f32 %v8374_v55, %v8178_v9 }
 0x827   : > { %v6078_v5 = vpop.eup %6077 }
 0x828   : > { %v4087_v39 = vpop.permute.xlu0 %4086  ;;  %v6080_v34 = vpop.eup %6079  ;;  %6093 = vrcp.f32 %v3758_v47  ;;  %v4793_v50 = vmul.f32 -1.442695, %v3087_v25  ;;  %v4295_v25 = vld [vmem:[%s8328_s25 + $0x60] sm:$0xff] (%p8777_p12) }
 0x829   : > { %v4167_v27 = vsel %vm4150_vm6, %v6062_v18, %v4087_v39  ;;  %4217 = vst.msk [vmem:[%s8328_s25 + $0x108] sm:$0xff] %vm4184_vm7, %v4087_v39  ;;  %v3759_v3 = vadd.f32 1.0, %v6080_v34  ;;  %6095 = vpow2.f32 %v4821_v8  ;;  %v3088_v39 = vadd.f32 %v8374_v55, %v8080_v40  ;;  %4296 = vst [vmem:[%s8517_s2 + $0xc0] sm:$0xff] (%p8777_p12), %v4295_v25 }
 0x82a   : > { %4216 = vst [vmem:[%s8328_s25 + $0x100] sm:$0xff] %v4167_v27  ;;  %v6082_v4 = vpop.eup %6081 }
 0x82b   : > { %v6084_v15 = vpop.eup %6083  ;;  %6097 = vrcp.f32 %v3759_v3 }
 0x82c   : > { %v4089_v63 = vpop.permute.xlu1 %4088  ;;  %v6086_v7 = vpop.eup %6085  ;;  %v3760_v32 = vadd.f32 1.0, %v6084_v15 }
 0x82d   : > { %v4168_v48 = vsel %vm4150_vm6, %v6066_v1, %v4089_v63  ;;  %4219 = vst.msk [vmem:[%s8328_s25 + $0x118] sm:$0xff] %vm4184_vm7, %v4089_v63  ;;  %v6088_v53 = vpop.eup %6087  ;;  %v4794_v1 = vmul.f32 -1.442695, %v3088_v39  ;;  %v4822_v63 = vmul.f32 -1.442695, %v3116_v33  ;;  %v4305_v39 = vld [vmem:[%s8328_s25 + $0x88] sm:$0xff] (%p8777_p12) }
 0x82e   : > { %4218 = vst [vmem:[%s8328_s25 + $0x110] sm:$0xff] %v4168_v48  ;;  %v6090_v56 = vpop.eup %6089  ;;  %6099 = vrcp.f32 %v3760_v32  ;;  %v3761_v49 = vadd.f32 1.0, %v6088_v53  ;;  %4306 = vst [vmem:[%s8517_s2 + $0x108] sm:$0xff] (%p8777_p12), %v4305_v39  ;;  %v4311_v33 = vld [vmem:[%s8328_s25 + $0xa0] sm:$0xff] (%p8777_p12) }
 0x82f   : > { %v6092_v29 = vpop.eup %6091  ;;  %4312 = vst [vmem:[%s8517_s2 + $0x140] sm:$0xff] (%p8777_p12), %v4311_v33 }
 0x830   : > { %v4091_v54 = vpop.permute.xlu0 %4090  ;;  %6101 = vrcp.f32 %v3761_v49  ;;  %v3762_v17 = vadd.f32 1.0, %v6092_v29  ;;  %v4285_v49 = vld [vmem:[%s8328_s25 + $0x38] sm:$0xff] (%p8777_p12)  ;;  %v4287_v29 = vld [vmem:[%s8328_s25 + $0x40] sm:$0xff] (%p8777_p12) }
 0x831   : > { %v4169_v20 = vsel %vm4150_vm6, %v6070_v37, %v4091_v54  ;;  %4221 = vst.msk [vmem:[%s8328_s25 + $0x128] sm:$0xff] %vm4184_vm7, %v4091_v54  ;;  %6103 = vpow2.f32 %v4792_v31  ;;  %4286 = vst [vmem:[%s8517_s2 + $0x58] sm:$0xff] (%p8777_p12), %v4285_v49  ;;  %v4293_v31 = vld [vmem:[%s8328_s25 + $0x58] sm:$0xff] (%p8777_p12) }
 0x832   : > { %4220 = vst [vmem:[%s8328_s25 + $0x120] sm:$0xff] %v4169_v20  ;;  %v6094_v12 = vpop.eup %6093  ;;  %6105 = vrcp.f32 %v3762_v17  ;;  %4288 = vst [vmem:[%s8517_s2 + $0x80] sm:$0xff] (%p8777_p12), %v4287_v29  ;;  %v4299_v17 = vld [vmem:[%s8328_s25 + $0x70] sm:$0xff] (%p8777_p12) }
 0x833   : > { %v6096_v46 = vpop.eup %6095  ;;  %6107 = vpow2.f32 %v4793_v50  ;;  %4294 = vst [vmem:[%s8517_s2 + $0x98] sm:$0xff] (%p8777_p12), %v4293_v31  ;;  %4300 = vst [vmem:[%s8517_s2 + $0xd0] sm:$0xff] (%p8777_p12), %v4299_v17  ;;  %v4309_v50 = vld [vmem:[%s8328_s25 + $0x98] sm:$0xff] (%p8777_p12) }
 0x834   : > { %v4093_v60 = vpop.permute.xlu1 %4092  ;;  %v3763_v2 = vadd.f32 1.0, %v6096_v46  ;;  %v4301_v46 = vld [vmem:[%s8328_s25 + $0x78] sm:$0xff] (%p8777_p12)  ;;  %4310 = vst [vmem:[%s8517_s2 + $0x118] sm:$0xff] (%p8777_p12), %v4309_v50 }
 0x835   : > { %v4170_v62 = vsel %vm4150_vm6, %v6074_v24, %v4093_v60  ;;  %4223 = vst.msk [vmem:[%s8328_s25 + $0x138] sm:$0xff] %vm4184_vm7, %v4093_v60  ;;  %v6098_v18 = vpop.eup %6097  ;;  %4302 = vst [vmem:[%s8517_s2 + $0xd8] sm:$0xff] (%p8777_p12), %v4301_v46 }
 0x836   : > { %4222 = vst [vmem:[%s8328_s25 + $0x130] sm:$0xff] %v4170_v62  ;;  %6109 = vrcp.f32 %v3763_v2  ;;  %v4315_v2 = vld [vmem:[%s8328_s25 + $0xb0] sm:$0xff] (%p8777_p12) }
 0x837   : > { %6111 = vpow2.f32 %v4794_v1  ;;  %4316 = vst [vmem:[%s8517_s2 + $0x150] sm:$0xff] (%p8777_p12), %v4315_v2  ;;  %v4319_v1 = vld [vmem:[%s8328_s25 + $0xc0] sm:$0xff] (%p8777_p12) }
 0x838   : > { %v4095_v45 = vpop.permute.xlu0 %4094  ;;  %v6100_v11 = vpop.eup %6099  ;;  %6113 = vpow2.f32 %v4822_v63  ;;  %v4323_v63 = vld [vmem:[%s8328_s25 + $0xd0] sm:$0xff] (%p8777_p12)  ;;  %4320 = vst [vmem:[%s8517_s2 + $0x180] sm:$0xff] (%p8777_p12), %v4319_v1 }
 0x839   : > { %v4171_v57 = vsel %vm4150_vm6, %v6078_v5, %v4095_v45  ;;  %4225 = vst.msk [vmem:[%s8328_s25 + $0x148] sm:$0xff] %vm4184_vm7, %v4095_v45  ;;  %6115 = vpow2.f32 %v4823_v30  ;;  %4324 = vst [vmem:[%s8517_s2 + $0x190] sm:$0xff] (%p8777_p12), %v4323_v63  ;;  %v4333_v30 = vld [vmem:[%s8328_s25 + $0xf8] sm:$0xff] (%p8777_p12) }
 0x83a   : > { %4224 = vst [vmem:[%s8328_s25 + $0x140] sm:$0xff] %v4171_v57  ;;  %v6102_v9 = vpop.eup %6101  ;;  %4334 = vst [vmem:[%s8517_s2 + $0x1d8] sm:$0xff] (%p8777_p12), %v4333_v30 }
 0x83b   : > { %v6104_v42 = vpop.eup %6103 }
 0x83c   : > { %v4097_v22 = vpop.permute.xlu1 %4096  ;;  %v6106_v55 = vpop.eup %6105  ;;  %v3734_v58 = vadd.f32 1.0, %v6104_v42  ;;  %v4337_v42 = vld [vmem:[%s8328_s25 + $0x108] sm:$0xff] (%p8777_p12) }
 0x83d   : > { %v4172_v16 = vsel %vm4150_vm6, %v6082_v4, %v4097_v22  ;;  %4227 = vst.msk [vmem:[%s8328_s25 + $0x158] sm:$0xff] %vm4184_vm7, %v4097_v22  ;;  %v6108_v21 = vpop.eup %6107  ;;  %4338 = vst [vmem:[%s8517_s2 + $0x208] sm:$0xff] (%p8777_p12), %v4337_v42 }
 0x83e   : > { %4226 = vst [vmem:[%s8328_s25 + $0x150] sm:$0xff] %v4172_v16  ;;  %6117 = vrcp.f32 %v3734_v58  ;;  %v3735_v60 = vadd.f32 1.0, %v6108_v21  ;;  %v4345_v58 = vld [vmem:[%s8328_s25 + $0x128] sm:$0xff] (%p8777_p12)  ;;  %v4347_v21 = vld [vmem:[%s8328_s25 + $0x130] sm:$0xff] (%p8777_p12) }
 0x83f   : > { %4346 = vst [vmem:[%s8517_s2 + $0x248] sm:$0xff] (%p8777_p12), %v4345_v58  ;;  %4348 = vst [vmem:[%s8517_s2 + $0x250] sm:$0xff] (%p8777_p12), %v4347_v21 }
 0x840   : > { %v4099_v35 = vpop.permute.xlu0 %4098  ;;  %v6110_v20 = vpop.eup %6109  ;;  %6119 = vrcp.f32 %v3735_v60 }
 0x841   : > { %v4173_v6 = vsel %vm4150_vm6, %v6086_v7, %v4099_v35  ;;  %4229 = vst.msk [vmem:[%s8328_s25 + $0x168] sm:$0xff] %vm4184_vm7, %v4099_v35  ;;  %v6112_v24 = vpop.eup %6111 }
 0x842   : > { %4228 = vst [vmem:[%s8328_s25 + $0x160] sm:$0xff] %v4173_v6  ;;  %v6114_v44 = vpop.eup %6113  ;;  %v3736_v13 = vadd.f32 1.0, %v6112_v24 }
 0x843   : > { %v3764_v62 = vadd.f32 1.0, %v6114_v44  ;;  %v6116_v43 = vpop.eup %6115 }
 0x844   : > { %v4101_v19 = vpop.permute.xlu1 %4100  ;;  %6121 = vrcp.f32 %v3736_v13  ;;  %v3765_v28 = vadd.f32 1.0, %v6116_v43  ;;  %v4357_v60 = vld [vmem:[%s8328_s25 + $0x158] sm:$0xff] (%p8777_p12) }
 0x845   : > { %v4174_v61 = vsel %vm4150_vm6, %v6090_v56, %v4101_v19  ;;  %4231 = vst.msk [vmem:[%s8328_s25 + $0x178] sm:$0xff] %vm4184_vm7, %v4101_v19  ;;  %6123 = vrcp.f32 %v3764_v62  ;;  %v4355_v24 = vld [vmem:[%s8328_s25 + $0x150] sm:$0xff] (%p8777_p12)  ;;  %4358 = vst [vmem:[%s8517_s2 + $0x298] sm:$0xff] (%p8777_p12), %v4357_v60 }
 0x846   : > { %4230 = vst [vmem:[%s8328_s25 + $0x170] sm:$0xff] %v4174_v61  ;;  %6125 = vrcp.f32 %v3765_v28  ;;  %v4283_v61 = vld [vmem:[%s8328_s25 + $0x30] sm:$0xff] (%p8777_p12)  ;;  %4356 = vst [vmem:[%s8517_s2 + $0x290] sm:$0xff] (%p8777_p12), %v4355_v24 }
 0x847   : > { %4284 = vst [vmem:[%s8517_s2 + $0x50] sm:$0xff] (%p8777_p12), %v4283_v61 }
 0x848   : > { %v4103_v52 = vpop.permute.xlu0 %4102  ;;  %v6118_v5 = vpop.eup %6117  ;;  %v4361_v13 = vld [vmem:[%s8328_s25 + $0x168] sm:$0xff] (%p8777_p12) }
 0x849   : > { %v4175_v38 = vsel %vm4150_vm6, %v6094_v12, %v4103_v52  ;;  %4233 = vst.msk [vmem:[%s8328_s25 + $0x188] sm:$0xff] %vm4184_vm7, %v4103_v52  ;;  %v4289_v12 = vld [vmem:[%s8328_s25 + $0x48] sm:$0xff] (%p8777_p12)  ;;  %v4291_v52 = vld [vmem:[%s8328_s25 + $0x50] sm:$0xff] (%p8777_p12)  ;;  %v4359_v44 = vld [vmem:[%s8328_s25 + $0x160] sm:$0xff] (%p8777_p12) }
 0x84a   : > { %4232 = vst [vmem:[%s8328_s25 + $0x180] sm:$0xff] %v4175_v38  ;;  %v6120_v23 = vpop.eup %6119  ;;  %4290 = vst [vmem:[%s8517_s2 + $0x88] sm:$0xff] (%p8777_p12), %v4289_v12  ;;  %v4297_v38 = vld [vmem:[%s8328_s25 + $0x68] sm:$0xff] (%p8777_p12) }
 0x84b   : > { %4292 = vst [vmem:[%s8517_s2 + $0x90] sm:$0xff] (%p8777_p12), %v4291_v52  ;;  %4298 = vst [vmem:[%s8517_s2 + $0xc8] sm:$0xff] (%p8777_p12), %v4297_v38 }
 0x84c   : > { %v4105_v10 = vpop.permute.xlu1 %4104  ;;  %4360 = vst [vmem:[%s8517_s2 + $0x2c0] sm:$0xff] (%p8777_p12), %v4359_v44  ;;  %v4365_v43 = vld [vmem:[%s8328_s25 + $0x178] sm:$0xff] (%p8777_p12)  ;;  %4362 = vst [vmem:[%s8517_s2 + $0x2c8] sm:$0xff] (%p8777_p12), %v4361_v13 }
 0x84d   : > { %v4176_v27 = vsel %vm4150_vm6, %v6098_v18, %v4105_v10  ;;  %4235 = vst.msk [vmem:[%s8328_s25 + $0x198] sm:$0xff] %vm4184_vm7, %v4105_v10  ;;  %v4303_v18 = vld [vmem:[%s8328_s25 + $0x80] sm:$0xff] (%p8777_p12)  ;;  %v4307_v10 = vld [vmem:[%s8328_s25 + $0x90] sm:$0xff] (%p8777_p12)  ;;  %4366 = vst [vmem:[%s8517_s2 + $0x2d8] sm:$0xff] (%p8777_p12), %v4365_v43 }
 0x84e   : > { %4234 = vst [vmem:[%s8328_s25 + $0x190] sm:$0xff] %v4176_v27  ;;  %v6122_v34 = vpop.eup %6121  ;;  %4304 = vst [vmem:[%s8517_s2 + $0x100] sm:$0xff] (%p8777_p12), %v4303_v18  ;;  %v4313_v27 = vld [vmem:[%s8328_s25 + $0xa8] sm:$0xff] (%p8777_p12)  ;;  %v4363_v62 = vld [vmem:[%s8328_s25 + $0x170] sm:$0xff] (%p8777_p12) }
 0x84f   : > { %v6124_v4 = vpop.eup %6123  ;;  %4308 = vst [vmem:[%s8517_s2 + $0x110] sm:$0xff] (%p8777_p12), %v4307_v10  ;;  %4314 = vst [vmem:[%s8517_s2 + $0x148] sm:$0xff] (%p8777_p12), %v4313_v27 }
 0x850   : > { %v4107_v40 = vpop.permute.xlu0 %4106  ;;  %v6126_v15 = vpop.eup %6125  ;;  %4364 = vst [vmem:[%s8517_s2 + $0x2d0] sm:$0xff] (%p8777_p12), %v4363_v62 }
 0x851   : > { %v4177_v36 = vsel %vm4150_vm6, %v6100_v11, %v4107_v40  ;;  %4237 = vst.msk [vmem:[%s8328_s25 + $0x1a8] sm:$0xff] %vm4184_vm7, %v4107_v40  ;;  %v4317_v11 = vld [vmem:[%s8328_s25 + $0xb8] sm:$0xff] (%p8777_p12)  ;;  %v4321_v40 = vld [vmem:[%s8328_s25 + $0xc8] sm:$0xff] (%p8777_p12)  ;;  %v4367_v28 = vld [vmem:[%s8328_s25 + $0x180] sm:$0xff] (%p8777_p12) }
 0x852   : > { %4236 = vst [vmem:[%s8328_s25 + $0x1a0] sm:$0xff] %v4177_v36  ;;  %4318 = vst [vmem:[%s8517_s2 + $0x158] sm:$0xff] (%p8777_p12), %v4317_v11  ;;  %v4327_v36 = vld [vmem:[%s8328_s25 + $0xe0] sm:$0xff] (%p8777_p12) }
 0x853   : > { %4322 = vst [vmem:[%s8517_s2 + $0x188] sm:$0xff] (%p8777_p12), %v4321_v40  ;;  %4328 = vst [vmem:[%s8517_s2 + $0x1c0] sm:$0xff] (%p8777_p12), %v4327_v36 }
 0x854   : > { %v4109_v48 = vpop.permute.xlu1 %4108  ;;  %4368 = vst [vmem:[%s8517_s2 + $0x300] sm:$0xff] (%p8777_p12), %v4367_v28 }
 0x855   : > { %v4178_v59 = vsel %vm4150_vm6, %v6102_v9, %v4109_v48  ;;  %4239 = vst.msk [vmem:[%s8328_s25 + $0x1b8] sm:$0xff] %vm4184_vm7, %v4109_v48  ;;  %v4329_v9 = vld [vmem:[%s8328_s25 + $0xe8] sm:$0xff] (%p8777_p12)  ;;  %v4331_v48 = vld [vmem:[%s8328_s25 + $0xf0] sm:$0xff] (%p8777_p12) }
 0x856   : > { %4238 = vst [vmem:[%s8328_s25 + $0x1b0] sm:$0xff] %v4178_v59  ;;  %4330 = vst [vmem:[%s8517_s2 + $0x1c8] sm:$0xff] (%p8777_p12), %v4329_v9  ;;  %v4335_v59 = vld [vmem:[%s8328_s25 + $0x100] sm:$0xff] (%p8777_p12) }
 0x857   : > { %4332 = vst [vmem:[%s8517_s2 + $0x1d0] sm:$0xff] (%p8777_p12), %v4331_v48  ;;  %4336 = vst [vmem:[%s8517_s2 + $0x200] sm:$0xff] (%p8777_p12), %v4335_v59 }
 0x858   : > { %v4111_v37 = vpop.permute.xlu0 %4110 }
 0x859   : > { %v4179_v54 = vsel %vm4150_vm6, %v6106_v55, %v4111_v37  ;;  %4241 = vst.msk [vmem:[%s8328_s25 + $0x1c8] sm:$0xff] %vm4184_vm7, %v4111_v37  ;;  %v4339_v55 = vld [vmem:[%s8328_s25 + $0x110] sm:$0xff] (%p8777_p12)  ;;  %v4341_v37 = vld [vmem:[%s8328_s25 + $0x118] sm:$0xff] (%p8777_p12) }
 0x85a   : > { %4240 = vst [vmem:[%s8328_s25 + $0x1c0] sm:$0xff] %v4179_v54  ;;  %4340 = vst [vmem:[%s8517_s2 + $0x210] sm:$0xff] (%p8777_p12), %v4339_v55  ;;  %v4343_v54 = vld [vmem:[%s8328_s25 + $0x120] sm:$0xff] (%p8777_p12) }
 0x85b   : > { %4342 = vst [vmem:[%s8517_s2 + $0x218] sm:$0xff] (%p8777_p12), %v4341_v37  ;;  %4344 = vst [vmem:[%s8517_s2 + $0x240] sm:$0xff] (%p8777_p12), %v4343_v54 }
 0x85c   : > { %v4113_v41 = vpop.permute.xlu1 %4112 }
 0x85d   : > { %v4180_v51 = vsel %vm4150_vm6, %v6110_v20, %v4113_v41  ;;  %4243 = vst.msk [vmem:[%s8328_s25 + $0x1d8] sm:$0xff] %vm4184_vm7, %v4113_v41  ;;  %v4349_v20 = vld [vmem:[%s8328_s25 + $0x138] sm:$0xff] (%p8777_p12)  ;;  %v4351_v41 = vld [vmem:[%s8328_s25 + $0x140] sm:$0xff] (%p8777_p12) }
 0x85e   : > { %4242 = vst [vmem:[%s8328_s25 + $0x1d0] sm:$0xff] %v4180_v51  ;;  %v4353_v51 = vld [vmem:[%s8328_s25 + $0x148] sm:$0xff] (%p8777_p12)  ;;  %4350 = vst [vmem:[%s8517_s2 + $0x258] sm:$0xff] (%p8777_p12), %v4349_v20 }
 0x85f   : > { %4352 = vst [vmem:[%s8517_s2 + $0x280] sm:$0xff] (%p8777_p12), %v4351_v41  ;;  %4354 = vst [vmem:[%s8517_s2 + $0x288] sm:$0xff] (%p8777_p12), %v4353_v51 }
 0x868   : > { %v4055_v45 = vpop.permute.xlu0 %4054 }
 0x869   : > { %v4151_v26 = vsel %vm4150_vm6, %v6118_v5, %v4055_v45  ;;  %4185 = vst.msk [vmem:[%s8328_s25 + $0x8] sm:$0xff] %vm4184_vm7, %v4055_v45  ;;  %v4369_v5 = vld [vmem:[%s8328_s25 + $0x188] sm:$0xff] (%p8777_p12)  ;;  %v4371_v45 = vld [vmem:[%s8328_s25 + $0x190] sm:$0xff] (%p8777_p12) }
 0x86a   : > { %4183 = vst [vmem:[%s8328_s25] sm:$0xff] %v4151_v26  ;;  %4370 = vst [vmem:[%s8517_s2 + $0x308] sm:$0xff] (%p8777_p12), %v4369_v5  ;;  %v4373_v26 = vld [vmem:[%s8328_s25 + $0x198] sm:$0xff] (%p8777_p12) }
 0x86b   : > { %4372 = vst [vmem:[%s8517_s2 + $0x310] sm:$0xff] (%p8777_p12), %v4371_v45  ;;  %4374 = vst [vmem:[%s8517_s2 + $0x318] sm:$0xff] (%p8777_p12), %v4373_v26 }
 0x86c   : > { %v4057_v57 = vpop.permute.xlu0 %4056 }
 0x86d   : > { %v4152_v47 = vsel %vm4150_vm6, %v6120_v23, %v4057_v57  ;;  %4187 = vst.msk [vmem:[%s8328_s25 + $0x18] sm:$0xff] %vm4184_vm7, %v4057_v57  ;;  %v4375_v23 = vld [vmem:[%s8328_s25 + $0x1a0] sm:$0xff] (%p8777_p12)  ;;  %v4377_v57 = vld [vmem:[%s8328_s25 + $0x1a8] sm:$0xff] (%p8777_p12) }
 0x86e   : > { %4186 = vst [vmem:[%s8328_s25 + $0x10] sm:$0xff] %v4152_v47  ;;  %4376 = vst [vmem:[%s8517_s2 + $0x340] sm:$0xff] (%p8777_p12), %v4375_v23  ;;  %v4379_v47 = vld [vmem:[%s8328_s25 + $0x1b0] sm:$0xff] (%p8777_p12) }
 0x86f   : > { %4378 = vst [vmem:[%s8517_s2 + $0x348] sm:$0xff] (%p8777_p12), %v4377_v57  ;;  %4380 = vst [vmem:[%s8517_s2 + $0x350] sm:$0xff] (%p8777_p12), %v4379_v47 }
 0x870   : > { %v4059_v22 = vpop.permute.xlu1 %4058  ;;  %v4115_v8 = vpop.permute.xlu0 %4114  ;;  %4254 = sbr.rel (!%p8777_p12) target bundleno = 2175 (0x87f), region = 124  ;;  %v4273_v32 = vld [vmem:[%s8328_s25 + $0x8] sm:$0xff] (%p8777_p12) }
 0x871   : > { %v4153_v16 = vsel %vm4150_vm6, %v6122_v34, %v4059_v22  ;;  %4189 = vst.msk [vmem:[%s8328_s25 + $0x28] sm:$0xff] %vm4184_vm7, %v4059_v22  ;;  %v4181_v3 = vsel %vm4150_vm6, %v6124_v4, %v4115_v8  ;;  %4245 = vst.msk [vmem:[%s8328_s25 + $0x1e8] sm:$0xff] %vm4184_vm7, %v4115_v8  ;;  %v4271_v6 = vld [vmem:[%s8328_s25] sm:$0xff] (%p8777_p12)  ;;  %v4381_v34 = vld [vmem:[%s8328_s25 + $0x1b8] sm:$0xff] (%p8777_p12) }
 0x872   : > { %4188 = vst [vmem:[%s8328_s25 + $0x20] sm:$0xff] %v4153_v16  ;;  %4244 = vst [vmem:[%s8328_s25 + $0x1e0] sm:$0xff] %v4181_v3  ;;  %v4383_v4 = vld [vmem:[%s8328_s25 + $0x1c0] sm:$0xff] (%p8777_p12)  ;;  %v4385_v22 = vld [vmem:[%s8328_s25 + $0x1c8] sm:$0xff] (%p8777_p12) }
 0x873   : > { %4272 = vst [vmem:[%s8517_s2] sm:$0xff] (%p8777_p12), %v4271_v6  ;;  %4274 = vst [vmem:[%s8517_s2 + $0x8] sm:$0xff] (%p8777_p12), %v4273_v32  ;;  %v4387_v8 = vld [vmem:[%s8328_s25 + $0x1d0] sm:$0xff] (%p8777_p12)  ;;  %v4389_v16 = vld [vmem:[%s8328_s25 + $0x1d8] sm:$0xff] (%p8777_p12) }
 0x874   : > { %v4117_v7 = vpop.permute.xlu1 %4116  ;;  %v4277_v56 = vld [vmem:[%s8328_s25 + $0x18] sm:$0xff] (%p8777_p12)  ;;  %4382 = vst [vmem:[%s8517_s2 + $0x358] sm:$0xff] (%p8777_p12), %v4381_v34  ;;  %4384 = vst [vmem:[%s8517_s2 + $0x380] sm:$0xff] (%p8777_p12), %v4383_v4 }
 0x875   : > { %v4182_v35 = vsel %vm4150_vm6, %v6126_v15, %v4117_v7  ;;  %4247 = vst.msk [vmem:[%s8328_s25 + $0x1f8] sm:$0xff] %vm4184_vm7, %v4117_v7  ;;  %v4275_v53 = vld [vmem:[%s8328_s25 + $0x10] sm:$0xff] (%p8777_p12)  ;;  %4278 = vst [vmem:[%s8517_s2 + $0x18] sm:$0xff] (%p8777_p12), %v4277_v56 }
 0x876   : > { %4246 = vst [vmem:[%s8328_s25 + $0x1f0] sm:$0xff] %v4182_v35  ;;  %4276 = vst [vmem:[%s8517_s2 + $0x10] sm:$0xff] (%p8777_p12), %v4275_v53 }
 0x877   : > { %4386 = vst [vmem:[%s8517_s2 + $0x388] sm:$0xff] %v4385_v22  ;;  %4388 = vst [vmem:[%s8517_s2 + $0x390] sm:$0xff] %v4387_v8 }
 0x878   : > { %v4281_v14 = vld [vmem:[%s8328_s25 + $0x28] sm:$0xff]  ;;  %4390 = vst [vmem:[%s8517_s2 + $0x398] sm:$0xff] %v4389_v16 }
 0x879   : > { %v4279_v19 = vld [vmem:[%s8328_s25 + $0x20] sm:$0xff]  ;;  %4282 = vst [vmem:[%s8517_s2 + $0x48] sm:$0xff] %v4281_v14  ;;  %v4393_v15 = vld [vmem:[%s8328_s25 + $0x1e8] sm:$0xff] }
 0x87a   : > { %4280 = vst [vmem:[%s8517_s2 + $0x40] sm:$0xff] %v4279_v19  ;;  %v4391_v3 = vld [vmem:[%s8328_s25 + $0x1e0] sm:$0xff]  ;;  %4394 = vst [vmem:[%s8517_s2 + $0x3c8] sm:$0xff] %v4393_v15 }
 0x87b   : > { %4392 = vst [vmem:[%s8517_s2 + $0x3c0] sm:$0xff] %v4391_v3 }
 0x87c   : > { %v4397_v35 = vld [vmem:[%s8328_s25 + $0x1f8] sm:$0xff] }
 0x87d   : > { %v4395_v7 = vld [vmem:[%s8328_s25 + $0x1f0] sm:$0xff]  ;;  %4398 = vst [vmem:[%s8517_s2 + $0x3d8] sm:$0xff] %v4397_v35 }
 0x87e   : > { %4396 = vst [vmem:[%s8517_s2 + $0x3d0] sm:$0xff] %v4395_v7 }
 0x87f PF: > { %s8779_s27 = sld [smem:[#allocation30_spill]]  ;;  %s8780_s25 = sld [smem:[#allocation29_spill]] }
 0x880   : > { %s8781_s26 = sld [smem:[#allocation31_spill]] }
 0x885   : > { %p27_p6 = scmp.ge.s32.totalorder %s8779_s27, 4  }
 0x887   :  { %29 = sbr.rel (!%p27_p6) target bundleno = 14 (0xe), region = 183 }
 0x88e   :  { %4414 = vsyncpa [#allocation3], 1 }
 0x88f   :  { %4416 = vsyncpa [#allocation3 + $0x1], 1 }
 0x890   :  { %4417 = vsyncpa [#allocation5], 1 }
 0x891   :  { %4418 = vsyncpa [#allocation8], 1 }
 0x892   :  { %4419 = vsyncpa [#allocation11], 1 }
 0x893   :  { %4420 = vsyncpa [#allocation14], 1 }
 0x894   :  { %4421 = vsyncpa [#allocation17], 1 }
 0x895   :  { %4422 = vsyncpa [#allocation20], 1 }

</bundles_post_ra>
